<compile_context>
chip_gen: v7x
topology: tpu7x:2x2x1
jax: 0.10.0
libtpu: 0.0.40
codegen_flags: <defaults>
</compile_context>

<pallas_src>
import jax
import jax.numpy as jnp
from jax.experimental import pallas as pl
from jax.experimental.pallas import tpu as pltpu

IN_DIM = 2
HID_DIM = 100
OUT_DIM = 1
PAD = 128          # padded hidden width (sublane axis inside the kernel)
NEG_SLOPE = 0.01   # nn.LeakyReLU default

_TM_ALIGN = 256    # batch-tile alignment (multiple of 128 lanes)
_MAX_TM = 4096     # cap: 2 x (128, TM) f32 intermediates ~= 4 MiB, safe on all
                   # generations' default scoped VMEM (v5e 16 MiB ... v7x 32 MiB)


def _round_up(n, m):
    return ((n + m - 1) // m) * m


def _choose_tile(n):
    """Pick the batch tile TM and padded batch n_pad for static batch size n."""
    n_min = _round_up(max(n, 1), _TM_ALIGN)
    if n_min <= _MAX_TM:
        # One grid step: no per-step pipeline overhead at all (ideal for the
        # single-TC v5e/v6e; for v7x the batch is too small to be worth
        # splitting across cores anyway).
        tm = n_min
    else:
        # Large batch: cap the tile so intermediates stay a few MiB; the grid
        # becomes >= 2 and the "parallel" axis shards across v7x's two TCs.
        tm = _MAX_TM
    return tm, _round_up(n, tm)


def _spectral_normalize(w, n_iter=20):
    """w: (out, in). Divide by largest singular value (power iteration)."""
    u = jnp.ones((w.shape[0],), jnp.float32)
    for _ in range(n_iter):
        v = w.T @ u
        v = v / (jnp.linalg.norm(v) + 1e-12)
        u = w @ v
        u = u / (jnp.linalg.norm(u) + 1e-12)
    sigma = u @ (w @ v)
    return w / sigma


def _pad2(w, rows, cols):
    out = jnp.zeros((rows, cols), jnp.float32)
    return out.at[: w.shape[0], : w.shape[1]].set(w)


def _mlp_kernel(x_ref, w1_ref, b1_ref, w2_ref, b2_ref, w3_ref, b3_ref, o_ref):
    # x_ref : (IN_DIM, TM)   raw transposed input batch tile
    # w1_ref: (PAD, IN_DIM)  layer-1 weight (out, in), zero-padded rows
    # b1_ref: (PAD, 1)       layer-1 bias (column)
    # w2_ref: (PAD, PAD)     layer-2 weight (out, in)
    # b2_ref: (PAD, 1)
    # w3_ref: (PAD, 1)       layer-3 weight as a column over hidden features
    # b3_ref: (1, 1)
    # o_ref : (1, TM)        lane-dense output row
    x = x_ref[...]                                           # (2, TM)
    w1 = w1_ref[...]                                         # (128, 2)

    # Layer 1: rank-2 input -> two VPU broadcast-FMAs (no MXU, no lane pad).
    h1 = w1[:, 0:1] * x[0:1, :] + w1[:, 1:2] * x[1:2, :] + b1_ref[...]
    h1 = jnp.where(h1 > 0, h1, NEG_SLOPE * h1)               # (128, TM)

    # Layer 2: the one real matmul, on the MXU, f32 accumulation, full f32
    # precision to preserve fidelity with the f32 PyTorch module.
    h2 = jnp.dot(w2_ref[...], h1,
                 preferred_element_type=jnp.float32,
                 precision=jax.lax.Precision.HIGHEST) + b2_ref[...]
    h2 = jnp.where(h2 > 0, h2, NEG_SLOPE * h2)               # (128, TM)

    # Layer 3: out_dim = 1 -> VPU multiply + sublane reduce -> lane-dense row.
    o = jnp.sum(h2 * w3_ref[...], axis=0, keepdims=True) + b3_ref[...]  # (1, TM)
    o_ref[...] = o.astype(o_ref.dtype)


@jax.jit
def discriminator_forward(x, params):
    """x: (N, 2) float32 -> (N, 1) float32."""
    w1, b1, w2, b2, w3, b3 = params
    n = x.shape[0]
    tm, n_pad = _choose_tile(n)

    # Transposed input: (2, n).  Only pad (cheap fused jnp.pad) when the batch
    # is not a multiple of the tile; no alloc+scatter in the common case.
    x_t = x.astype(jnp.float32).T
    if n_pad != n:
        x_t = jnp.pad(x_t, ((0, 0), (0, n_pad - n)))

    const = lambda i: (0, 0)  # weights/biases: constant block, fetched once

    out = pl.pallas_call(
        _mlp_kernel,
        out_shape=jax.ShapeDtypeStruct((1, n_pad), jnp.float32),
        grid_spec=pltpu.PrefetchScalarGridSpec(
            num_scalar_prefetch=0,
            grid=(n_pad // tm,),
            in_specs=[
                pl.BlockSpec((IN_DIM, tm), lambda i: (0, i)),  # x tile
                pl.BlockSpec((PAD, IN_DIM), const),            # w1
                pl.BlockSpec((PAD, 1), const),                 # b1
                pl.BlockSpec((PAD, PAD), const),               # w2
                pl.BlockSpec((PAD, 1), const),                 # b2
                pl.BlockSpec((PAD, 1), const),                 # w3
                pl.BlockSpec((1, 1), const),                   # b3
            ],
            out_specs=pl.BlockSpec((1, tm), lambda i: (0, i)),
        ),
        compiler_params=pltpu.CompilerParams(
            dimension_semantics=("parallel",)),
    )(x_t, w1, b1, w2, b2, w3, b3)

    row = out[0]
    if n_pad != n:
        row = row[:n]
    return row[:, None]


def init_params(key):
    """Deterministic init matching the module's layer shapes, with spectral norm."""
    # TODO(synk): PyTorch's spectral_norm updates its u/v power-iteration state
    # once per forward; here sigma is estimated once at init (frozen weights).
    k1, k2, k3, k4, k5, k6 = jax.random.split(key, 6)
    # PyTorch Linear weight shape is (out, in); spectral-normalize that, then
    # zero-pad into the kernel layout described in _mlp_kernel.
    w1 = _spectral_normalize(jax.random.normal(k1, (HID_DIM, IN_DIM)) * 0.5)
    w2 = _spectral_normalize(jax.random.normal(k2, (HID_DIM, HID_DIM)) * 0.1)
    w3 = _spectral_normalize(jax.random.normal(k3, (OUT_DIM, HID_DIM)) * 0.1)
    b1 = jax.random.normal(k4, (HID_DIM,)) * 0.05
    b2 = jax.random.normal(k5, (HID_DIM,)) * 0.05
    b3 = jax.random.normal(k6, (OUT_DIM,)) * 0.05

    w1p = _pad2(w1, PAD, IN_DIM)            # (128, 2)
    w2p = _pad2(w2, PAD, PAD)               # (128, 128)
    w3p = _pad2(w3.T, PAD, 1)               # (128, 1)
    b1p = _pad2(b1[:, None], PAD, 1)        # (128, 1)
    b2p = _pad2(b2[:, None], PAD, 1)        # (128, 1)
    b3p = b3.reshape(1, 1).astype(jnp.float32)
    return (w1p, b1p, w2p, b2p, w3p, b3p)


def _reference(x, params):
    """Plain-JAX reference of the same padded math (for a sanity check)."""
    w1, b1, w2, b2, w3, b3 = params
    xt = x.T.astype(jnp.float32)                                    # (2, N)
    h1 = w1[:, 0:1] * xt[0:1, :] + w1[:, 1:2] * xt[1:2, :] + b1
    h1 = jnp.where(h1 > 0, h1, NEG_SLOPE * h1)
    h2 = jnp.dot(w2, h1, precision=jax.lax.Precision.HIGHEST) + b2
    h2 = jnp.where(h2 > 0, h2, NEG_SLOPE * h2)
    o = jnp.sum(h2 * w3, axis=0, keepdims=True) + b3                # (1, N)
    return o.T                                                      # (N, 1)


if __name__ == "__main__":
    key = jax.random.PRNGKey(0)
    pkey, xkey1, xkey2 = jax.random.split(key, 3)
    params = init_params(pkey)

    # Case 1: small batch (N = 300), not tile-aligned -> exercises batch
    # padding, the single-grid-step path, and the final slice.
    n1 = 300
    x1 = jax.random.normal(xkey1, (n1, IN_DIM), dtype=jnp.float32)
    out1 = jax.block_until_ready(discriminator_forward(x1, params))
    ref1 = _reference(x1, params)
    assert out1.shape == (n1, OUT_DIM), out1.shape
    assert jnp.allclose(out1, ref1, atol=1e-4, rtol=1e-4)

    # Case 2: larger batch (N = 4500) -> TM capped at 4096, grid = 2, which
    # exercises the multi-step pipeline / megacore-parallel path.
    n2 = 4500
    x2 = jax.random.normal(xkey2, (n2, IN_DIM), dtype=jnp.float32)
    out2 = jax.block_until_ready(discriminator_forward(x2, params))
    ref2 = _reference(x2, params)
    assert out2.shape == (n2, OUT_DIM), out2.shape
    assert jnp.allclose(out2, ref2, atol=1e-4, rtol=1e-4)

    print("KERNEL_OK")
</pallas_src>

<mosaic_0001>
module attributes {stable_mosaic.version = 11 : i64} {
  func.func @_mlp_kernel(%arg0: i32, %arg1: memref<2x512xf32, #tpu.memory_space<vmem>>, %arg2: memref<128x2xf32, #tpu.memory_space<vmem>>, %arg3: memref<128x1xf32, #tpu.memory_space<vmem>>, %arg4: memref<128x128xf32, #tpu.memory_space<vmem>>, %arg5: memref<128x1xf32, #tpu.memory_space<vmem>>, %arg6: memref<128x1xf32, #tpu.memory_space<vmem>>, %arg7: memref<1x1xf32, #tpu.memory_space<vmem>>, %arg8: memref<1x512xf32, #tpu.memory_space<vmem>>) attributes {dimension_semantics = [#tpu.dimension_semantics<parallel>], iteration_bounds = array<i64: 1>, scalar_prefetch = 0 : i64, scratch_operands = 0 : i64, tpu.core_type = #tpu.core_type<tc>, window_params = [{transform_indices = @transform_0, window_bounds = array<i64: 2, 512>}, {pipeline_mode = #tpu.pipeline_mode<synchronous>, transform_indices = @transform_1, window_bounds = array<i64: 128, 2>}, {pipeline_mode = #tpu.pipeline_mode<synchronous>, transform_indices = @transform_2, window_bounds = array<i64: 128, 1>}, {pipeline_mode = #tpu.pipeline_mode<synchronous>, transform_indices = @transform_3, window_bounds = array<i64: 128, 128>}, {pipeline_mode = #tpu.pipeline_mode<synchronous>, transform_indices = @transform_4, window_bounds = array<i64: 128, 1>}, {pipeline_mode = #tpu.pipeline_mode<synchronous>, transform_indices = @transform_5, window_bounds = array<i64: 128, 1>}, {pipeline_mode = #tpu.pipeline_mode<synchronous>, transform_indices = @transform_6, window_bounds = array<i64: 1, 1>}, {transform_indices = @transform_7, window_bounds = array<i64: 1, 512>}]} {
    %c0 = arith.constant 0 : index
    %c0_0 = arith.constant 0 : index
    %0 = vector.load %arg1[%c0, %c0_0] : memref<2x512xf32, #tpu.memory_space<vmem>>, vector<2x512xf32>
    %c0_1 = arith.constant 0 : index
    %c0_2 = arith.constant 0 : index
    %1 = vector.load %arg2[%c0_1, %c0_2] : memref<128x2xf32, #tpu.memory_space<vmem>>, vector<128x2xf32>
    %2 = vector.extract_strided_slice %1 {offsets = [0, 0], sizes = [128, 1], strides = [1, 1]} : vector<128x2xf32> to vector<128x1xf32>
    %3 = vector.extract_strided_slice %0 {offsets = [0, 0], sizes = [1, 512], strides = [1, 1]} : vector<2x512xf32> to vector<1x512xf32>
    %4 = vector.broadcast %2 : vector<128x1xf32> to vector<128x512xf32>
    %5 = vector.broadcast %3 : vector<1x512xf32> to vector<128x512xf32>
    %6 = arith.mulf %4, %5 : vector<128x512xf32>
    %7 = vector.extract_strided_slice %1 {offsets = [0, 1], sizes = [128, 1], strides = [1, 1]} : vector<128x2xf32> to vector<128x1xf32>
    %8 = vector.extract_strided_slice %0 {offsets = [1, 0], sizes = [1, 512], strides = [1, 1]} : vector<2x512xf32> to vector<1x512xf32>
    %9 = vector.broadcast %7 : vector<128x1xf32> to vector<128x512xf32>
    %10 = vector.broadcast %8 : vector<1x512xf32> to vector<128x512xf32>
    %11 = arith.mulf %9, %10 : vector<128x512xf32>
    %12 = arith.addf %6, %11 : vector<128x512xf32>
    %c0_3 = arith.constant 0 : index
    %c0_4 = arith.constant 0 : index
    %13 = vector.load %arg3[%c0_3, %c0_4] : memref<128x1xf32, #tpu.memory_space<vmem>>, vector<128x1xf32>
    %14 = vector.broadcast %13 : vector<128x1xf32> to vector<128x512xf32>
    %15 = arith.addf %12, %14 : vector<128x512xf32>
    %cst = arith.constant 0.000000e+00 : f32
    %16 = vector.broadcast %cst : f32 to vector<128x512xf32>
    %17 = arith.cmpf ogt, %15, %16 : vector<128x512xf32>
    %cst_5 = arith.constant 0.00999999977 : f32
    %18 = vector.broadcast %cst_5 : f32 to vector<128x512xf32>
    %19 = arith.mulf %18, %15 : vector<128x512xf32>
    %20 = arith.select %17, %15, %19 : vector<128x512xi1>, vector<128x512xf32>
    %c0_6 = arith.constant 0 : index
    %c0_7 = arith.constant 0 : index
    %21 = vector.load %arg4[%c0_6, %c0_7] : memref<128x128xf32, #tpu.memory_space<vmem>>, vector<128x128xf32>
    %cst_8 = arith.constant dense<0.000000e+00> : vector<128x512xf32>
    %22 = tpu.matmul %21, %20, %cst_8 {dimension_numbers = #tpu.dot_dimension_numbers<[1], [0], [0], [1], [0, 0, 1, 1], [], []>, precision = #tpu.contract_precision<fp32>} : vector<128x128xf32>, vector<128x512xf32>, vector<128x512xf32> -> vector<128x512xf32>
    %c0_9 = arith.constant 0 : index
    %c0_10 = arith.constant 0 : index
    %23 = vector.load %arg5[%c0_9, %c0_10] : memref<128x1xf32, #tpu.memory_space<vmem>>, vector<128x1xf32>
    %24 = vector.broadcast %23 : vector<128x1xf32> to vector<128x512xf32>
    %25 = arith.addf %22, %24 : vector<128x512xf32>
    %cst_11 = arith.constant 0.000000e+00 : f32
    %26 = vector.broadcast %cst_11 : f32 to vector<128x512xf32>
    %27 = arith.cmpf ogt, %25, %26 : vector<128x512xf32>
    %cst_12 = arith.constant 0.00999999977 : f32
    %28 = vector.broadcast %cst_12 : f32 to vector<128x512xf32>
    %29 = arith.mulf %28, %25 : vector<128x512xf32>
    %30 = arith.select %27, %25, %29 : vector<128x512xi1>, vector<128x512xf32>
    %c0_13 = arith.constant 0 : index
    %c0_14 = arith.constant 0 : index
    %31 = vector.load %arg6[%c0_13, %c0_14] : memref<128x1xf32, #tpu.memory_space<vmem>>, vector<128x1xf32>
    %32 = vector.broadcast %31 : vector<128x1xf32> to vector<128x512xf32>
    %33 = arith.mulf %30, %32 : vector<128x512xf32>
    %cst_15 = arith.constant dense<0.000000e+00> : vector<512xf32>
    %34 = vector.multi_reduction <add>, %33, %cst_15 [0] : vector<128x512xf32> to vector<512xf32>
    %35 = vector.shape_cast %34 : vector<512xf32> to vector<1x512xf32>
    %c0_16 = arith.constant 0 : index
    %c0_17 = arith.constant 0 : index
    %36 = vector.load %arg7[%c0_16, %c0_17] : memref<1x1xf32, #tpu.memory_space<vmem>>, vector<1x1xf32>
    %37 = vector.broadcast %36 : vector<1x1xf32> to vector<1x512xf32>
    %38 = arith.addf %35, %37 : vector<1x512xf32>
    %c0_18 = arith.constant 0 : index
    %c0_19 = arith.constant 0 : index
    %39 = vector.load %arg8[%c0_18, %c0_19] : memref<1x512xf32, #tpu.memory_space<vmem>>, vector<1x512xf32>
    tpu.vector_store %arg8[%c0_18, %c0_19], %38 {strides = array<i32>} : memref<1x512xf32, #tpu.memory_space<vmem>>, vector<1x512xf32>,
    return
  }
  func.func @transform_0(%arg0: i32) -> (i32, i32) {
    %c0_i32 = arith.constant 0 : i32
    %c0_i32_0 = arith.constant 0 : i32
    return %c0_i32, %arg0 : i32, i32
  }
  func.func @transform_1(%arg0: i32) -> (i32, i32) {
    %c0_i32 = arith.constant 0 : i32
    %c0_i32_0 = arith.constant 0 : i32
    %c0_i32_1 = arith.constant 0 : i32
    return %c0_i32, %c0_i32_0 : i32, i32
  }
  func.func @transform_2(%arg0: i32) -> (i32, i32) {
    %c0_i32 = arith.constant 0 : i32
    %c0_i32_0 = arith.constant 0 : i32
    %c0_i32_1 = arith.constant 0 : i32
    return %c0_i32, %c0_i32_0 : i32, i32
  }
  func.func @transform_3(%arg0: i32) -> (i32, i32) {
    %c0_i32 = arith.constant 0 : i32
    %c0_i32_0 = arith.constant 0 : i32
    %c0_i32_1 = arith.constant 0 : i32
    return %c0_i32, %c0_i32_0 : i32, i32
  }
  func.func @transform_4(%arg0: i32) -> (i32, i32) {
    %c0_i32 = arith.constant 0 : i32
    %c0_i32_0 = arith.constant 0 : i32
    %c0_i32_1 = arith.constant 0 : i32
    return %c0_i32, %c0_i32_0 : i32, i32
  }
  func.func @transform_5(%arg0: i32) -> (i32, i32) {
    %c0_i32 = arith.constant 0 : i32
    %c0_i32_0 = arith.constant 0 : i32
    %c0_i32_1 = arith.constant 0 : i32
    return %c0_i32, %c0_i32_0 : i32, i32
  }
  func.func @transform_6(%arg0: i32) -> (i32, i32) {
    %c0_i32 = arith.constant 0 : i32
    %c0_i32_0 = arith.constant 0 : i32
    %c0_i32_1 = arith.constant 0 : i32
    return %c0_i32, %c0_i32_0 : i32, i32
  }
  func.func @transform_7(%arg0: i32) -> (i32, i32) {
    %c0_i32 = arith.constant 0 : i32
    %c0_i32_0 = arith.constant 0 : i32
    return %c0_i32, %arg0 : i32, i32
  }
}

</mosaic_0001>

<bundles_post_ra>
// kernel: discriminator_forward.1
= control target key start
LH: loop header
LB: loop body
LE: loop exit
PB: predicated region body
PF: predicated region fallthrough
CT: control target
= control target key end

     0   :  { %v5376_v0 = vmov 1   ;;  %v5377_v8 = vmov 0   ;;  %v8024_v47 = vlaneseq  ;;  %s8016_s1 = inlined_call_operand.vmem [shape: f32[128,2], index: 1, kind: input, shape index: {}]   ;;  %s8017_s6 = inlined_call_operand.<no memory space> [shape: f32[1,1], index: 6, kind: input, shape index: {}]   ;;  %s8018_s2 = inlined_call_operand.vmem [shape: f32[128,1], index: 2, kind: input, shape index: {}]   ;;  %s8019_s4 = inlined_call_operand.vmem [shape: f32[128,1], index: 4, kind: input, shape index: {}]   ;;  %s8020_s5 = inlined_call_operand.vmem [shape: f32[128,1], index: 5, kind: input, shape index: {}]   ;;  %s8021_s0 = inlined_call_operand.vmem [shape: f32[2,512], index: 0, kind: input, shape index: {}]   ;;  %s8022_s3 = inlined_call_operand.vmem [shape: f32[128,128], index: 3, kind: input, shape index: {}]   ;;  %s8023_s7 = inlined_call_operand.vmem [shape: f32[1,512], index: 7, kind: output, shape index: {}]  }
   0x1   :  { %5360 = vset.pattern.permute.xlu0 %v5376_v0  ;;  %5358 = vset.pattern.permute.xlu1 %v5376_v0  ;;  %v31_v1 = vld [vmem:[%s8016_s1 + $0x10] sm:$0xff]  ;;  %v29_v2 = vld [vmem:[%s8016_s1] sm:$0xff]  ;;  %v12_v3 = vstv %s8017_s6  ;;  %v30_v5 = vld [vmem:[%s8016_s1 + $0x8] sm:$0xff] }
   0x2   :  { %235 = vperm.xlu0 %5360, %v31_v1   ;;  %227 = vperm.xlu1 %5358, %v29_v2   ;;  %13 = vst [vmem:[#allocation2] sm:$0x1] %v12_v3  ;;  %v33_v4 = vld [vmem:[%s8016_s1 + $0x20] sm:$0xff]  ;;  %v35_v6 = vld [vmem:[%s8016_s1 + $0x30] sm:$0xff]  ;;  %v32_v7 = vld [vmem:[%s8016_s1 + $0x18] sm:$0xff]  ;;  %v5588_v50 = vshrl.u32 %v8024_v47, 7 }
   0x3   :  { %v37_v9 = vld [vmem:[%s8016_s1 + $0x40] sm:$0xff]  ;;  %v39_v10 = vld [vmem:[%s8016_s1 + $0x50] sm:$0xff]  ;;  %v34_v14 = vld [vmem:[%s8016_s1 + $0x28] sm:$0xff] }
   0x4   :  { %v454_v11 = vld [vmem:[%s8018_s2] sm:$0xff]  ;;  %v5464_v13 = vld [vmem:[%s8016_s1 + $0x70] sm:$0xff]  ;;  %v455_v16 = vld [vmem:[%s8018_s2 + $0x8] sm:$0xff]  ;;  %8335 = vst [vmem:[#allocation3_spill] sm:$0xff] %v5588_v50  ;;  %v292_v55 = vsub.s32 1, %v5588_v50  ;;  %v296_v56 = vsub.s32 3, %v5588_v50 }
   0x5   :  { %v5457_v12 = vld [vmem:[%s8016_s1 + $0x60] sm:$0xff]  ;;  %v456_v15 = vld [vmem:[%s8018_s2 + $0x10] sm:$0xff]  ;;  %v457_v17 = vld [vmem:[%s8018_s2 + $0x18] sm:$0xff]  ;;  %v300_v57 = vsub.s32 5, %v5588_v50  ;;  %v304_v60 = vsub.s32 7, %v5588_v50  ;;  %v5604_v63 = vsub.s32 0, %v5588_v50 }
   0x6   :  { %243 = vperm.xlu0 %5360, %v33_v4   ;;  %231 = vperm.xlu1 %5358, %v30_v5   ;;  %v36_v18 = vld [vmem:[%s8016_s1 + $0x38] sm:$0xff]  ;;  %v459_v19 = vld [vmem:[%s8018_s2 + $0x28] sm:$0xff]  ;;  %v458_v21 = vld [vmem:[%s8018_s2 + $0x20] sm:$0xff] }
   0x7   :  { %v461_v20 = vld [vmem:[%s8018_s2 + $0x38] sm:$0xff]  ;;  %v463_v22 = vld [vmem:[%s8018_s2 + $0x48] sm:$0xff]  ;;  %v822_v26 = vld [vmem:[%s8019_s4] sm:$0xff]  ;;  %8336 = vst [vmem:[#allocation4_spill] sm:$0xff] %v5604_v63 }
   0x8   :  { %v465_v23 = vld [vmem:[%s8018_s2 + $0x58] sm:$0xff]  ;;  %v38_v24 = vld [vmem:[%s8016_s1 + $0x48] sm:$0xff]  ;;  %v824_v27 = vld [vmem:[%s8019_s4 + $0x10] sm:$0xff] }
   0x9   :  { %v467_v25 = vld [vmem:[%s8018_s2 + $0x68] sm:$0xff]  ;;  %v460_v28 = vld [vmem:[%s8018_s2 + $0x30] sm:$0xff]  ;;  %v4290_v29 = vld [vmem:[%s8020_s5] sm:$0xff] }
   0xa   :  { %251 = vperm.xlu0 %5360, %v35_v6   ;;  %5359 = vset.pattern.permute.xlu1 %v5377_v8  ;;  %v826_v30 = vld [vmem:[%s8019_s4 + $0x20] sm:$0xff]  ;;  %v40_v31 = vld [vmem:[%s8016_s1 + $0x58] sm:$0xff]  ;;  %v827_v32 = vld [vmem:[%s8019_s4 + $0x28] sm:$0xff] }
   0xb   :  { %62 = vperm.xlu1 %5359, %v32_v7   ;;  %v828_v33 = vld [vmem:[%s8019_s4 + $0x30] sm:$0xff]  ;;  %v462_v34 = vld [vmem:[%s8018_s2 + $0x40] sm:$0xff]  ;;  %v829_v35 = vld [vmem:[%s8019_s4 + $0x38] sm:$0xff] }
   0xc   :  { %v830_v36 = vld [vmem:[%s8019_s4 + $0x40] sm:$0xff]  ;;  %v42_v37 = vld [vmem:[%s8016_s1 + $0x68] sm:$0xff]  ;;  %v832_v39 = vld [vmem:[%s8019_s4 + $0x50] sm:$0xff] }
   0xd   :  { %v831_v38 = vld [vmem:[%s8019_s4 + $0x48] sm:$0xff]  ;;  %v833_v40 = vld [vmem:[%s8019_s4 + $0x58] sm:$0xff]  ;;  %v464_v41 = vld [vmem:[%s8018_s2 + $0x50] sm:$0xff] }
   0xe   :  { %259 = vperm.xlu0 %5360, %v37_v9   ;;  %v834_v42 = vld [vmem:[%s8019_s4 + $0x60] sm:$0xff]  ;;  %v835_v43 = vld [vmem:[%s8019_s4 + $0x68] sm:$0xff]  ;;  %v44_v44 = vld [vmem:[%s8016_s1 + $0x78] sm:$0xff] }
   0xf   :  { %5361 = vset.pattern.permute.xlu1 %v5376_v0  ;;  %v836_v45 = vld [vmem:[%s8019_s4 + $0x70] sm:$0xff]  ;;  %v837_v46 = vld [vmem:[%s8019_s4 + $0x78] sm:$0xff]  ;;  %v466_v48 = vld [vmem:[%s8018_s2 + $0x60] sm:$0xff] }
  0x10   :  { %239 = vperm.xlu1 %5361, %v32_v7   ;;  %v4304_v49 = vld [vmem:[%s8020_s5 + $0x70] sm:$0xff]  ;;  %v4534_v54 = vld [vmem:[#allocation2] sm:$0x1]  ;;  %v469_v62 = vld [vmem:[%s8018_s2 + $0x78] sm:$0xff] }
  0x11   :  { %v468_v53 = vld [vmem:[%s8018_s2 + $0x70] sm:$0xff]  ;;  %v28_v61 = vld [vmem:[%s8021_s0] sm:$0xff] }
  0x12   :  { %267 = vperm.xlu0 %5360, %v39_v10   ;;  %v297_v3 = vrot.slane %v28_v61, %v296_v56  ;;  %v305_v7 = vrot.slane %v28_v61, %v304_v60 }
  0x14   :  { %5362 = vset.pattern.permute.xlu1 %v5377_v8 }
  0x15   :  { %472 = vperm.xlu1 %5362, %v454_v11  }
  0x16   :  { %275 = vperm.xlu0 %5360, %v5457_v12  }
  0x19   :  { %67 = vperm.xlu1 %5362, %v33_v4   ;;  %v301_v4 = vrot.slane %v28_v61, %v300_v57 }
  0x1a   :  { %283 = vperm.xlu0 %5360, %v5464_v13  }
  0x1d   :  { %72 = vperm.xlu1 %5362, %v34_v14  }
  0x1e   :  { %5373 = vset.pattern.permute.xlu0 %v5377_v8 }
  0x1f   :  { %47 = vperm.xlu0 %5373, %v29_v2   ;;  %v293_v2 = vrot.slane %v28_v61, %v292_v55 }
  0x21   :  { %5363 = vset.pattern.permute.xlu1 %v5376_v0 }
  0x22   :  { %247 = vperm.xlu1 %5363, %v34_v14   ;;  %v5615_v14 = vrot.slane %v297_v3, %v292_v55 }
  0x23   :  { %52 = vperm.xlu0 %5373, %v30_v5  }
  0x24   :  { %8338 = vst [vmem:[#allocation6_spill] sm:$0xff] %v5615_v14 }
  0x26   :  { %5364 = vset.pattern.permute.xlu1 %v5377_v8 }
  0x27   :  { %57 = vperm.xlu0 %5373, %v31_v1   ;;  %482 = vperm.xlu1 %5364, %v456_v15   ;;  %v136_v1 = vsub.s32 4, %v5588_v50  ;;  %v5617_v15 = vrot.slane %v301_v4, %v292_v55 }
  0x29   :  { %8339 = vst [vmem:[#allocation7_spill] sm:$0xff] %v5617_v15 }
  0x2b   :  { %477 = vperm.xlu0 %5373, %v455_v16   ;;  %77 = vperm.xlu1 %5364, %v35_v6   ;;  %v140_v6 = vsub.s32 6, %v5588_v50 }
  0x2d   :  { %v141_v16 = vrot.slane %v28_v61, %v140_v6 }
  0x2f   :  { %487 = vperm.xlu0 %5373, %v457_v17   ;;  %82 = vperm.xlu1 %5364, %v36_v18  }
  0x33   :  { %497 = vperm.xlu0 %5373, %v459_v19   ;;  %5365 = vset.pattern.permute.xlu1 %v5376_v0  ;;  %v825_v19 = vld [vmem:[%s8019_s4 + $0x18] sm:$0xff] }
  0x34   :  { %255 = vperm.xlu1 %5365, %v36_v18   ;;  %v5619_v18 = vrot.slane %v305_v7, %v292_v55 }
  0x36   :  { %8340 = vst [vmem:[#allocation8_spill] sm:$0xff] %v5619_v18 }
  0x37   :  { %507 = vperm.xlu0 %5373, %v461_v20  }
  0x38   :  { %5366 = vset.pattern.permute.xlu1 %v5377_v8 }
  0x39   :  { %492 = vperm.xlu1 %5366, %v458_v21  }
  0x3b   :  { %517 = vperm.xlu0 %5373, %v463_v22  }
  0x3d   :  { %87 = vperm.xlu1 %5366, %v37_v9   ;;  %v823_v9 = vld [vmem:[%s8019_s4 + $0x8] sm:$0xff] }
  0x3f   :  { %527 = vperm.xlu0 %5373, %v465_v23  }
  0x41   :  { %92 = vperm.xlu1 %5366, %v38_v24  }
  0x43   :  { %537 = vperm.xlu0 %5373, %v467_v25  }
  0x45   :  { %5367 = vset.pattern.permute.xlu1 %v5376_v0 }
  0x46   :  { %263 = vperm.xlu1 %5367, %v38_v24  }
  0x47   :  { %840 = vperm.xlu0 %5373, %v822_v26  }
  0x4a   :  { %5368 = vset.pattern.permute.xlu1 %v5377_v8 }
  0x4b   :  { %850 = vperm.xlu0 %5373, %v824_v27   ;;  %502 = vperm.xlu1 %5368, %v460_v28   ;;  %v5643_v27 = vrot.slane %v141_v16, %v5604_v63 }
  0x4f   :  { %4308 = vperm.xlu0 %5373, %v4290_v29   ;;  %97 = vperm.xlu1 %5368, %v39_v10   ;;  %v129_v10 = vrot.slane %v28_v61, %v5604_v63 }
  0x51   :  { %v5625_v21 = vrot.slane %v129_v10, %v5604_v63  ;;  %v4293_v10 = vld [vmem:[%s8020_s5 + $0x18] sm:$0xff] }
  0x53   :  { %860 = vperm.xlu0 %5373, %v826_v30   ;;  %102 = vperm.xlu1 %5368, %v40_v31  }
  0x57   :  { %865 = vperm.xlu0 %5373, %v827_v32   ;;  %5369 = vset.pattern.permute.xlu1 %v5376_v0 }
  0x58   :  { %271 = vperm.xlu1 %5369, %v40_v31  }
  0x5b   :  { %870 = vperm.xlu0 %5373, %v828_v33   ;;  %v4291_v33 = vld [vmem:[%s8020_s5 + $0x8] sm:$0xff] }
  0x5c   :  { %5370 = vset.pattern.permute.xlu1 %v5377_v8 }
  0x5d   :  { %512 = vperm.xlu1 %5370, %v462_v34  }
  0x5f   :  { %875 = vperm.xlu0 %5373, %v829_v35  }
  0x61   :  { %107 = vperm.xlu1 %5370, %v5457_v12   ;;  %v137_v12 = vrot.slane %v28_v61, %v136_v1 }
  0x63   :  { %880 = vperm.xlu0 %5373, %v830_v36   ;;  %v5631_v23 = vrot.slane %v137_v12, %v5604_v63 }
  0x65   :  { %112 = vperm.xlu1 %5370, %v42_v37  }
  0x67   :  { %885 = vperm.xlu0 %5373, %v831_v38  }
  0x69   :  { %5371 = vset.pattern.permute.xlu1 %v5376_v0 }
  0x6a   :  { %279 = vperm.xlu1 %5371, %v42_v37  }
  0x6b   :  { %890 = vperm.xlu0 %5373, %v832_v39  }
  0x6e   :  { %5372 = vset.pattern.permute.xlu1 %v5377_v8 }
  0x6f   :  { %895 = vperm.xlu0 %5373, %v833_v40   ;;  %522 = vperm.xlu1 %5372, %v464_v41  }
  0x73   :  { %900 = vperm.xlu0 %5373, %v834_v42   ;;  %117 = vperm.xlu1 %5372, %v5464_v13   ;;  %v5613_v13 = vrot.slane %v293_v2, %v292_v55 }
  0x75   :  { %8337 = vst [vmem:[#allocation5_spill] sm:$0xff] %v5613_v13 }
  0x77   :  { %905 = vperm.xlu0 %5373, %v835_v43   ;;  %122 = vperm.xlu1 %5372, %v44_v44  }
  0x7b   :  { %910 = vperm.xlu0 %5373, %v836_v45   ;;  %5374 = vset.pattern.permute.xlu1 %v5376_v0  ;;  %v132_v0 = vsub.s32 2, %v5588_v50 }
  0x7c   :  { %287 = vperm.xlu1 %5374, %v44_v44  }
  0x7d   :  { %v133_v11 = vrot.slane %v28_v61, %v132_v0 }
  0x7f   :  { %915 = vperm.xlu0 %5373, %v837_v46   ;;  %v5628_v22 = vrot.slane %v133_v11, %v5604_v63 }
  0x80   :  { %5375 = vset.pattern.permute.xlu1 %v5377_v8 }
  0x81   :  { %532 = vperm.xlu1 %5375, %v466_v48   ;;  %v228_v51 = vpop.permute.xlu1 %227  ;;  %v236_v52 = vpop.permute.xlu0 %235 }
  0x82   :  { %v5634_v24 = vmul.f32 %v5613_v13, %v228_v51  ;;  %v5637_v25 = vmul.f32 %v5615_v14, %v228_v51  ;;  %v5640_v26 = vmul.f32 %v5617_v15, %v228_v51  ;;  %v5646_v29 = vmul.f32 %v5619_v18, %v228_v51 }
  0x83   :  { %4378 = vperm.xlu0 %5373, %v4304_v49   ;;  %v5649_v30 = vmul.f32 %v5613_v13, %v236_v52  ;;  %v5652_v31 = vmul.f32 %v5615_v14, %v236_v52  ;;  %v5655_v32 = vmul.f32 %v5617_v15, %v236_v52  ;;  %v5661_v34 = vmul.f32 %v5619_v18, %v236_v52 }
  0x85   :  { %542 = vperm.xlu1 %5375, %v468_v53   ;;  %v232_v58 = vpop.permute.xlu1 %231  ;;  %v244_v59 = vpop.permute.xlu0 %243 }
  0x86   :  { %v5664_v35 = vmul.f32 %v5613_v13, %v232_v58  ;;  %v5667_v36 = vmul.f32 %v5615_v14, %v232_v58  ;;  %v5670_v37 = vmul.f32 %v5617_v15, %v232_v58  ;;  %v5673_v38 = vmul.f32 %v5619_v18, %v232_v58 }
  0x87   :  { %4537 = vperm.xlu0 %5373, %v4534_v54   ;;  %v342_v39 = vmul.f32 %v5613_v13, %v244_v59  ;;  %v343_v40 = vmul.f32 %v5615_v14, %v244_v59  ;;  %v344_v41 = vmul.f32 %v5617_v15, %v244_v59  ;;  %v345_v43 = vmul.f32 %v5619_v18, %v244_v59  ;;  %v4292_v54 = vld [vmem:[%s8020_s5 + $0x10] sm:$0xff] }
  0x89   :  { %547 = vperm.xlu1 %5375, %v469_v62   ;;  %v252_v5 = vpop.permute.xlu0 %251 }
  0x8a   :  { %v63_v8 = vpop.permute.xlu1 %62  ;;  %v5682_v44 = vmul.f32 %v5613_v13, %v252_v5  ;;  %v5685_v45 = vmul.f32 %v5615_v14, %v252_v5  ;;  %v5688_v46 = vmul.f32 %v5617_v15, %v252_v5  ;;  %v5691_v49 = vmul.f32 %v5619_v18, %v252_v5 }
  0x8b   :  { %v174_v51 = vmul.f32 %v5625_v21, %v63_v8  ;;  %v175_v52 = vmul.f32 %v5628_v22, %v63_v8  ;;  %v176_v53 = vmul.f32 %v5631_v23, %v63_v8  ;;  %v177_v59 = vmul.f32 %v5643_v27, %v63_v8 }
  0x8c   :  { %8341 = vst [vmem:[#allocation9_spill] sm:$0xff] %v5682_v44  ;;  %8342 = vst [vmem:[#allocation10_spill] sm:$0xff] %v5685_v45 }
  0x8d   :  { %845 = vperm.xlu1 %5375, %v823_v9   ;;  %v260_v17 = vpop.permute.xlu0 %259  ;;  %8343 = vst [vmem:[#allocation11_spill] sm:$0xff] %v5688_v46  ;;  %8344 = vst [vmem:[#allocation12_spill] sm:$0xff] %v5691_v49 }
  0x8e   :  { %v5705_v60 = vmul.f32 %v5613_v13, %v260_v17  ;;  %v5708_v61 = vmul.f32 %v5615_v14, %v260_v17  ;;  %v5711_v62 = vmul.f32 %v5617_v15, %v260_v17  ;;  %v5714_v1 = vmul.f32 %v5619_v18, %v260_v17 }
  0x8f   :  { %v240_v20 = vpop.permute.xlu1 %239 }
  0x90   :  { %v338_v55 = vmul.f32 %v5613_v13, %v240_v20  ;;  %v339_v56 = vmul.f32 %v5615_v14, %v240_v20  ;;  %v340_v57 = vmul.f32 %v5617_v15, %v240_v20  ;;  %v341_v58 = vmul.f32 %v5619_v18, %v240_v20  ;;  %8345 = vst [vmem:[#allocation13_spill] sm:$0xff] %v5705_v60 }
  0x91   :  { %855 = vperm.xlu1 %5375, %v825_v19   ;;  %v268_v28 = vpop.permute.xlu0 %267  ;;  %8346 = vst [vmem:[#allocation14_spill] sm:$0xff] %v5708_v61  ;;  %8347 = vst [vmem:[#allocation15_spill] sm:$0xff] %v5711_v62 }
  0x92   :  { %8348 = vst [vmem:[#allocation16_spill] sm:$0xff] %v5714_v1  ;;  %v5717_v2 = vmul.f32 %v5613_v13, %v268_v28  ;;  %v5720_v3 = vmul.f32 %v5615_v14, %v268_v28  ;;  %v5723_v4 = vmul.f32 %v5617_v15, %v268_v28  ;;  %v5726_v6 = vmul.f32 %v5619_v18, %v268_v28 }
  0x93   :  { %v5734_v11 = vadd.f32 %v338_v55, %v174_v51  ;;  %v5736_v12 = vadd.f32 %v339_v56, %v175_v52  ;;  %v5738_v16 = vadd.f32 %v340_v57, %v176_v53  ;;  %v5740_v17 = vadd.f32 %v341_v58, %v177_v59  ;;  %v4294_v58 = vld [vmem:[%s8020_s5 + $0x20] sm:$0xff] }
  0x94   :  { %v5678_v42 = vpop.permute.xlu1 %472  ;;  %8349 = vst [vmem:[#allocation17_spill] sm:$0xff] %v5717_v2  ;;  %8350 = vst [vmem:[#allocation18_spill] sm:$0xff] %v5720_v3 }
  0x95   :  { %4313 = vperm.xlu1 %5375, %v4291_v33   ;;  %v276_v48 = vpop.permute.xlu0 %275  ;;  %8351 = vst [vmem:[#allocation19_spill] sm:$0xff] %v5723_v4  ;;  %8352 = vst [vmem:[#allocation20_spill] sm:$0xff] %v5726_v6 }
  0x96   :  { %v5743_v19 = vmul.f32 %v5613_v13, %v276_v48  ;;  %v5746_v20 = vmul.f32 %v5615_v14, %v276_v48  ;;  %v5749_v28 = vmul.f32 %v5617_v15, %v276_v48  ;;  %v5753_v51 = vmul.f32 %v5619_v18, %v276_v48 }
  0x98   :  { %v68_v0 = vpop.permute.xlu1 %67  ;;  %8353 = vst [vmem:[#allocation21_spill] sm:$0xff] %v5743_v19  ;;  %8354 = vst [vmem:[#allocation22_spill] sm:$0xff] %v5746_v20 }
  0x99   :  { %4318 = vperm.xlu1 %5375, %v4292_v54   ;;  %v284_v5 = vpop.permute.xlu0 %283  ;;  %v178_v7 = vmul.f32 %v5625_v21, %v68_v0  ;;  %v179_v8 = vmul.f32 %v5628_v22, %v68_v0  ;;  %v180_v9 = vmul.f32 %v5631_v23, %v68_v0  ;;  %8355 = vst [vmem:[#allocation23_spill] sm:$0xff] %v5749_v28  ;;  %8356 = vst [vmem:[#allocation24_spill] sm:$0xff] %v5753_v51  ;;  %v4296_v28 = vld [vmem:[%s8020_s5 + $0x30] sm:$0xff] }
  0x9a   :  { %v181_v33 = vmul.f32 %v5643_v27, %v68_v0  ;;  %v5756_v52 = vmul.f32 %v5613_v13, %v284_v5  ;;  %v5759_v53 = vmul.f32 %v5615_v14, %v284_v5  ;;  %v5762_v55 = vmul.f32 %v5617_v15, %v284_v5 }
  0x9b   :  { %v5765_v56 = vmul.f32 %v5619_v18, %v284_v5  ;;  %v5770_v48 = vadd.f32 %v342_v39, %v178_v7  ;;  %v5772_v59 = vadd.f32 %v343_v40, %v179_v8  ;;  %v5774_v0 = vadd.f32 %v344_v41, %v180_v9 }
  0x9c   :  { %v73_v54 = vpop.permute.xlu1 %72  ;;  %8357 = vst [vmem:[#allocation25_spill] sm:$0xff] %v5756_v52  ;;  %8358 = vst [vmem:[#allocation26_spill] sm:$0xff] %v5759_v53  ;;  %v5783_v39 = vadd.f32 %v345_v43, %v181_v33 }
  0x9d   :  { %8359 = vst [vmem:[#allocation27_spill] sm:$0xff] %v5762_v55  ;;  %4323 = vperm.xlu1 %5375, %v4293_v10   ;;  %8360 = vst [vmem:[#allocation28_spill] sm:$0xff] %v5765_v56  ;;  %v182_v63 = vmul.f32 %v5625_v21, %v73_v54  ;;  %v183_v56 = vmul.f32 %v5628_v22, %v73_v54  ;;  %v184_v55 = vmul.f32 %v5631_v23, %v73_v54 }
  0x9e   :  { %v48_v57 = vpop.permute.xlu0 %47 }
  0x9f   :  { %v162_v47 = vmul.f32 %v5625_v21, %v48_v57  ;;  %v163_v50 = vmul.f32 %v5628_v22, %v48_v57  ;;  %v164_v10 = vmul.f32 %v5631_v23, %v48_v57  ;;  %v165_v5 = vmul.f32 %v5643_v27, %v48_v57 }
  0xa1   :  { %v390_v40 = vadd.f32 %v5634_v24, %v162_v47  ;;  %v391_v41 = vadd.f32 %v5637_v25, %v163_v50  ;;  %v392_v7 = vadd.f32 %v5640_v26, %v164_v10  ;;  %v393_v8 = vadd.f32 %v5646_v29, %v165_v5  ;;  %4328 = vperm.xlu1 %5375, %v4294_v58   ;;  %v248_v9 = vpop.permute.xlu1 %247  ;;  %v4295_v47 = vld [vmem:[%s8020_s5 + $0x28] sm:$0xff] }
  0xa2   :  { %v346_v57 = vmul.f32 %v5613_v13, %v248_v9  ;;  %v347_v53 = vmul.f32 %v5615_v14, %v248_v9  ;;  %v348_v52 = vmul.f32 %v5617_v15, %v248_v9  ;;  %v349_v51 = vmul.f32 %v5619_v18, %v248_v9  ;;  %v53_v43 = vpop.permute.xlu0 %52 }
  0xa3   :  { %v185_v50 = vmul.f32 %v5643_v27, %v73_v54  ;;  %v5798_v24 = vadd.f32 %v5678_v42, %v390_v40  ;;  %v551_v25 = vadd.f32 %v5678_v42, %v391_v41  ;;  %v553_v26 = vadd.f32 %v5678_v42, %v393_v8 }
  0xa4   :  { %v166_v29 = vmul.f32 %v5625_v21, %v53_v43  ;;  %v167_v33 = vmul.f32 %v5628_v22, %v53_v43  ;;  %v168_v58 = vmul.f32 %v5631_v23, %v53_v43  ;;  %v169_v10 = vmul.f32 %v5643_v27, %v53_v43 }
  0xa5   :  { %v5807_v5 = vadd.f32 %v5678_v42, %v392_v7  ;;  %4333 = vperm.xlu1 %5375, %v4295_v47   ;;  %v5809_v54 = vadd.f32 %v346_v57, %v182_v63  ;;  %v5811_v40 = vadd.f32 %v347_v53, %v183_v56  ;;  %v5813_v9 = vadd.f32 %v348_v52, %v184_v55 }
  0xa6   :  { %v58_v41 = vpop.permute.xlu0 %57  ;;  %v483_v8 = vpop.permute.xlu1 %482  ;;  %v394_v20 = vadd.f32 %v5664_v35, %v166_v29  ;;  %v395_v43 = vadd.f32 %v5667_v36, %v167_v33  ;;  %v396_v42 = vadd.f32 %v5670_v37, %v168_v58  ;;  %v5821_v7 = vadd.f32 %v349_v51, %v185_v50  ;;  %v4297_v33 = vld [vmem:[%s8020_s5 + $0x38] sm:$0xff] }
  0xa7   :  { %v170_v63 = vmul.f32 %v5625_v21, %v58_v41  ;;  %v171_v53 = vmul.f32 %v5628_v22, %v58_v41  ;;  %v172_v52 = vmul.f32 %v5631_v23, %v58_v41  ;;  %v173_v55 = vmul.f32 %v5643_v27, %v58_v41 }
  0xa8   :  { %v397_v56 = vadd.f32 %v5673_v38, %v169_v10  ;;  %vm615_vm0 = vcmp.gt.f32.partialorder %v551_v25, 0.0  ;;  %v679_v57 = vmul.f32 0.01, %v551_v25  ;;  %v681_v47 = vmul.f32 0.01, %v553_v26 }
  0xa9   :  { %v398_v35 = vadd.f32 %v5649_v30, %v170_v63  ;;  %v399_v36 = vadd.f32 %v5652_v31, %v171_v53  ;;  %v400_v37 = vadd.f32 %v5655_v32, %v172_v52  ;;  %v401_v51 = vadd.f32 %v5661_v34, %v173_v55  ;;  %4338 = vperm.xlu1 %5375, %v4296_v28  }
  0xaa   :  { %v478_v50 = vpop.permute.xlu0 %477  ;;  %v78_v29 = vpop.permute.xlu1 %77  ;;  %v5835_v58 = vsel %vm615_vm0, %v551_v25, %v679_v57  ;;  %vm617_vm1 = vcmp.gt.f32.partialorder %v553_v26, 0.0  ;;  %vm614_vm2 = vcmp.gt.f32.partialorder %v5798_v24, 0.0  ;;  %v678_v30 = vmul.f32 0.01, %v5798_v24  ;;  %v4298_v25 = vld [vmem:[%s8020_s5 + $0x40] sm:$0xff] }
  0xab   :  { %v5839_v38 = vadd.f32 %v483_v8, %v398_v35  ;;  %v5841_v31 = vadd.f32 %v483_v8, %v399_v36  ;;  %v5843_v32 = vadd.f32 %v483_v8, %v400_v37  ;;  %v5845_v34 = vadd.f32 %v483_v8, %v401_v51 }
  0xac   :  { %v554_v28 = vadd.f32 %v478_v50, %v394_v20  ;;  %v555_v10 = vadd.f32 %v478_v50, %v395_v43  ;;  %v5847_v41 = vadd.f32 %v478_v50, %v396_v42  ;;  %v557_v63 = vadd.f32 %v478_v50, %v397_v56 }
  0xad   :  { %v5853_v53 = vmul.f32 0.01, %v5839_v38  ;;  %v5856_v52 = vmul.f32 0.01, %v5841_v31  ;;  %v5859_v55 = vmul.f32 0.01, %v5843_v32  ;;  %4343 = vperm.xlu1 %5375, %v4297_v33   ;;  %v745_v20 = vsel %vm617_vm1, %v553_v26, %v681_v47 }
  0xae   :  { %v5863_v8 = vmul.f32 0.01, %v5845_v34  ;;  %v682_v43 = vmul.f32 0.01, %v554_v28  ;;  %v683_v42 = vmul.f32 0.01, %v555_v10  ;;  %v5866_v56 = vmul.f32 %v5625_v21, %v78_v29  ;;  %v488_v57 = vpop.permute.xlu0 %487  ;;  %v83_v35 = vpop.permute.xlu1 %82 }
  0xaf   :  { %v5869_v36 = vmul.f32 0.01, %v5847_v41  ;;  %v685_v37 = vmul.f32 0.01, %v557_v63  ;;  %v5872_v51 = vmul.f32 %v5628_v22, %v78_v29  ;;  %v5875_v50 = vmul.f32 %v5631_v23, %v78_v29 }
  0xb0   :  { %8361 = vst [vmem:[#allocation29_spill] sm:$0xff] %v5866_v56  ;;  %v5878_v26 = vadd.f32 %v488_v57, %v5734_v11  ;;  %v5881_v47 = vadd.f32 %v488_v57, %v5736_v12  ;;  %v5884_v33 = vadd.f32 %v488_v57, %v5738_v16  ;;  %v5887_v19 = vadd.f32 %v488_v57, %v5740_v17  ;;  %v4299_v11 = vld [vmem:[%s8020_s5 + $0x48] sm:$0xff] }
  0xb1   :  { %8362 = vst [vmem:[#allocation30_spill] sm:$0xff] %v5872_v51  ;;  %8363 = vst [vmem:[#allocation31_spill] sm:$0xff] %v5875_v50  ;;  %v5890_v6 = vmul.f32 %v5643_v27, %v78_v29  ;;  %v190_v4 = vmul.f32 %v5625_v21, %v83_v35  ;;  %v191_v3 = vmul.f32 %v5628_v22, %v83_v35  ;;  %4348 = vperm.xlu1 %5375, %v4298_v25  }
  0xb2   :  { %v192_v2 = vmul.f32 %v5631_v23, %v83_v35  ;;  %v5899_v12 = vmul.f32 0.01, %v5878_v26  ;;  %v5902_v16 = vmul.f32 0.01, %v5881_v47  ;;  %v5905_v17 = vmul.f32 0.01, %v5884_v33  ;;  %v498_v57 = vpop.permute.xlu0 %497 }
  0xb3   :  { %8364 = vst [vmem:[#allocation32_spill] sm:$0xff] %v5890_v6  ;;  %v193_v29 = vmul.f32 %v5643_v27, %v83_v35  ;;  %v5909_v1 = vadd.f32 %v498_v57, %v5809_v54  ;;  %v5912_v25 = vadd.f32 %v498_v57, %v5811_v40  ;;  %v5915_v62 = vadd.f32 %v498_v57, %v5813_v9  ;;  %v256_v61 = vpop.permute.xlu1 %255 }
  0xb4   :  { %v742_v60 = vsel %vm614_vm2, %v5798_v24, %v678_v30  ;;  %v5921_v49 = vmul.f32 0.01, %v5887_v19  ;;  %v5924_v35 = vadd.f32 %v498_v57, %v5821_v7  ;;  %v354_v54 = vmul.f32 %v5613_v13, %v256_v61  ;;  %v4300_v57 = vld [vmem:[%s8020_s5 + $0x50] sm:$0xff] }
  0xb5   :  { %v355_v6 = vmul.f32 %v5615_v14, %v256_v61  ;;  %v5929_v40 = vmul.f32 0.01, %v5909_v1  ;;  %v5932_v9 = vmul.f32 0.01, %v5912_v25  ;;  %v5935_v46 = vmul.f32 0.01, %v5915_v62  ;;  %4353 = vperm.xlu1 %5375, %v4299_v11  }
  0xb6   :  { %v356_v24 = vmul.f32 %v5617_v15, %v256_v61  ;;  %v357_v30 = vmul.f32 %v5619_v18, %v256_v61  ;;  %vm619_vm3 = vcmp.gt.f32.partialorder %v555_v10, 0.0  ;;  %v918_v7 = vand.u32 4294901760, %v5835_v58 }
  0xb7   :  { %8365 = vst [vmem:[#allocation33_spill] sm:$0xff] %v5935_v46  ;;  %vm621_vm4 = vcmp.gt.f32.partialorder %v557_v63, 0.0  ;;  %v747_v50 = vsel %vm619_vm3, %v555_v10, %v683_v42  ;;  %v2508_v51 = vand.u32 4294901760, %v745_v20  ;;  %vm618_vm5 = vcmp.gt.f32.partialorder %v554_v28, 0.0 }
  0xb8   :  { %v749_v45 = vsel %vm621_vm4, %v557_v63, %v685_v37  ;;  %v922_v44 = vand.u32 4294901760, %v747_v50  ;;  %v5944_v56 = vsub.f32 %v5835_v58, %v918_v7  ;;  %v746_v11 = vsel %vm618_vm5, %v554_v28, %v682_v43  ;;  %v493_v14 = vpop.permute.xlu1 %492  ;;  %v4301_v58 = vld [vmem:[%s8020_s5 + $0x58] sm:$0xff]  ;;  %v508_v37 = vpop.permute.xlu0 %507 }
  0xb9   :  { %v2512_v15 = vand.u32 4294901760, %v749_v45  ;;  %v5946_v61 = vsub.f32 %v745_v20, %v2508_v51  ;;  %v920_v18 = vand.u32 4294901760, %v742_v60  ;;  %v924_v13 = vand.u32 4294901760, %v746_v11  ;;  %4358 = vperm.xlu1 %5375, %v4300_v57  }
  0xba   :  { %8366 = vst [vmem:[#allocation34_spill] sm:$0xff] %v5944_v56  ;;  %vm616_vm6 = vcmp.gt.f32.partialorder %v5807_v5, 0.0  ;;  %v5949_v46 = vpack.c.bf16 %v922_v44, %v918_v7  ;;  %v5951_v10 = vsub.f32 %v747_v50, %v922_v44  ;;  %vm620_vm7 = vcmp.gt.f32.partialorder %v5847_v41, 0.0 }
  0xbb   :  { %8367 = vst [vmem:[#allocation35_spill] sm:$0xff] %v5946_v61  ;;  %v5953_v63 = vpack.c.bf16 %v2512_v15, %v2508_v51  ;;  %v5955_v42 = vsub.f32 %v749_v45, %v2512_v15  ;;  %v5960_v28 = vpack.c.bf16 %v924_v13, %v920_v18  ;;  %v5962_v20 = vsub.f32 %v742_v60, %v920_v18 }
  0xbc   :  { %8368 = vst [vmem:[#allocation36_spill] sm:$0xff] %v5949_v46  ;;  %8369 = vst [vmem:[#allocation37_spill] sm:$0xff] %v5951_v10  ;;  %v5964_v43 = vsub.f32 %v746_v11, %v924_v13  ;;  %4587 = vmatprep.subr.bf16.mxu0 %v5949_v46  ;;  %v680_v15 = vmul.f32 0.01, %v5807_v5  ;;  %v748_v44 = vsel %vm620_vm7, %v5847_v41, %v5869_v36  ;;  %v5972_v50 = vpop.permute.xlu1 %87  ;;  %vm623_vm8 = vcmp.gt.f32.partialorder %v5841_v31, 0.0 }
  0xbd   :  { %8370 = vst [vmem:[#allocation38_spill] sm:$0xff] %v5953_v63  ;;  %8371 = vst [vmem:[#allocation39_spill] sm:$0xff] %v5955_v42  ;;  %4779 = vmatprep.subr.bf16.mxu1 %v5953_v63  ;;  %v418_v45 = vadd.f32 %v354_v54, %v190_v4  ;;  %v419_v51 = vadd.f32 %v355_v6, %v191_v3  ;;  %4589 = vmatpush1.bf16.msra.mxu0 %v5960_v28  ;;  %v2514_v13 = vand.u32 4294901760, %v748_v44 }
  0xbe   :  { %8372 = vst [vmem:[#allocation40_spill] sm:$0xff] %v5960_v28  ;;  %8373 = vst [vmem:[#allocation41_spill] sm:$0xff] %v5962_v20  ;;  %v420_v18 = vadd.f32 %v356_v24, %v192_v2  ;;  %v421_v60 = vadd.f32 %v357_v30, %v193_v29  ;;  %v5976_v7 = vadd.f32 %v493_v14, %v5770_v48  ;;  %4363 = vperm.xlu1 %5375, %v4301_v58   ;;  %v4302_v2 = vld [vmem:[%s8020_s5 + $0x60] sm:$0xff] }
  0xbf   :  { %8374 = vst [vmem:[#allocation42_spill] sm:$0xff] %v5964_v43  ;;  %v744_v57 = vsel %vm616_vm6, %v5807_v5, %v680_v15  ;;  %v5981_v11 = vadd.f32 %v508_v37, %v418_v45  ;;  %v5983_v41 = vadd.f32 %v508_v37, %v419_v51  ;;  %v5986_v3 = vadd.f32 %v493_v14, %v5772_v59 }
  0xc0   :  { %v2510_v4 = vand.u32 4294901760, %v744_v57  ;;  %v5991_v6 = vsub.f32 %v748_v44, %v2514_v13  ;;  %v5993_v48 = vadd.f32 %v508_v37, %v420_v18  ;;  %v5995_v36 = vadd.f32 %v508_v37, %v421_v60  ;;  %v6009_v24 = vpop.permute.xlu1 %92  ;;  %v4303_v44 = vld [vmem:[%s8020_s5 + $0x68] sm:$0xff] }
  0xc1   :  { %v5998_v5 = vmul.f32 0.01, %v5924_v35  ;;  %v6001_v29 = vmul.f32 0.01, %v5981_v11  ;;  %v6004_v59 = vmul.f32 0.01, %v5983_v41  ;;  %v6007_v54 = vadd.f32 %v493_v14, %v5774_v0 }
  0xc2   :  { %8375 = vst [vmem:[#allocation43_spill] sm:$0xff] %v5991_v6  ;;  %v6011_v30 = vpack.c.bf16 %v2514_v13, %v2510_v4  ;;  %v6013_v58 = vsub.f32 %v744_v57, %v2510_v4  ;;  %v6016_v37 = vmul.f32 0.01, %v5993_v48  ;;  %v6019_v15 = vmul.f32 0.01, %v5995_v36  ;;  %4368 = vperm.xlu1 %5375, %v4302_v2  }
  0xc3   :  { %v6025_v0 = vadd.f32 %v493_v14, %v5783_v39  ;;  %v6028_v45 = vmul.f32 0.01, %v5976_v7  ;;  %v695_v51 = vmul.f32 0.01, %v5986_v3  ;;  %v6032_v13 = vmul.f32 0.01, %v6007_v54 }
  0xc4   :  { %8376 = vst [vmem:[#allocation44_spill] sm:$0xff] %v6011_v30  ;;  %8377 = vst [vmem:[#allocation45_spill] sm:$0xff] %v6013_v58  ;;  %4781 = vmatpush1.bf16.msra.mxu1 %v6011_v30  ;;  %vm627_vm9 = vcmp.gt.f32.partialorder %v5881_v47, 0.0  ;;  %vm625_vm10 = vcmp.gt.f32.partialorder %v5845_v34, 0.0  ;;  %v6040_v14 = vmul.f32 %v5625_v21, %v5972_v50  ;;  %v751_v39 = vsel %vm623_vm8, %v5841_v31, %v5856_v52  ;;  %v4305_v31 = vld [vmem:[%s8020_s5 + $0x78] sm:$0xff] }
  0xc5   :  { %v755_v18 = vsel %vm627_vm9, %v5881_v47, %v5902_v16  ;;  %vm629_vm11 = vcmp.gt.f32.partialorder %v5887_v19, 0.0  ;;  %v753_v60 = vsel %vm625_vm10, %v5845_v34, %v5863_v8  ;;  %v926_v57 = vand.u32 4294901760, %v751_v39  ;;  %v6051_v28 = vpop.permute.xlu1 %263 }
  0xc6   :  { %v930_v2 = vand.u32 4294901760, %v755_v18  ;;  %v757_v4 = vsel %vm629_vm11, %v5887_v19, %v5921_v49  ;;  %v2516_v30 = vand.u32 4294901760, %v753_v60  ;;  %4373 = vperm.xlu1 %5375, %v4303_v44   ;;  %vm622_vm12 = vcmp.gt.f32.partialorder %v5839_v38, 0.0 }
  0xc7   :  { %v2520_v63 = vand.u32 4294901760, %v757_v4  ;;  %vm626_vm13 = vcmp.gt.f32.partialorder %v5878_v26, 0.0  ;;  %vm624_vm14 = vcmp.gt.f32.partialorder %v5843_v32, 0.0  ;;  %v6061_v52 = vsub.f32 %v751_v39, %v926_v57 }
  0xc8   :  { %v6059_v34 = vpack.c.bf16 %v930_v2, %v926_v57  ;;  %v6063_v49 = vsub.f32 %v755_v18, %v930_v2  ;;  %v6065_v19 = vsub.f32 %v753_v60, %v2516_v30  ;;  %v750_v16 = vsel %vm622_vm12, %v5839_v38, %v5853_v53 }
  0xc9   :  { %8379 = vst [vmem:[#allocation47_spill] sm:$0xff] %v6061_v52  ;;  %v6067_v8 = vpack.c.bf16 %v2520_v63, %v2516_v30  ;;  %v6069_v47 = vsub.f32 %v757_v4, %v2520_v63  ;;  %v754_v44 = vsel %vm626_vm13, %v5878_v26, %v5899_v12  ;;  %v928_v46 = vand.u32 4294901760, %v750_v16 }
  0xca   :  { %8378 = vst [vmem:[#allocation46_spill] sm:$0xff] %v6059_v34  ;;  %8380 = vst [vmem:[#allocation48_spill] sm:$0xff] %v6063_v49  ;;  %4591 = vmatprep.subr.bf16.mxu0 %v6059_v34  ;;  %v932_v6 = vand.u32 4294901760, %v754_v44  ;;  %vm628_vm15 = vcmp.gt.f32.partialorder %v5884_v33, 0.0  ;;  %v752_v39 = vsel %vm624_vm14, %v5843_v32, %v5859_v55  ;;  %4383 = vperm.xlu1 %5375, %v4305_v31   ;;  %v697_v30 = vmul.f32 0.01, %v6025_v0  ;;  %v6087_v12 = vpop.permute.xlu1 %502 }
  0xcb   :  { %8381 = vst [vmem:[#allocation49_spill] sm:$0xff] %v6065_v19  ;;  %8382 = vst [vmem:[#allocation50_spill] sm:$0xff] %v6067_v8  ;;  %4783 = vmatprep.subr.bf16.mxu1 %v6067_v8  ;;  %v756_v38 = vsel %vm628_vm15, %v5884_v33, %v5905_v17  ;;  %v2518_v53 = vand.u32 4294901760, %v752_v39  ;;  %v6085_v26 = vmul.f32 %v5628_v22, %v5972_v50  ;;  %vm631_vm0 = vcmp.gt.f32.partialorder %v5986_v3, 0.0  ;;  %v8402_v8 = vld [vmem:[#allocation7_spill] sm:$0xff]  ;;  %v8406_v34 = vld [vmem:[#allocation8_spill] sm:$0xff] }
  0xcc   :  { %8383 = vst [vmem:[#allocation51_spill] sm:$0xff] %v6069_v47  ;;  %v6089_v63 = vpack.c.bf16 %v932_v6, %v928_v46  ;;  %v6091_v18 = vsub.f32 %v750_v16, %v928_v46  ;;  %v6093_v32 = vsub.f32 %v754_v44, %v932_v6  ;;  %v2522_v55 = vand.u32 4294901760, %v756_v38 }
  0xcd   :  { %v6095_v60 = vsub.f32 %v752_v39, %v2518_v53  ;;  %v6099_v57 = vmul.f32 %v5631_v23, %v5972_v50  ;;  %v198_v33 = vmul.f32 %v5625_v21, %v6009_v24  ;;  %v199_v17 = vmul.f32 %v5628_v22, %v6009_v24 }
  0xce   :  { %8384 = vst [vmem:[#allocation52_spill] sm:$0xff] %v6089_v63  ;;  %8385 = vst [vmem:[#allocation53_spill] sm:$0xff] %v6091_v18  ;;  %4593 = vmatpush1.bf16.msra.mxu0 %v6089_v63  ;;  %v6106_v2 = vpack.c.bf16 %v2522_v55, %v2518_v53  ;;  %v6108_v46 = vsub.f32 %v756_v38, %v2522_v55  ;;  %v200_v6 = vmul.f32 %v5631_v23, %v6009_v24  ;;  %v6118_v31 = vpop.permute.xlu1 %97 }
  0xcf   :  { %8386 = vst [vmem:[#allocation54_spill] sm:$0xff] %v6093_v32  ;;  %8387 = vst [vmem:[#allocation55_spill] sm:$0xff] %v6095_v60  ;;  %v201_v4 = vmul.f32 %v5643_v27, %v6009_v24  ;;  %vm635_vm1 = vcmp.gt.f32.partialorder %v5912_v25, 0.0  ;;  %vm633_vm2 = vcmp.gt.f32.partialorder %v6025_v0, 0.0  ;;  %vm637_vm3 = vcmp.gt.f32.partialorder %v5924_v35, 0.0 }
  0xd0   :  { %8388 = vst [vmem:[#allocation56_spill] sm:$0xff] %v6106_v2  ;;  %8389 = vst [vmem:[#allocation57_spill] sm:$0xff] %v6108_v46  ;;  %4785 = vmatpush1.bf16.msra.mxu1 %v6106_v2  ;;  %v759_v16 = vsel %vm631_vm0, %v5986_v3, %v695_v51  ;;  %v763_v44 = vsel %vm635_vm1, %v5912_v25, %v5932_v9  ;;  %v761_v39 = vsel %vm633_vm2, %v6025_v0, %v697_v30  ;;  %v8414_v46 = vld [vmem:[#allocation12_spill] sm:$0xff] }
  0xd1   :  { %v765_v24 = vsel %vm637_vm3, %v5924_v35, %v5998_v5  ;;  %v934_v38 = vand.u32 4294901760, %v759_v16  ;;  %v938_v53 = vand.u32 4294901760, %v763_v44  ;;  %v2524_v55 = vand.u32 4294901760, %v761_v39 }
  0xd2   :  { %v2528_v63 = vand.u32 4294901760, %v765_v24  ;;  %vm630_vm4 = vcmp.gt.f32.partialorder %v5976_v7, 0.0  ;;  %vm634_vm5 = vcmp.gt.f32.partialorder %v5909_v1, 0.0  ;;  %vm632_vm6 = vcmp.gt.f32.partialorder %v6007_v54, 0.0  ;;  %v103_v35 = vpop.permute.xlu1 %102 }
  0xd3   :  { %vm636_vm7 = vcmp.gt.f32.partialorder %v5915_v62, 0.0  ;;  %v6131_v3 = vpack.c.bf16 %v938_v53, %v934_v38  ;;  %v6133_v25 = vsub.f32 %v759_v16, %v934_v38  ;;  %v6135_v9 = vsub.f32 %v763_v44, %v938_v53  ;;  %v8396_v53 = vld [vmem:[#allocation33_spill] sm:$0xff] }
  0xd4   :  { %v6137_v0 = vpack.c.bf16 %v2528_v63, %v2524_v55  ;;  %v6139_v5 = vsub.f32 %v761_v39, %v2524_v55  ;;  %v6141_v51 = vsub.f32 %v765_v24, %v2528_v63  ;;  %v758_v30 = vsel %vm630_vm4, %v5976_v7, %v6028_v45  ;;  %v8397_v55 = vld [vmem:[#allocation5_spill] sm:$0xff]  ;;  %v8398_v45 = vld [vmem:[#allocation6_spill] sm:$0xff] }
  0xd5   :  { %8390 = vst [vmem:[#allocation58_spill] sm:$0xff] %v6131_v3  ;;  %8391 = vst [vmem:[#allocation59_spill] sm:$0xff] %v6133_v25  ;;  %v762_v2 = vsel %vm634_vm5, %v5909_v1, %v5929_v40  ;;  %4595 = vmatprep.subr.bf16.mxu0 %v6131_v3  ;;  %v936_v16 = vand.u32 4294901760, %v758_v30  ;;  %v760_v38 = vsel %vm632_vm6, %v6007_v54, %v6032_v13  ;;  %v8413_v25 = vld [vmem:[#allocation32_spill] sm:$0xff]  ;;  %vm643_vm9 = vcmp.gt.f32.partialorder %v5983_v41, 0.0 }
  0xd6   :  { %8392 = vst [vmem:[#allocation60_spill] sm:$0xff] %v6135_v9  ;;  %8393 = vst [vmem:[#allocation61_spill] sm:$0xff] %v6137_v0  ;;  %4787 = vmatprep.subr.bf16.mxu1 %v6137_v0  ;;  %v940_v44 = vand.u32 4294901760, %v762_v2  ;;  %v764_v39 = vsel %vm636_vm7, %v5915_v62, %v8396_v53  ;;  %v2526_v63 = vand.u32 4294901760, %v760_v38  ;;  %v362_v7 = vmul.f32 %v8397_v55, %v6051_v28  ;;  %v518_v9 = vpop.permute.xlu0 %517 }
  0xd7   :  { %8394 = vst [vmem:[#allocation62_spill] sm:$0xff] %v6139_v5  ;;  %8395 = vst [vmem:[#allocation63_spill] sm:$0xff] %v6141_v51  ;;  %v2530_v24 = vand.u32 4294901760, %v764_v39  ;;  %v363_v1 = vmul.f32 %v8398_v45, %v6051_v28  ;;  %v6159_v3 = vsub.f32 %v758_v30, %v936_v16  ;;  %v364_v54 = vmul.f32 %v8402_v8, %v6051_v28  ;;  %v6173_v5 = vpop.permute.xlu1 %271 }
  0xd8   :  { %v6157_v40 = vpack.c.bf16 %v940_v44, %v936_v16  ;;  %v6161_v0 = vsub.f32 %v762_v2, %v940_v44  ;;  %v6167_v62 = vsub.f32 %v760_v38, %v2526_v63  ;;  %v365_v51 = vmul.f32 %v8406_v34, %v6051_v28  ;;  %v8407_v44 = vld [vmem:[#allocation29_spill] sm:$0xff] }
  0xd9   :  { %8400 = vst [vmem:[#allocation5_spill] sm:$0xff] %v6159_v3  ;;  %v6165_v13 = vpack.c.bf16 %v2530_v24, %v2526_v63  ;;  %v6169_v53 = vsub.f32 %v764_v39, %v2530_v24  ;;  %v426_v30 = vadd.f32 %v362_v7, %v198_v33  ;;  %v427_v16 = vadd.f32 %v363_v1, %v199_v17  ;;  %v8409_v63 = vld [vmem:[#allocation30_spill] sm:$0xff] }
  0xda   :  { %8399 = vst [vmem:[#allocation33_spill] sm:$0xff] %v6157_v40  ;;  %8401 = vst [vmem:[#allocation6_spill] sm:$0xff] %v6161_v0  ;;  %4597 = vmatpush1.bf16.msra.mxu0 %v6157_v40  ;;  %v428_v2 = vadd.f32 %v364_v54, %v200_v6  ;;  %v8408_v0 = vld [vmem:[#allocation9_spill] sm:$0xff]  ;;  %v429_v38 = vadd.f32 %v365_v51, %v201_v4  ;;  %v8410_v39 = vld [vmem:[#allocation10_spill] sm:$0xff]  ;;  %v417_v60 = vadd.f32 %v8414_v46, %v8413_v25 }
  0xdb   :  { %8403 = vst [vmem:[#allocation7_spill] sm:$0xff] %v6165_v13  ;;  %8404 = vst [vmem:[#allocation64_spill] sm:$0xff] %v6167_v62  ;;  %v414_v3 = vadd.f32 %v8408_v0, %v8407_v44  ;;  %4789 = vmatpush1.bf16.msra.mxu1 %v6165_v13  ;;  %v415_v24 = vadd.f32 %v8410_v39, %v8409_v63  ;;  %v8412_v62 = vld [vmem:[#allocation11_spill] sm:$0xff]  ;;  %v6187_v33 = vmul.f32 %v5643_v27, %v5972_v50 }
  0xdc   :  { %8405 = vst [vmem:[#allocation65_spill] sm:$0xff] %v6169_v53  ;;  %v8411_v53 = vld [vmem:[#allocation31_spill] sm:$0xff]  ;;  %v6189_v17 = vadd.f32 %v518_v9, %v426_v30  ;;  %v6191_v6 = vadd.f32 %v518_v9, %v427_v16  ;;  %v6194_v4 = vadd.f32 %v518_v9, %v428_v2  ;;  %v577_v1 = vadd.f32 %v6087_v12, %v417_v60 }
  0xdd   :  { %v416_v28 = vadd.f32 %v8412_v62, %v8411_v53  ;;  %v574_v0 = vadd.f32 %v6087_v12, %v414_v3  ;;  %v575_v51 = vadd.f32 %v6087_v12, %v415_v24  ;;  %v6199_v54 = vadd.f32 %v518_v9, %v429_v38  ;;  %v6209_v3 = vpop.permute.xlu1 %512 }
  0xde   :  { %v6203_v50 = vmul.f32 %v5625_v21, %v6118_v31  ;;  %v6207_v25 = vmul.f32 %v5628_v22, %v6118_v31  ;;  %v705_v30 = vmul.f32 0.01, %v577_v1  ;;  %v6213_v16 = vmul.f32 %v5631_v23, %v6118_v31 }
  0xdf   :  { %v576_v7 = vadd.f32 %v6087_v12, %v416_v28  ;;  %v702_v46 = vmul.f32 0.01, %v574_v0  ;;  %v703_v62 = vmul.f32 0.01, %v575_v51  ;;  %v206_v12 = vmul.f32 %v5625_v21, %v103_v35 }
  0xe0   :  { %v207_v60 = vmul.f32 %v5628_v22, %v103_v35  ;;  %v208_v9 = vmul.f32 %v5631_v23, %v103_v35  ;;  %v209_v2 = vmul.f32 %v5643_v27, %v103_v35  ;;  %vm639_vm8 = vcmp.gt.f32.partialorder %v575_v51, 0.0 }
  0xe1   :  { %v704_v53 = vmul.f32 0.01, %v576_v7  ;;  %vm641_vm10 = vcmp.gt.f32.partialorder %v577_v1, 0.0  ;;  %vm645_vm11 = vcmp.gt.f32.partialorder %v5995_v36, 0.0  ;;  %v767_v44 = vsel %vm639_vm8, %v575_v51, %v703_v62  ;;  %v6225_v24 = vpop.permute.xlu1 %107 }
  0xe2   :  { %v771_v38 = vsel %vm643_vm9, %v5983_v41, %v6004_v59  ;;  %v769_v63 = vsel %vm641_vm10, %v577_v1, %v705_v30  ;;  %v773_v39 = vsel %vm645_vm11, %v5995_v36, %v6019_v15  ;;  %v942_v28 = vand.u32 4294901760, %v767_v44 }
  0xe3   :  { %v946_v13 = vand.u32 4294901760, %v771_v38  ;;  %v2532_v40 = vand.u32 4294901760, %v769_v63  ;;  %v2536_v35 = vand.u32 4294901760, %v773_v39  ;;  %vm638_vm12 = vcmp.gt.f32.partialorder %v574_v0, 0.0 }
  0xe4   :  { %vm642_vm13 = vcmp.gt.f32.partialorder %v5981_v11, 0.0  ;;  %vm640_vm14 = vcmp.gt.f32.partialorder %v576_v7, 0.0  ;;  %vm644_vm15 = vcmp.gt.f32.partialorder %v5993_v48, 0.0  ;;  %v6231_v62 = vsub.f32 %v767_v44, %v942_v28 }
  0xe5   :  { %v6229_v51 = vpack.c.bf16 %v946_v13, %v942_v28  ;;  %v6233_v41 = vsub.f32 %v771_v38, %v946_v13  ;;  %v6235_v59 = vpack.c.bf16 %v2536_v35, %v2532_v40  ;;  %v6237_v36 = vsub.f32 %v769_v63, %v2532_v40  ;;  %v113_v32 = vpop.permute.xlu1 %112 }
  0xe6   :  { %v6239_v15 = vsub.f32 %v773_v39, %v2536_v35  ;;  %v766_v1 = vsel %vm638_vm12, %v574_v0, %v702_v46  ;;  %v770_v30 = vsel %vm642_vm13, %v5981_v11, %v6001_v29  ;;  %v768_v28 = vsel %vm640_vm14, %v576_v7, %v704_v53 }
  0xe7   :  { %8415 = vst [vmem:[#allocation8_spill] sm:$0xff] %v6229_v51  ;;  %8416 = vst [vmem:[#allocation29_spill] sm:$0xff] %v6233_v41  ;;  %4599 = vmatprep.subr.bf16.mxu0 %v6229_v51  ;;  %4791 = vmatprep.subr.bf16.mxu1 %v6235_v59  ;;  %v944_v18 = vand.u32 4294901760, %v766_v1  ;;  %v948_v44 = vand.u32 4294901760, %v770_v30  ;;  %v772_v13 = vsel %vm644_vm15, %v5993_v48, %v6016_v37  ;;  %v2534_v38 = vand.u32 4294901760, %v768_v28  ;;  %v528_v51 = vpop.permute.xlu0 %527 }
  0xe8   :  { %8417 = vst [vmem:[#allocation9_spill] sm:$0xff] %v6235_v59  ;;  %8418 = vst [vmem:[#allocation30_spill] sm:$0xff] %v6237_v36  ;;  %v2538_v40 = vand.u32 4294901760, %v772_v13  ;;  %v370_v63 = vmul.f32 %v8397_v55, %v6173_v5  ;;  %v371_v0 = vmul.f32 %v8398_v45, %v6173_v5  ;;  %v372_v7 = vmul.f32 %v8402_v8, %v6173_v5 }
  0xe9   :  { %8419 = vst [vmem:[#allocation10_spill] sm:$0xff] %v6239_v15  ;;  %v6251_v11 = vpack.c.bf16 %v948_v44, %v944_v18  ;;  %v6253_v29 = vsub.f32 %v766_v1, %v944_v18  ;;  %v6255_v46 = vsub.f32 %v770_v30, %v948_v44  ;;  %v6261_v48 = vsub.f32 %v768_v28, %v2534_v38  ;;  %v8426_v1 = vld [vmem:[#allocation13_spill] sm:$0xff]  ;;  %v6270_v44 = vpop.permute.xlu1 %279 }
  0xea   :  { %v6259_v53 = vpack.c.bf16 %v2538_v40, %v2534_v38  ;;  %v6263_v37 = vsub.f32 %v772_v13, %v2538_v40  ;;  %v373_v39 = vmul.f32 %v8406_v34, %v6173_v5  ;;  %v434_v35 = vadd.f32 %v370_v63, %v206_v12  ;;  %v8427_v13 = vld [vmem:[#allocation14_spill] sm:$0xff]  ;;  %v8428_v40 = vld [vmem:[#allocation15_spill] sm:$0xff] }
  0xeb   :  { %8420 = vst [vmem:[#allocation31_spill] sm:$0xff] %v6251_v11  ;;  %8421 = vst [vmem:[#allocation11_spill] sm:$0xff] %v6253_v29  ;;  %4601 = vmatpush1.bf16.msra.mxu0 %v6251_v11  ;;  %v435_v59 = vadd.f32 %v371_v0, %v207_v60  ;;  %v436_v18 = vadd.f32 %v372_v7, %v208_v9  ;;  %v422_v30 = vadd.f32 %v8426_v1, %v6040_v14  ;;  %v8429_v11 = vld [vmem:[#allocation16_spill] sm:$0xff] }
  0xec   :  { %8422 = vst [vmem:[#allocation32_spill] sm:$0xff] %v6255_v46  ;;  %8423 = vst [vmem:[#allocation12_spill] sm:$0xff] %v6259_v53  ;;  %4793 = vmatpush1.bf16.msra.mxu1 %v6259_v53  ;;  %v437_v28 = vadd.f32 %v373_v39, %v209_v2  ;;  %v423_v38 = vadd.f32 %v8427_v13, %v6085_v26  ;;  %v424_v5 = vadd.f32 %v8428_v40, %v6099_v57 }
  0xed   :  { %8424 = vst [vmem:[#allocation66_spill] sm:$0xff] %v6261_v48  ;;  %8425 = vst [vmem:[#allocation67_spill] sm:$0xff] %v6263_v37  ;;  %v425_v12 = vadd.f32 %v8429_v11, %v6187_v33  ;;  %v6281_v60 = vmul.f32 %v5643_v27, %v6118_v31  ;;  %v6283_v14 = vadd.f32 %v528_v51, %v434_v35  ;;  %vm651_vm1 = vcmp.gt.f32.partialorder %v6191_v6, 0.0 }
  0xee   :  { %v6285_v9 = vadd.f32 %v528_v51, %v435_v59  ;;  %v582_v63 = vadd.f32 %v6209_v3, %v422_v30  ;;  %v6288_v2 = vadd.f32 %v528_v51, %v436_v18  ;;  %v583_v26 = vadd.f32 %v6209_v3, %v423_v38  ;;  %v6307_v1 = vpop.permute.xlu1 %522 }
  0xef   :  { %v584_v0 = vadd.f32 %v6209_v3, %v424_v5  ;;  %v585_v57 = vadd.f32 %v6209_v3, %v425_v12  ;;  %v6293_v7 = vadd.f32 %v528_v51, %v437_v28  ;;  %v6297_v31 = vmul.f32 %v5625_v21, %v6225_v24 }
  0xf0   :  { %v710_v33 = vmul.f32 0.01, %v582_v63  ;;  %v6301_v59 = vmul.f32 %v5628_v22, %v6225_v24  ;;  %v711_v11 = vmul.f32 0.01, %v583_v26  ;;  %v6305_v18 = vmul.f32 %v5631_v23, %v6225_v24 }
  0xf1   :  { %v712_v39 = vmul.f32 0.01, %v584_v0  ;;  %v713_v35 = vmul.f32 0.01, %v585_v57  ;;  %v214_v3 = vmul.f32 %v5625_v21, %v113_v32  ;;  %v215_v51 = vmul.f32 %v5628_v22, %v113_v32 }
  0xf2   :  { %v216_v30 = vmul.f32 %v5631_v23, %v113_v32  ;;  %v217_v28 = vmul.f32 %v5643_v27, %v113_v32  ;;  %vm647_vm0 = vcmp.gt.f32.partialorder %v583_v26, 0.0  ;;  %v715_v13 = vmul.f32 0.01, %v6191_v6  ;;  %v118_v29 = vpop.permute.xlu1 %117 }
  0xf3   :  { %vm649_vm2 = vcmp.gt.f32.partialorder %v585_v57, 0.0  ;;  %v775_v38 = vsel %vm647_vm0, %v583_v26, %v711_v11  ;;  %vm653_vm3 = vcmp.gt.f32.partialorder %v6199_v54, 0.0  ;;  %v717_v40 = vmul.f32 0.01, %v6199_v54 }
  0xf4   :  { %v777_v5 = vsel %vm649_vm2, %v585_v57, %v713_v35  ;;  %v779_v12 = vsel %vm651_vm1, %v6191_v6, %v715_v13  ;;  %v950_v53 = vand.u32 4294901760, %v775_v38  ;;  %vm646_vm4 = vcmp.gt.f32.partialorder %v582_v63, 0.0 }
  0xf5   :  { %v2540_v37 = vand.u32 4294901760, %v777_v5  ;;  %v954_v48 = vand.u32 4294901760, %v779_v12  ;;  %v781_v32 = vsel %vm653_vm3, %v6199_v54, %v717_v40  ;;  %vm650_vm5 = vcmp.gt.f32.partialorder %v6189_v17, 0.0 }
  0xf6   :  { %v714_v46 = vmul.f32 0.01, %v6189_v17  ;;  %v6321_v15 = vsub.f32 %v775_v38, %v950_v53  ;;  %v2544_v26 = vand.u32 4294901760, %v781_v32  ;;  %v774_v36 = vsel %vm646_vm4, %v582_v63, %v710_v33 }
  0xf7   :  { %v6323_v11 = vsub.f32 %v777_v5, %v2540_v37  ;;  %v6325_v57 = vpack.c.bf16 %v954_v48, %v950_v53  ;;  %v6327_v6 = vsub.f32 %v779_v12, %v954_v48  ;;  %v952_v13 = vand.u32 4294901760, %v774_v36 }
  0xf8   :  { %v778_v35 = vsel %vm650_vm5, %v6189_v17, %v714_v46  ;;  %v6330_v41 = vpack.c.bf16 %v2544_v26, %v2540_v37  ;;  %v6332_v54 = vsub.f32 %v781_v32, %v2544_v26  ;;  %vm648_vm6 = vcmp.gt.f32.partialorder %v584_v0, 0.0 }
  0xf9   :  { %8430 = vst [vmem:[#allocation13_spill] sm:$0xff] %v6325_v57  ;;  %v956_v40 = vand.u32 4294901760, %v778_v35  ;;  %4603 = vmatprep.subr.bf16.mxu0 %v6325_v57  ;;  %v6335_v38 = vsub.f32 %v774_v36, %v952_v13  ;;  %vm652_vm7 = vcmp.gt.f32.partialorder %v6194_v4, 0.0  ;;  %v716_v53 = vmul.f32 0.01, %v6194_v4  ;;  %v538_v57 = vpop.permute.xlu0 %537 }
  0xfa   :  { %8431 = vst [vmem:[#allocation14_spill] sm:$0xff] %v6330_v41  ;;  %8432 = vst [vmem:[#allocation15_spill] sm:$0xff] %v6332_v54  ;;  %v776_v63 = vsel %vm648_vm6, %v584_v0, %v712_v39  ;;  %4795 = vmatprep.subr.bf16.mxu1 %v6330_v41  ;;  %v378_v37 = vmul.f32 %v8397_v55, %v6270_v44  ;;  %v379_v36 = vmul.f32 %v8398_v45, %v6270_v44  ;;  %v6353_v39 = vpop.permute.xlu1 %122 }
  0xfb   :  { %8433 = vst [vmem:[#allocation16_spill] sm:$0xff] %v6335_v38  ;;  %v6340_v48 = vpack.c.bf16 %v956_v40, %v952_v13  ;;  %v6342_v17 = vsub.f32 %v778_v35, %v956_v40  ;;  %v2542_v46 = vand.u32 4294901760, %v776_v63  ;;  %v780_v33 = vsel %vm652_vm7, %v6194_v4, %v716_v53  ;;  %v8437_v53 = vld [vmem:[#allocation17_spill] sm:$0xff] }
  0xfc   :  { %v380_v5 = vmul.f32 %v8402_v8, %v6270_v44  ;;  %v381_v0 = vmul.f32 %v8406_v34, %v6270_v44  ;;  %v6357_v12 = vmul.f32 %v5643_v27, %v6225_v24  ;;  %v2546_v32 = vand.u32 4294901760, %v780_v33  ;;  %v8440_v24 = vld [vmem:[#allocation18_spill] sm:$0xff] }
  0xfd   :  { %8434 = vst [vmem:[#allocation68_spill] sm:$0xff] %v6340_v48  ;;  %8435 = vst [vmem:[#allocation69_spill] sm:$0xff] %v6342_v17  ;;  %4605 = vmatpush1.bf16.msra.mxu0 %v6340_v48  ;;  %v6360_v26 = vsub.f32 %v776_v63, %v2542_v46  ;;  %v442_v4 = vadd.f32 %v378_v37, %v214_v3  ;;  %v443_v35 = vadd.f32 %v379_v36, %v215_v51  ;;  %v8441_v48 = vld [vmem:[#allocation19_spill] sm:$0xff] }
  0xfe   :  { %v444_v13 = vadd.f32 %v380_v5, %v216_v30  ;;  %v445_v40 = vadd.f32 %v381_v0, %v217_v28  ;;  %v430_v41 = vadd.f32 %v8437_v53, %v6203_v50  ;;  %v6364_v44 = vpack.c.bf16 %v2546_v32, %v2542_v46  ;;  %v8442_v30 = vld [vmem:[#allocation20_spill] sm:$0xff]  ;;  %v6396_v36 = vpop.permute.xlu1 %287 }
  0xff   :  { %8436 = vst [vmem:[#allocation70_spill] sm:$0xff] %v6360_v26  ;;  %v6366_v17 = vsub.f32 %v780_v33, %v2546_v32  ;;  %v431_v38 = vadd.f32 %v8440_v24, %v6207_v25  ;;  %v432_v54 = vadd.f32 %v8441_v48, %v6213_v16  ;;  %v6372_v63 = vadd.f32 %v538_v57, %v442_v4 }
 0x100   :  { %8438 = vst [vmem:[#allocation17_spill] sm:$0xff] %v6364_v44  ;;  %v6374_v3 = vadd.f32 %v538_v57, %v443_v35  ;;  %v6376_v51 = vadd.f32 %v538_v57, %v444_v13  ;;  %v433_v50 = vadd.f32 %v8442_v30, %v6281_v60  ;;  %4797 = vmatpush1.bf16.msra.mxu1 %v6364_v44  ;;  %vm659_vm9 = vcmp.gt.f32.partialorder %v6285_v9, 0.0 }
 0x101   :  { %8439 = vst [vmem:[#allocation71_spill] sm:$0xff] %v6366_v17  ;;  %v6381_v28 = vadd.f32 %v538_v57, %v445_v40  ;;  %v590_v46 = vadd.f32 %v6307_v1, %v430_v41  ;;  %v591_v25 = vadd.f32 %v6307_v1, %v431_v38  ;;  %v592_v37 = vadd.f32 %v6307_v1, %v432_v54 }
 0x102   :  { %v593_v16 = vadd.f32 %v6307_v1, %v433_v50  ;;  %v6388_v48 = vmul.f32 %v5625_v21, %v118_v29  ;;  %v6391_v33 = vmul.f32 %v5628_v22, %v118_v29  ;;  %v6394_v60 = vmul.f32 %v5631_v23, %v118_v29  ;;  %v533_v30 = vpop.permute.xlu1 %532 }
 0x103   :  { %v718_v57 = vmul.f32 0.01, %v590_v46  ;;  %v719_v5 = vmul.f32 0.01, %v591_v25  ;;  %v720_v41 = vmul.f32 0.01, %v592_v37  ;;  %v6399_v38 = vmul.f32 %v5643_v27, %v118_v29 }
 0x104   :  { %v721_v54 = vmul.f32 0.01, %v593_v16  ;;  %v6403_v1 = vmul.f32 %v5625_v21, %v6353_v39  ;;  %v6407_v0 = vmul.f32 %v5628_v22, %v6353_v39  ;;  %v6411_v32 = vmul.f32 %v5631_v23, %v6353_v39 }
 0x105   :  { %vm655_vm8 = vcmp.gt.f32.partialorder %v591_v25, 0.0  ;;  %v723_v4 = vmul.f32 0.01, %v6285_v9  ;;  %vm657_vm10 = vcmp.gt.f32.partialorder %v593_v16, 0.0  ;;  %vm661_vm11 = vcmp.gt.f32.partialorder %v6293_v7, 0.0 }
 0x106   :  { %v783_v29 = vsel %vm655_vm8, %v591_v25, %v719_v5  ;;  %v725_v21 = vmul.f32 0.01, %v6293_v7  ;;  %v785_v35 = vsel %vm657_vm10, %v593_v16, %v721_v54  ;;  %vm654_vm12 = vcmp.gt.f32.partialorder %v590_v46, 0.0 }
 0x107   :  { %v787_v13 = vsel %vm659_vm9, %v6285_v9, %v723_v4  ;;  %v958_v22 = vand.u32 4294901760, %v783_v29  ;;  %v2548_v40 = vand.u32 4294901760, %v785_v35  ;;  %vm658_vm13 = vcmp.gt.f32.partialorder %v6283_v14, 0.0 }
 0x108   :  { %v962_v53 = vand.u32 4294901760, %v787_v13  ;;  %v789_v23 = vsel %vm661_vm11, %v6293_v7, %v725_v21  ;;  %v722_v24 = vmul.f32 0.01, %v6283_v14  ;;  %v782_v44 = vsel %vm654_vm12, %v590_v46, %v718_v57 }
 0x109   :  { %v6421_v50 = vsub.f32 %v783_v29, %v958_v22  ;;  %v2552_v25 = vand.u32 4294901760, %v789_v23  ;;  %v6423_v5 = vsub.f32 %v785_v35, %v2548_v40  ;;  %v960_v4 = vand.u32 4294901760, %v782_v44 }
 0x10a   :  { %v6425_v16 = vpack.c.bf16 %v962_v53, %v958_v22  ;;  %v6427_v9 = vsub.f32 %v787_v13, %v962_v53  ;;  %v786_v54 = vsel %vm658_vm13, %v6283_v14, %v722_v24  ;;  %vm656_vm14 = vcmp.gt.f32.partialorder %v592_v37, 0.0 }
 0x10b   :  { %v6430_v17 = vpack.c.bf16 %v2552_v25, %v2548_v40  ;;  %v6432_v7 = vsub.f32 %v789_v23, %v2552_v25  ;;  %v964_v21 = vand.u32 4294901760, %v786_v54  ;;  %v6435_v29 = vsub.f32 %v782_v44, %v960_v4  ;;  %v8446_v23 = vld [vmem:[#allocation21_spill] sm:$0xff] }
 0x10c   :  { %8443 = vst [vmem:[#allocation18_spill] sm:$0xff] %v6425_v16  ;;  %4607 = vmatprep.subr.bf16.mxu0 %v6425_v16  ;;  %vm660_vm15 = vcmp.gt.f32.partialorder %v6288_v2, 0.0  ;;  %v724_v46 = vmul.f32 0.01, %v6288_v2  ;;  %v784_v57 = vsel %vm656_vm14, %v592_v37, %v720_v41  ;;  %v225_v35 = vmul.f32 %v5643_v27, %v6353_v39  ;;  %v543_v41 = vpop.permute.xlu1 %542 }
 0x10d   :  { %8444 = vst [vmem:[#allocation19_spill] sm:$0xff] %v6430_v17  ;;  %4799 = vmatprep.subr.bf16.mxu1 %v6430_v17  ;;  %v6442_v14 = vpack.c.bf16 %v964_v21, %v960_v4  ;;  %v6444_v13 = vsub.f32 %v786_v54, %v964_v21  ;;  %v2550_v22 = vand.u32 4294901760, %v784_v57  ;;  %v386_v44 = vmul.f32 %v8397_v55, %v6396_v36  ;;  %v8448_v55 = vld [vmem:[#allocation23_spill] sm:$0xff] }
 0x10e   :  { %v788_v40 = vsel %vm660_vm15, %v6288_v2, %v724_v46  ;;  %v387_v53 = vmul.f32 %v8398_v45, %v6396_v36  ;;  %v388_v37 = vmul.f32 %v8402_v8, %v6396_v36  ;;  %v438_v24 = vadd.f32 %v8446_v23, %v6297_v31  ;;  %v8447_v2 = vld [vmem:[#allocation22_spill] sm:$0xff]  ;;  %v8449_v45 = vld [vmem:[#allocation24_spill] sm:$0xff]  ;;  %v8450_v8 = vld [vmem:[#allocation25_spill] sm:$0xff] }
 0x10f   :  { %8445 = vst [vmem:[#allocation20_spill] sm:$0xff] %v6442_v14  ;;  %4609 = vmatpush1.bf16.msra.mxu0 %v6442_v14  ;;  %v2554_v27 = vand.u32 4294901760, %v788_v40  ;;  %v6454_v39 = vsub.f32 %v784_v57, %v2550_v22  ;;  %v439_v25 = vadd.f32 %v8447_v2, %v6301_v59  ;;  %v440_v54 = vadd.f32 %v8448_v55, %v6305_v18  ;;  %v8451_v46 = vld [vmem:[#allocation26_spill] sm:$0xff]  ;;  %v8454_v18 = vld [vmem:[#allocation27_spill] sm:$0xff] }
 0x110   :  { %v441_v4 = vadd.f32 %v8449_v45, %v6357_v12  ;;  %v446_v21 = vadd.f32 %v8450_v8, %v6388_v48  ;;  %v447_v14 = vadd.f32 %v8451_v46, %v6391_v33  ;;  %v598_v31 = vadd.f32 %v533_v30, %v438_v24  ;;  %v8455_v12 = vld [vmem:[#allocation28_spill] sm:$0xff] }
 0x111   :  { %v6468_v57 = vpack.c.bf16 %v2554_v27, %v2550_v22  ;;  %v6470_v17 = vsub.f32 %v788_v40, %v2554_v27  ;;  %v599_v23 = vadd.f32 %v533_v30, %v439_v25  ;;  %v6472_v16 = vadd.f32 %v533_v30, %v440_v54 }
 0x112   :  { %v601_v59 = vadd.f32 %v533_v30, %v441_v4  ;;  %v448_v2 = vadd.f32 %v8454_v18, %v6394_v60  ;;  %v449_v55 = vadd.f32 %v8455_v12, %v6399_v38  ;;  %v389_v48 = vmul.f32 %v8406_v34, %v6396_v36  ;;  %v548_v60 = vpop.permute.xlu1 %547 }
 0x113   :  { %8452 = vst [vmem:[#allocation21_spill] sm:$0xff] %v6468_v57  ;;  %8453 = vst [vmem:[#allocation22_spill] sm:$0xff] %v6470_v17  ;;  %4801 = vmatpush1.bf16.msra.mxu1 %v6468_v57  ;;  %v726_v33 = vmul.f32 0.01, %v598_v31  ;;  %v6481_v22 = vadd.f32 %v543_v41, %v446_v21  ;;  %v6483_v40 = vadd.f32 %v543_v41, %v447_v14  ;;  %v727_v27 = vmul.f32 0.01, %v599_v23 }
 0x114   :  { %v728_v24 = vmul.f32 0.01, %v6472_v16  ;;  %v6486_v30 = vadd.f32 %v543_v41, %v448_v2  ;;  %v6488_v25 = vadd.f32 %v543_v41, %v449_v55  ;;  %v729_v54 = vmul.f32 0.01, %v601_v59 }
 0x115   :  { %v6491_v38 = vmul.f32 0.01, %v6481_v22  ;;  %v735_v45 = vmul.f32 0.01, %v6483_v40  ;;  %v450_v34 = vadd.f32 %v386_v44, %v6403_v1  ;;  %v451_v4 = vadd.f32 %v387_v53, %v6407_v0 }
 0x116   :  { %v6496_v36 = vmul.f32 0.01, %v6486_v30  ;;  %v737_v14 = vmul.f32 0.01, %v6488_v25  ;;  %v452_v8 = vadd.f32 %v388_v37, %v6411_v32  ;;  %v453_v41 = vadd.f32 %v389_v48, %v225_v35 }
 0x117   :  { %v6501_v21 = vadd.f32 %v548_v60, %v450_v34  ;;  %vm663_vm0 = vcmp.gt.f32.partialorder %v599_v23, 0.0  ;;  %vm667_vm1 = vcmp.gt.f32.partialorder %v6374_v3, 0.0  ;;  %v611_v46 = vadd.f32 %v548_v60, %v451_v4 }
 0x118   :  { %v6504_v18 = vadd.f32 %v548_v60, %v452_v8  ;;  %v731_v1 = vmul.f32 0.01, %v6374_v3  ;;  %v791_v44 = vsel %vm663_vm0, %v599_v23, %v727_v27  ;;  %v613_v2 = vadd.f32 %v548_v60, %v453_v41 }
 0x119   :  { %v6508_v12 = vmul.f32 0.01, %v6501_v21  ;;  %v966_v55 = vand.u32 4294901760, %v791_v44  ;;  %vm665_vm2 = vcmp.gt.f32.partialorder %v601_v59, 0.0  ;;  %v739_v0 = vmul.f32 0.01, %v611_v46 }
 0x11a   :  { %v6511_v32 = vmul.f32 0.01, %v6504_v18  ;;  %v795_v35 = vsel %vm667_vm1, %v6374_v3, %v731_v1  ;;  %vm669_vm3 = vcmp.gt.f32.partialorder %v6381_v28, 0.0  ;;  %v741_v53 = vmul.f32 0.01, %v613_v2 }
 0x11b   :  { %v970_v37 = vand.u32 4294901760, %v795_v35  ;;  %v6515_v48 = vsub.f32 %v791_v44, %v966_v55  ;;  %v733_v23 = vmul.f32 0.01, %v6381_v28  ;;  %v793_v27 = vsel %vm665_vm2, %v601_v59, %v729_v54 }
 0x11c   :  { %vm662_vm4 = vcmp.gt.f32.partialorder %v598_v31, 0.0  ;;  %vm666_vm5 = vcmp.gt.f32.partialorder %v6372_v63, 0.0  ;;  %v730_v60 = vmul.f32 0.01, %v6372_v63  ;;  %v2556_v8 = vand.u32 4294901760, %v793_v27 }
 0x11d   :  { %v6520_v34 = vpack.c.bf16 %v970_v37, %v966_v55  ;;  %v6522_v4 = vsub.f32 %v795_v35, %v970_v37  ;;  %v797_v3 = vsel %vm669_vm3, %v6381_v28, %v733_v23  ;;  %v790_v1 = vsel %vm662_vm4, %v598_v31, %v726_v33 }
 0x11e   :  { %v2560_v41 = vand.u32 4294901760, %v797_v3  ;;  %v794_v44 = vsel %vm666_vm5, %v6372_v63, %v730_v60  ;;  %vm664_vm6 = vcmp.gt.f32.partialorder %v6472_v16, 0.0  ;;  %v6528_v59 = vsub.f32 %v793_v27, %v2556_v8 }
 0x11f   :  { %8456 = vst [vmem:[#allocation23_spill] sm:$0xff] %v6520_v34  ;;  %4611 = vmatprep.subr.bf16.mxu0 %v6520_v34  ;;  %v968_v54 = vand.u32 4294901760, %v790_v1  ;;  %v972_v57 = vand.u32 4294901760, %v794_v44  ;;  %vm668_vm7 = vcmp.gt.f32.partialorder %v6376_v51, 0.0  ;;  %v732_v28 = vmul.f32 0.01, %v6376_v51 }
 0x120   :  { %v6531_v55 = vpack.c.bf16 %v2560_v41, %v2556_v8  ;;  %v6533_v35 = vsub.f32 %v797_v3, %v2560_v41  ;;  %v792_v31 = vsel %vm664_vm6, %v6472_v16, %v728_v24  ;;  %vm671_vm8 = vcmp.gt.f32.partialorder %v6483_v40, 0.0 }
 0x121   :  { %v6537_v33 = vpack.c.bf16 %v972_v57, %v968_v54  ;;  %v6539_v63 = vsub.f32 %v790_v1, %v968_v54  ;;  %v6541_v37 = vsub.f32 %v794_v44, %v972_v57  ;;  %v2558_v23 = vand.u32 4294901760, %v792_v31 }
 0x122   :  { %8457 = vst [vmem:[#allocation24_spill] sm:$0xff] %v6531_v55  ;;  %4803 = vmatprep.subr.bf16.mxu1 %v6531_v55  ;;  %v796_v27 = vsel %vm668_vm7, %v6376_v51, %v732_v28  ;;  %vm675_vm9 = vcmp.gt.f32.partialorder %v611_v46, 0.0  ;;  %vm673_vm10 = vcmp.gt.f32.partialorder %v6488_v25, 0.0  ;;  %v799_v24 = vsel %vm671_vm8, %v6483_v40, %v735_v45 }
 0x123   :  { %8458 = vst [vmem:[#allocation25_spill] sm:$0xff] %v6537_v33  ;;  %4613 = vmatpush1.bf16.msra.mxu0 %v6537_v33  ;;  %v2562_v60 = vand.u32 4294901760, %v796_v27  ;;  %v6548_v16 = vsub.f32 %v792_v31, %v2558_v23  ;;  %v803_v3 = vsel %vm675_vm9, %v611_v46, %v739_v0  ;;  %v974_v57 = vand.u32 4294901760, %v799_v24 }
 0x124   :  { %v978_v8 = vand.u32 4294901760, %v803_v3  ;;  %vm677_vm11 = vcmp.gt.f32.partialorder %v613_v2, 0.0  ;;  %v801_v41 = vsel %vm673_vm10, %v6488_v25, %v737_v14  ;;  %vm670_vm12 = vcmp.gt.f32.partialorder %v6481_v22, 0.0 }
 0x125   :  { %v6552_v1 = vpack.c.bf16 %v2562_v60, %v2558_v23  ;;  %v6554_v51 = vsub.f32 %v796_v27, %v2562_v60  ;;  %v805_v44 = vsel %vm677_vm11, %v613_v2, %v741_v53  ;;  %v2564_v54 = vand.u32 4294901760, %v801_v41 }
 0x126   :  { %v6556_v28 = vpack.c.bf16 %v978_v8, %v974_v57  ;;  %v6558_v33 = vsub.f32 %v799_v24, %v974_v57  ;;  %v6560_v31 = vsub.f32 %v803_v3, %v978_v8  ;;  %v2568_v55 = vand.u32 4294901760, %v805_v44 }
 0x127   :  { %8459 = vst [vmem:[#allocation26_spill] sm:$0xff] %v6552_v1  ;;  %4805 = vmatpush1.bf16.msra.mxu1 %v6552_v1  ;;  %v6563_v40 = vsub.f32 %v801_v41, %v2564_v54  ;;  %vm674_vm13 = vcmp.gt.f32.partialorder %v6501_v21, 0.0  ;;  %vm672_vm14 = vcmp.gt.f32.partialorder %v6486_v30, 0.0  ;;  %v798_v14 = vsel %vm670_vm12, %v6481_v22, %v6491_v38 }
 0x128   :  { %8460 = vst [vmem:[#allocation27_spill] sm:$0xff] %v6556_v28  ;;  %4615 = vmatprep.subr.bf16.mxu0 %v6556_v28  ;;  %v6569_v25 = vpack.c.bf16 %v2568_v55, %v2564_v54  ;;  %v6571_v45 = vsub.f32 %v805_v44, %v2568_v55  ;;  %v802_v46 = vsel %vm674_vm13, %v6501_v21, %v6508_v12  ;;  %v976_v2 = vand.u32 4294901760, %v798_v14 }
 0x129   :  { %v980_v0 = vand.u32 4294901760, %v802_v46  ;;  %vm676_vm15 = vcmp.gt.f32.partialorder %v6504_v18, 0.0  ;;  %v800_v53 = vsel %vm672_vm14, %v6486_v30, %v6496_v36  ;;  %v8113_v27 = vand.u32 4294901760, %v5944_v56  ;;  %v806_v30 = vld [vmem:[%s8022_s3] sm:$0xff] }
 0x12a   :  { %8461 = vst [vmem:[#allocation28_spill] sm:$0xff] %v6569_v25  ;;  %4807 = vmatprep.subr.bf16.mxu1 %v6569_v25  ;;  %v804_v23 = vsel %vm676_vm15, %v6504_v18, %v6511_v32  ;;  %v2566_v55 = vand.u32 4294901760, %v800_v53  ;;  %v8112_v22 = vand.u32 4294901760, %v5951_v10  ;;  %v6587_v21 = vsub.f32 %v798_v14, %v976_v2 }
 0x12b   :  { %v6585_v38 = vpack.c.bf16 %v980_v0, %v976_v2  ;;  %v6589_v12 = vsub.f32 %v802_v46, %v980_v0  ;;  %v2570_v60 = vand.u32 4294901760, %v804_v23  ;;  %v1194_v18 = vsub.f32 %v5944_v56, %v8113_v27 }
 0x12c   :  { %v6594_v36 = vsub.f32 %v800_v53, %v2566_v55  ;;  %v1206_v32 = vsub.f32 %v5951_v10, %v8112_v22  ;;  %v8111_v24 = vand.u32 4294901760, %v5946_v61  ;;  %v8114_v8 = vand.u32 4294901760, %v5955_v42 }
 0x12d   :  { %8462 = vst [vmem:[#allocation72_spill] sm:$0xff] %v6585_v38  ;;  %4617 = vmatpush1.bf16.msra.mxu0 %v6585_v38  ;;  %v6604_v3 = vpack.c.bf16 %v2570_v60, %v2566_v55  ;;  %v6606_v57 = vsub.f32 %v804_v23, %v2570_v60  ;;  %v1195_v41 = vand.u32 4294901760, %v1194_v18  ;;  %v8115_v14 = vmov 0.0  }
 0x12e   :  { %8463 = vst [vmem:[#allocation73_spill] sm:$0xff] %v6594_v36  ;;  %v1207_v44 = vand.u32 4294901760, %v1206_v32  ;;  %v2784_v54 = vsub.f32 %v5946_v61, %v8111_v24  ;;  %1014 = vmatprep.mubr.f32.mxu0 %v8115_v14  ;;  %2604 = vmatprep.mubr.f32.mxu1 %v8115_v14  ;;  %v6614_v46 = vand.u32 4294901760, %v806_v30  ;;  %v2796_v2 = vsub.f32 %v5955_v42, %v8114_v8  ;;  %v8468_v32 = vld [vmem:[#allocation43_spill] sm:$0xff] }
 0x12f   :  { %8464 = vst [vmem:[#allocation74_spill] sm:$0xff] %v6604_v3  ;;  %8465 = vst [vmem:[#allocation75_spill] sm:$0xff] %v6606_v57  ;;  %4809 = vmatpush1.bf16.msra.mxu1 %v6604_v3  ;;  %v8118_v0 = vand.u32 4294901760, %v5962_v20  ;;  %v8117_v53 = vand.u32 4294901760, %v5964_v43  ;;  %v8121_v23 = vand.u32 4294901760, %v6013_v58  ;;  %v8124_v24 = vand.u32 4294901760, %v8468_v32 }
 0x130   :  { %8466 = vst [vmem:[#allocation76_spill] sm:$0xff] %v6614_v46  ;;  %v4618_v55 = vpack.c.bf16 %v1207_v44, %v1195_v41  ;;  %v2785_v60 = vand.u32 4294901760, %v2784_v54  ;;  %v6624_v18 = vsub.f32 %v806_v30, %v6614_v46  ;;  %v2797_v22 = vand.u32 4294901760, %v2796_v2  ;;  %v807_v2 = vld [vmem:[%s8022_s3 + $0x8] sm:$0xff]  ;;  %v809_v46 = vld [vmem:[%s8022_s3 + $0x18] sm:$0xff] }
 0x131   :  { %v1200_v27 = vsub.f32 %v5962_v20, %v8118_v0  ;;  %v1212_v8 = vsub.f32 %v5964_v43, %v8117_v53  ;;  %v2790_v14 = vsub.f32 %v6013_v58, %v8121_v23  ;;  %v2802_v30 = vsub.f32 %v8468_v32, %v8124_v24 }
 0x132   :  { %8467 = vst [vmem:[#allocation77_spill] sm:$0xff] %v6624_v18  ;;  %4619 = vmatprep.subr.bf16.mxu0 %v4618_v55  ;;  %v6637_v41 = vand.u32 4294901760, %v6624_v18  ;;  %v8131_v44 = vand.u32 4294901760, %v6061_v52  ;;  %v8132_v54 = vand.u32 4294901760, %v6063_v49  ;;  %v4810_v53 = vpack.c.bf16 %v2797_v22, %v2785_v60 }
 0x133   :  { %v1201_v0 = vand.u32 4294901760, %v1200_v27  ;;  %v1213_v3 = vand.u32 4294901760, %v1212_v8  ;;  %v2791_v23 = vand.u32 4294901760, %v2790_v14  ;;  %v2803_v38 = vand.u32 4294901760, %v2802_v30 }
 0x134   :  { %8469 = vst [vmem:[#allocation78_spill] sm:$0xff] %v6637_v41  ;;  %v1018_v55 = vsub.f32 %v6624_v18, %v6637_v41  ;;  %v1218_v24 = vsub.f32 %v6061_v52, %v8131_v44  ;;  %v1230_v25 = vsub.f32 %v6063_v49, %v8132_v54  ;;  %4811 = vmatprep.subr.bf16.mxu1 %v4810_v53  ;;  %v8137_v1 = vand.u32 4294901760, %v6065_v19 }
 0x135   :  { %v4620_v28 = vpack.c.bf16 %v1213_v3, %v1201_v0  ;;  %v8140_v27 = vand.u32 4294901760, %v6069_v47  ;;  %v6657_v22 = vand.u32 4294901760, %v807_v2  ;;  %v4812_v14 = vpack.c.bf16 %v2803_v38, %v2791_v23  ;;  %v8472_v0 = vld [vmem:[#allocation53_spill] sm:$0xff] }
 0x136   :  { %v1019_v8 = vand.u32 4294901760, %v1018_v55  ;;  %v1219_v60 = vand.u32 4294901760, %v1218_v24  ;;  %v1231_v30 = vand.u32 4294901760, %v1230_v25  ;;  %v2808_v44 = vsub.f32 %v6065_v19, %v8137_v1  ;;  %v8473_v55 = vld [vmem:[#allocation54_spill] sm:$0xff]  ;;  %v8474_v24 = vld [vmem:[#allocation55_spill] sm:$0xff]  ;;  %v8475_v23 = vld [vmem:[#allocation57_spill] sm:$0xff] }
 0x137   :  { %8470 = vst [vmem:[#allocation79_spill] sm:$0xff] %v6657_v22  ;;  %v2820_v54 = vsub.f32 %v6069_v47, %v8140_v27  ;;  %v6666_v3 = vsub.f32 %v807_v2, %v6657_v22  ;;  %v8141_v53 = vand.u32 4294901760, %v8472_v0  ;;  %v8145_v38 = vand.u32 4294901760, %v8473_v55  ;;  %v8479_v22 = vld [vmem:[#allocation60_spill] sm:$0xff] }
 0x138   :  { %1020 = vmatmul.mubr.f32.vlgmr.msra.gmra.mrb[0].mxu0 %v1019_v8  ;;  %2610 = vmatmul.mubr.f32.vlgmr.msra.gmra.mrb[0].mxu1 %v1019_v8  ;;  %v4622_v41 = vpack.c.bf16 %v1231_v30, %v1219_v60  ;;  %v8146_v25 = vand.u32 4294901760, %v8474_v24  ;;  %v8149_v34 = vand.u32 4294901760, %v8475_v23  ;;  %v2809_v1 = vand.u32 4294901760, %v2808_v44 }
 0x139   :  { %8471 = vst [vmem:[#allocation80_spill] sm:$0xff] %v6666_v3  ;;  %4621 = vmatpush1.bf16.msra.mxu0 %v4620_v28  ;;  %4813 = vmatpush1.bf16.msra.mxu1 %v4812_v14  ;;  %v2821_v18 = vand.u32 4294901760, %v2820_v54  ;;  %v6673_v27 = vand.u32 4294901760, %v6666_v3  ;;  %v1224_v2 = vsub.f32 %v8472_v0, %v8141_v53  ;;  %v8477_v8 = vmov 0.0   ;;  %v8478_v54 = vld [vmem:[#allocation59_spill] sm:$0xff] }
 0x13a   :  { %4623 = vmatprep.subr.bf16.mxu0 %v4622_v41  ;;  %1025 = vmatprep.mubr.f32.mxu0 %v8477_v8  ;;  %v1236_v60 = vsub.f32 %v8473_v55, %v8145_v38  ;;  %v2814_v28 = vsub.f32 %v8474_v24, %v8146_v25  ;;  %v2826_v44 = vsub.f32 %v8475_v23, %v8149_v34  ;;  %v8162_v14 = vand.u32 4294901760, %v8478_v54  ;;  %v808_v38 = vld [vmem:[%s8022_s3 + $0x10] sm:$0xff] }
 0x13b   :  { %8476 = vst [vmem:[#allocation81_spill] sm:$0xff] %v6673_v27  ;;  %v4814_v30 = vpack.c.bf16 %v2821_v18, %v2809_v1  ;;  %2615 = vmatprep.mubr.f32.mxu1 %v8477_v8  ;;  %v1029_v41 = vsub.f32 %v6666_v3, %v6673_v27  ;;  %v1225_v53 = vand.u32 4294901760, %v1224_v2  ;;  %v8161_v0 = vand.u32 4294901760, %v8479_v22  ;;  %v8480_v2 = vld [vmem:[#allocation62_spill] sm:$0xff]  ;;  %v8481_v3 = vld [vmem:[#allocation63_spill] sm:$0xff] }
 0x13c   :  { %v1237_v25 = vand.u32 4294901760, %v1236_v60  ;;  %v2815_v24 = vand.u32 4294901760, %v2814_v28  ;;  %v2827_v55 = vand.u32 4294901760, %v2826_v44  ;;  %v1242_v34 = vsub.f32 %v8478_v54, %v8162_v14 }
 0x13d   :  { %4815 = vmatprep.subr.bf16.mxu1 %v4814_v30  ;;  %v1030_v1 = vand.u32 4294901760, %v1029_v41  ;;  %v1254_v18 = vsub.f32 %v8479_v22, %v8161_v0  ;;  %v8165_v27 = vand.u32 4294901760, %v8480_v2  ;;  %v8167_v23 = vand.u32 4294901760, %v8481_v3  ;;  %v8483_v41 = vld [vmem:[#allocation5_spill] sm:$0xff] }
 0x13e   :  { %v4624_v47 = vpack.c.bf16 %v1237_v25, %v1225_v53  ;;  %v4816_v19 = vpack.c.bf16 %v2827_v55, %v2815_v24  ;;  %v1243_v49 = vand.u32 4294901760, %v1242_v34  ;;  %v6704_v60 = vand.u32 4294901760, %v808_v38  ;;  %v8485_v34 = vld [vmem:[#allocation6_spill] sm:$0xff]  ;;  %v8486_v24 = vld [vmem:[#allocation64_spill] sm:$0xff] }
 0x13f   :  { %1031 = vmatmul.mubr.f32.gmra.mrb[2].mxu0 %v1030_v1  ;;  %2621 = vmatmul.mubr.f32.gmra.mrb[2].mxu1 %v1030_v1  ;;  %v1255_v28 = vand.u32 4294901760, %v1254_v18  ;;  %v2832_v44 = vsub.f32 %v8480_v2, %v8165_v27  ;;  %v2844_v30 = vsub.f32 %v8481_v3, %v8167_v23  ;;  %v8166_v0 = vand.u32 4294901760, %v8483_v41  ;;  %v8487_v1 = vld [vmem:[#allocation65_spill] sm:$0xff] }
 0x140   :  { %8482 = vst [vmem:[#allocation59_spill] sm:$0xff] %v6704_v60  ;;  %4625 = vmatpush1.bf16.msra.mxu0 %v4624_v47  ;;  %4817 = vmatpush1.bf16.msra.mxu1 %v4816_v19  ;;  %v6714_v53 = vsub.f32 %v808_v38, %v6704_v60  ;;  %v8172_v55 = vand.u32 4294901760, %v8485_v34  ;;  %v8174_v25 = vand.u32 4294901760, %v8486_v24  ;;  %v8177_v18 = vand.u32 4294901760, %v8487_v1  ;;  %v8489_v23 = vld [vmem:[#allocation29_spill] sm:$0xff] }
 0x141   :  { %v4626_v14 = vpack.c.bf16 %v1255_v28, %v1243_v49  ;;  %v2833_v52 = vand.u32 4294901760, %v2832_v44  ;;  %v2845_v27 = vand.u32 4294901760, %v2844_v30  ;;  %1036 = vmatprep.mubr.f32.mxu0 %v8477_v8  ;;  %2626 = vmatprep.mubr.f32.mxu1 %v8477_v8  ;;  %v1248_v19 = vsub.f32 %v8483_v41, %v8166_v0 }
 0x142   :  { %8484 = vst [vmem:[#allocation60_spill] sm:$0xff] %v6714_v53  ;;  %v6725_v47 = vand.u32 4294901760, %v6714_v53  ;;  %v1260_v38 = vsub.f32 %v8485_v34, %v8172_v55  ;;  %v2838_v49 = vsub.f32 %v8486_v24, %v8174_v25  ;;  %v2850_v28 = vsub.f32 %v8487_v1, %v8177_v18  ;;  %v8491_v18 = vld [vmem:[#allocation10_spill] sm:$0xff] }
 0x143   :  { %4627 = vmatprep.subr.bf16.mxu0 %v4626_v14  ;;  %v4818_v44 = vpack.c.bf16 %v2845_v27, %v2833_v52  ;;  %v1249_v30 = vand.u32 4294901760, %v1248_v19  ;;  %v8187_v0 = vand.u32 4294901760, %v6231_v62  ;;  %v8186_v60 = vand.u32 4294901760, %v8489_v23  ;;  %v8490_v14 = vld [vmem:[#allocation30_spill] sm:$0xff] }
 0x144   :  { %8488 = vst [vmem:[#allocation62_spill] sm:$0xff] %v6725_v47  ;;  %v1040_v55 = vsub.f32 %v6714_v53, %v6725_v47  ;;  %v1261_v32 = vand.u32 4294901760, %v1260_v38  ;;  %v2839_v25 = vand.u32 4294901760, %v2838_v49  ;;  %v2851_v58 = vand.u32 4294901760, %v2850_v28  ;;  %v8497_v53 = vld [vmem:[#allocation67_spill] sm:$0xff] }
 0x145   :  { %4819 = vmatprep.subr.bf16.mxu1 %v4818_v44  ;;  %v1266_v52 = vsub.f32 %v6231_v62, %v8187_v0  ;;  %v1278_v27 = vsub.f32 %v8489_v23, %v8186_v60  ;;  %v8188_v19 = vand.u32 4294901760, %v8490_v14  ;;  %v8194_v43 = vand.u32 4294901760, %v8491_v18 }
 0x146   :  { %v1041_v20 = vand.u32 4294901760, %v1040_v55  ;;  %v4628_v1 = vpack.c.bf16 %v1261_v32, %v1249_v30  ;;  %v4820_v24 = vpack.c.bf16 %v2851_v58, %v2839_v25  ;;  %v6751_v47 = vand.u32 4294901760, %v809_v46  ;;  %v8494_v55 = vld [vmem:[#allocation11_spill] sm:$0xff]  ;;  %v8495_v58 = vld [vmem:[#allocation32_spill] sm:$0xff]  ;;  %v8496_v30 = vld [vmem:[#allocation66_spill] sm:$0xff] }
 0x147   :  { %v1267_v38 = vand.u32 4294901760, %v1266_v52  ;;  %v1279_v49 = vand.u32 4294901760, %v1278_v27  ;;  %v2856_v28 = vsub.f32 %v8490_v14, %v8188_v19  ;;  %v2868_v44 = vsub.f32 %v8491_v18, %v8194_v43 }
 0x148   :  { %8492 = vst [vmem:[#allocation63_spill] sm:$0xff] %v6751_v47  ;;  %1042 = vmatmul.mubr.f32.gmra.mrb[4].mxu0 %v1041_v20  ;;  %2632 = vmatmul.mubr.f32.gmra.mrb[4].mxu1 %v1041_v20  ;;  %v6760_v60 = vsub.f32 %v809_v46, %v6751_v47  ;;  %v8192_v32 = vand.u32 4294901760, %v8494_v55  ;;  %v8193_v25 = vand.u32 4294901760, %v8495_v58  ;;  %v8197_v52 = vand.u32 4294901760, %v8496_v30 }
 0x149   :  { %4629 = vmatpush1.bf16.msra.mxu0 %v4628_v1  ;;  %4821 = vmatpush1.bf16.msra.mxu1 %v4820_v24  ;;  %v4630_v27 = vpack.c.bf16 %v1279_v49, %v1267_v38  ;;  %v2857_v0 = vand.u32 4294901760, %v2856_v28  ;;  %v2869_v19 = vand.u32 4294901760, %v2868_v44  ;;  %v8198_v14 = vand.u32 4294901760, %v8497_v53 }
 0x14a   :  { %8493 = vst [vmem:[#allocation5_spill] sm:$0xff] %v6760_v60  ;;  %1047 = vmatprep.mubr.f32.mxu0 %v8477_v8  ;;  %2637 = vmatprep.mubr.f32.mxu1 %v8477_v8  ;;  %v6769_v20 = vand.u32 4294901760, %v6760_v60  ;;  %v1272_v46 = vsub.f32 %v8494_v55, %v8192_v32  ;;  %v1284_v24 = vsub.f32 %v8495_v58, %v8193_v25  ;;  %v8206_v28 = vand.u32 4294901760, %v6321_v15  ;;  %v810_v32 = vld [vmem:[%s8022_s3 + $0x20] sm:$0xff] }
 0x14b   :  { %v2862_v1 = vsub.f32 %v8496_v30, %v8197_v52  ;;  %4631 = vmatprep.subr.bf16.mxu0 %v4630_v27  ;;  %v4822_v38 = vpack.c.bf16 %v2869_v19, %v2857_v0  ;;  %v2874_v49 = vsub.f32 %v8497_v53, %v8198_v14  ;;  %v8205_v44 = vand.u32 4294901760, %v6327_v6  ;;  %v8499_v58 = vld [vmem:[#allocation15_spill] sm:$0xff] }
 0x14c   :  { %8498 = vst [vmem:[#allocation6_spill] sm:$0xff] %v6769_v20  ;;  %v1051_v25 = vsub.f32 %v6760_v60, %v6769_v20  ;;  %v1273_v43 = vand.u32 4294901760, %v1272_v46  ;;  %v1285_v47 = vand.u32 4294901760, %v1284_v24  ;;  %v1290_v19 = vsub.f32 %v6321_v15, %v8206_v28 }
 0x14d   :  { %v2863_v52 = vand.u32 4294901760, %v2862_v1  ;;  %4823 = vmatprep.subr.bf16.mxu1 %v4822_v38  ;;  %v2875_v0 = vand.u32 4294901760, %v2874_v49  ;;  %v1302_v27 = vsub.f32 %v6327_v6, %v8205_v44  ;;  %v8207_v14 = vand.u32 4294901760, %v6323_v11  ;;  %v8503_v44 = vld [vmem:[#allocation69_spill] sm:$0xff] }
 0x14e   :  { %v1052_v53 = vand.u32 4294901760, %v1051_v25  ;;  %v4632_v30 = vpack.c.bf16 %v1285_v47, %v1273_v43  ;;  %v8208_v55 = vand.u32 4294901760, %v8499_v58  ;;  %v6798_v20 = vand.u32 4294901760, %v810_v32  ;;  %v8502_v43 = vld [vmem:[#allocation16_spill] sm:$0xff] }
 0x14f   :  { %v4824_v46 = vpack.c.bf16 %v2875_v0, %v2863_v52  ;;  %v1291_v24 = vand.u32 4294901760, %v1290_v19  ;;  %v1303_v1 = vand.u32 4294901760, %v1302_v27  ;;  %v2880_v38 = vsub.f32 %v6323_v11, %v8207_v14  ;;  %v8504_v27 = vld [vmem:[#allocation71_spill] sm:$0xff] }
 0x150   :  { %8500 = vst [vmem:[#allocation29_spill] sm:$0xff] %v6798_v20  ;;  %1053 = vmatmul.mubr.f32.gmra.mrb[6].mxu0 %v1052_v53  ;;  %2643 = vmatmul.mubr.f32.gmra.mrb[6].mxu1 %v1052_v53  ;;  %v2892_v49 = vsub.f32 %v8499_v58, %v8208_v55  ;;  %v6807_v25 = vsub.f32 %v810_v32, %v6798_v20  ;;  %v8209_v47 = vand.u32 4294901760, %v8502_v43  ;;  %v8214_v28 = vand.u32 4294901760, %v8503_v44 }
 0x151   :  { %4633 = vmatpush1.bf16.msra.mxu0 %v4632_v30  ;;  %4825 = vmatpush1.bf16.msra.mxu1 %v4824_v46  ;;  %v4634_v52 = vpack.c.bf16 %v1303_v1, %v1291_v24  ;;  %v2881_v0 = vand.u32 4294901760, %v2880_v38  ;;  %v8215_v19 = vand.u32 4294901760, %v6360_v26  ;;  %v8216_v14 = vand.u32 4294901760, %v8504_v27 }
 0x152   :  { %8501 = vst [vmem:[#allocation10_spill] sm:$0xff] %v6807_v25  ;;  %v2893_v53 = vand.u32 4294901760, %v2892_v49  ;;  %1058 = vmatprep.mubr.f32.mxu0 %v8477_v8  ;;  %2648 = vmatprep.mubr.f32.mxu1 %v8477_v8  ;;  %v6816_v32 = vand.u32 4294901760, %v6807_v25  ;;  %v1296_v55 = vsub.f32 %v8502_v43, %v8209_v47  ;;  %v1308_v30 = vsub.f32 %v8503_v44, %v8214_v28 }
 0x153   :  { %4635 = vmatprep.subr.bf16.mxu0 %v4634_v52  ;;  %v2886_v46 = vsub.f32 %v6360_v26, %v8215_v19  ;;  %v2898_v24 = vsub.f32 %v8504_v27, %v8216_v14  ;;  %v8231_v1 = vand.u32 4294901760, %v6421_v50  ;;  %v8228_v38 = vand.u32 4294901760, %v6427_v9  ;;  %v811_v52 = vld [vmem:[%s8022_s3 + $0x28] sm:$0xff] }
 0x154   :  { %8505 = vst [vmem:[#allocation15_spill] sm:$0xff] %v6816_v32  ;;  %v4826_v49 = vpack.c.bf16 %v2893_v53, %v2881_v0  ;;  %v1062_v47 = vsub.f32 %v6807_v25, %v6816_v32  ;;  %v1297_v60 = vand.u32 4294901760, %v1296_v55  ;;  %v1309_v20 = vand.u32 4294901760, %v1308_v30 }
 0x155   :  { %v2887_v28 = vand.u32 4294901760, %v2886_v46  ;;  %v2899_v19 = vand.u32 4294901760, %v2898_v24  ;;  %v1314_v14 = vsub.f32 %v6421_v50, %v8231_v1  ;;  %v1326_v27 = vsub.f32 %v6427_v9, %v8228_v38 }
 0x156   :  { %4827 = vmatprep.subr.bf16.mxu1 %v4826_v49  ;;  %v1063_v0 = vand.u32 4294901760, %v1062_v47  ;;  %v4636_v53 = vpack.c.bf16 %v1309_v20, %v1297_v60  ;;  %v8226_v55 = vand.u32 4294901760, %v6423_v5  ;;  %v8224_v30 = vand.u32 4294901760, %v6432_v7 }
 0x157   :  { %v4828_v32 = vpack.c.bf16 %v2899_v19, %v2887_v28  ;;  %v1315_v25 = vand.u32 4294901760, %v1314_v14  ;;  %v1327_v26 = vand.u32 4294901760, %v1326_v27  ;;  %v6845_v46 = vand.u32 4294901760, %v811_v52 }
 0x158   :  { %1064 = vmatmul.mubr.f32.gmra.mrb[8].mxu0 %v1063_v0  ;;  %2654 = vmatmul.mubr.f32.gmra.mrb[8].mxu1 %v1063_v0  ;;  %v2904_v24 = vsub.f32 %v6423_v5, %v8226_v55  ;;  %v2916_v47 = vsub.f32 %v6432_v7, %v8224_v30  ;;  %v8225_v60 = vand.u32 4294901760, %v6435_v29  ;;  %v8227_v20 = vand.u32 4294901760, %v6444_v13 }
 0x159   :  { %8506 = vst [vmem:[#allocation16_spill] sm:$0xff] %v6845_v46  ;;  %4637 = vmatpush1.bf16.msra.mxu0 %v4636_v53  ;;  %4829 = vmatpush1.bf16.msra.mxu1 %v4828_v32  ;;  %v4638_v14 = vpack.c.bf16 %v1327_v26, %v1315_v25  ;;  %v6856_v28 = vsub.f32 %v811_v52, %v6845_v46  ;;  %v8229_v19 = vand.u32 4294901760, %v6454_v39  ;;  %v8230_v27 = vand.u32 4294901760, %v6470_v17 }
 0x15a   :  { %v2905_v49 = vand.u32 4294901760, %v2904_v24  ;;  %v2917_v0 = vand.u32 4294901760, %v2916_v47  ;;  %1069 = vmatprep.mubr.f32.mxu0 %v8477_v8  ;;  %2659 = vmatprep.mubr.f32.mxu1 %v8477_v8  ;;  %v1320_v30 = vsub.f32 %v6435_v29, %v8225_v60  ;;  %v1332_v26 = vsub.f32 %v6444_v13, %v8227_v20 }
 0x15b   :  { %8507 = vst [vmem:[#allocation69_spill] sm:$0xff] %v6856_v28  ;;  %4639 = vmatprep.subr.bf16.mxu0 %v4638_v14  ;;  %v6869_v25 = vand.u32 4294901760, %v6856_v28  ;;  %v2910_v32 = vsub.f32 %v6454_v39, %v8229_v19  ;;  %v2922_v52 = vsub.f32 %v6470_v17, %v8230_v27  ;;  %v8244_v53 = vand.u32 4294901760, %v6515_v48  ;;  %v812_v14 = vld [vmem:[%s8022_s3 + $0x30] sm:$0xff] }
 0x15c   :  { %v4830_v24 = vpack.c.bf16 %v2917_v0, %v2905_v49  ;;  %v1321_v47 = vand.u32 4294901760, %v1320_v30  ;;  %v1333_v60 = vand.u32 4294901760, %v1332_v26  ;;  %v8242_v55 = vand.u32 4294901760, %v6522_v4 }
 0x15d   :  { %8508 = vst [vmem:[#allocation82_spill] sm:$0xff] %v6869_v25  ;;  %v1073_v20 = vsub.f32 %v6856_v28, %v6869_v25  ;;  %v2911_v38 = vand.u32 4294901760, %v2910_v32  ;;  %v2923_v19 = vand.u32 4294901760, %v2922_v52  ;;  %v1338_v27 = vsub.f32 %v6515_v48, %v8244_v53 }
 0x15e   :  { %4831 = vmatprep.subr.bf16.mxu1 %v4830_v24  ;;  %v4640_v1 = vpack.c.bf16 %v1333_v60, %v1321_v47  ;;  %v1350_v30 = vsub.f32 %v6522_v4, %v8242_v55  ;;  %v8240_v49 = vand.u32 4294901760, %v6528_v59  ;;  %v8238_v0 = vand.u32 4294901760, %v6533_v35 }
 0x15f   :  { %v1074_v26 = vand.u32 4294901760, %v1073_v20  ;;  %v4832_v46 = vpack.c.bf16 %v2923_v19, %v2911_v38  ;;  %v1339_v17 = vand.u32 4294901760, %v1338_v27  ;;  %v6892_v25 = vand.u32 4294901760, %v812_v14 }
 0x160   :  { %4641 = vmatpush1.bf16.msra.mxu0 %v4640_v1  ;;  %v1351_v32 = vand.u32 4294901760, %v1350_v30  ;;  %v2928_v52 = vsub.f32 %v6528_v59, %v8240_v49  ;;  %v2940_v60 = vsub.f32 %v6533_v35, %v8238_v0  ;;  %v8239_v24 = vand.u32 4294901760, %v6539_v63  ;;  %v813_v49 = vld [vmem:[%s8022_s3 + $0x38] sm:$0xff] }
 0x161   :  { %8509 = vst [vmem:[#allocation83_spill] sm:$0xff] %v6892_v25  ;;  %1075 = vmatmul.mubr.f32.gmra.mrb[10].mxu0 %v1074_v26  ;;  %2665 = vmatmul.mubr.f32.gmra.mrb[10].mxu1 %v1074_v26  ;;  %v6902_v20 = vsub.f32 %v812_v14, %v6892_v25  ;;  %v8241_v38 = vand.u32 4294901760, %v6541_v37  ;;  %v8243_v1 = vand.u32 4294901760, %v6548_v16  ;;  %v8245_v19 = vand.u32 4294901760, %v6554_v51 }
 0x162   :  { %4833 = vmatpush1.bf16.msra.mxu1 %v4832_v46  ;;  %v4642_v27 = vpack.c.bf16 %v1351_v32, %v1339_v17  ;;  %v2929_v47 = vand.u32 4294901760, %v2928_v52  ;;  %v2941_v30 = vand.u32 4294901760, %v2940_v60  ;;  %1080 = vmatprep.mubr.f32.mxu0 %v8477_v8  ;;  %v1344_v0 = vsub.f32 %v6539_v63, %v8239_v24 }
 0x163   :  { %8510 = vst [vmem:[#allocation84_spill] sm:$0xff] %v6902_v20  ;;  %2670 = vmatprep.mubr.f32.mxu1 %v8477_v8  ;;  %v6913_v14 = vand.u32 4294901760, %v6902_v20  ;;  %v1356_v26 = vsub.f32 %v6541_v37, %v8241_v38  ;;  %v2934_v17 = vsub.f32 %v6548_v16, %v8243_v1  ;;  %v2946_v46 = vsub.f32 %v6554_v51, %v8245_v19 }
 0x164   :  { %4643 = vmatprep.subr.bf16.mxu0 %v4642_v27  ;;  %v4834_v32 = vpack.c.bf16 %v2941_v30, %v2929_v47  ;;  %v1345_v52 = vand.u32 4294901760, %v1344_v0  ;;  %v8258_v60 = vand.u32 4294901760, %v6558_v33  ;;  %v8252_v24 = vand.u32 4294901760, %v6560_v31 }
 0x165   :  { %8511 = vst [vmem:[#allocation85_spill] sm:$0xff] %v6913_v14  ;;  %v1084_v38 = vsub.f32 %v6902_v20, %v6913_v14  ;;  %v1357_v55 = vand.u32 4294901760, %v1356_v26  ;;  %v2935_v1 = vand.u32 4294901760, %v2934_v17  ;;  %v2947_v53 = vand.u32 4294901760, %v2946_v46 }
 0x166   :  { %4835 = vmatprep.subr.bf16.mxu1 %v4834_v32  ;;  %v1362_v27 = vsub.f32 %v6558_v33, %v8258_v60  ;;  %v1374_v0 = vsub.f32 %v6560_v31, %v8252_v24  ;;  %v8257_v47 = vand.u32 4294901760, %v6563_v40  ;;  %v8256_v30 = vand.u32 4294901760, %v6571_v45 }
 0x167   :  { %v1085_v19 = vand.u32 4294901760, %v1084_v38  ;;  %v4644_v28 = vpack.c.bf16 %v1357_v55, %v1345_v52  ;;  %v4836_v25 = vpack.c.bf16 %v2947_v53, %v2935_v1  ;;  %v6939_v14 = vand.u32 4294901760, %v813_v49 }
 0x168   :  { %v1363_v26 = vand.u32 4294901760, %v1362_v27  ;;  %v1375_v17 = vand.u32 4294901760, %v1374_v0  ;;  %v2952_v46 = vsub.f32 %v6563_v40, %v8257_v47  ;;  %v2964_v32 = vsub.f32 %v6571_v45, %v8256_v30  ;;  %v818_v30 = vld [vmem:[%s8022_s3 + $0x60] sm:$0xff] }
 0x169   :  { %8512 = vst [vmem:[#allocation86_spill] sm:$0xff] %v6939_v14  ;;  %1086 = vmatmul.mubr.f32.gmra.mrb[12].mxu0 %v1085_v19  ;;  %2676 = vmatmul.mubr.f32.gmra.mrb[12].mxu1 %v1085_v19  ;;  %v6948_v24 = vsub.f32 %v813_v49, %v6939_v14  ;;  %v8255_v55 = vand.u32 4294901760, %v6587_v21  ;;  %v8253_v53 = vand.u32 4294901760, %v6589_v12  ;;  %v8254_v38 = vand.u32 4294901760, %v6594_v36 }
 0x16a   :  { %4645 = vmatpush1.bf16.msra.mxu0 %v4644_v28  ;;  %4837 = vmatpush1.bf16.msra.mxu1 %v4836_v25  ;;  %v4646_v1 = vpack.c.bf16 %v1375_v17, %v1363_v26  ;;  %v2953_v52 = vand.u32 4294901760, %v2952_v46  ;;  %v2965_v27 = vand.u32 4294901760, %v2964_v32  ;;  %v8259_v0 = vand.u32 4294901760, %v6606_v57  ;;  %v814_v26 = vld [vmem:[%s8022_s3 + $0x40] sm:$0xff]  ;;  %v815_v17 = vld [vmem:[%s8022_s3 + $0x48] sm:$0xff]  ;;  %v816_v46 = vld [vmem:[%s8022_s3 + $0x50] sm:$0xff] }
 0x16b   :  { %8513 = vst [vmem:[#allocation87_spill] sm:$0xff] %v6948_v24  ;;  %1091 = vmatprep.mubr.f32.mxu0 %v8477_v8  ;;  %2681 = vmatprep.mubr.f32.mxu1 %v8477_v8  ;;  %v6957_v49 = vand.u32 4294901760, %v6948_v24  ;;  %v1368_v19 = vsub.f32 %v6587_v21, %v8255_v55  ;;  %v1380_v28 = vsub.f32 %v6589_v12, %v8253_v53  ;;  %v817_v55 = vld [vmem:[%s8022_s3 + $0x58] sm:$0xff]  ;;  %v6992_v20 = vand.u32 4294901760, %v815_v17 }
 0x16c   :  { %v2958_v25 = vsub.f32 %v6594_v36, %v8254_v38  ;;  %4647 = vmatprep.subr.bf16.mxu0 %v4646_v1  ;;  %v4838_v32 = vpack.c.bf16 %v2965_v27, %v2953_v52  ;;  %v2970_v53 = vsub.f32 %v6606_v57, %v8259_v0  ;;  %v4842_v38 = vpack.c.bf16 %v5955_v42, %v5946_v61 }
 0x16d   :  { %8514 = vst [vmem:[#allocation88_spill] sm:$0xff] %v6957_v49  ;;  %v1095_v47 = vsub.f32 %v6948_v24, %v6957_v49  ;;  %v1369_v1 = vand.u32 4294901760, %v1368_v19  ;;  %v1381_v52 = vand.u32 4294901760, %v1380_v28  ;;  %v6990_v0 = vand.u32 4294901760, %v814_v26  ;;  %8516 = vst [vmem:[#allocation90_spill] sm:$0xff] %v6992_v20  ;;  %v819_v19 = vld [vmem:[%s8022_s3 + $0x68] sm:$0xff] }
 0x16e   :  { %v2959_v27 = vand.u32 4294901760, %v2958_v25  ;;  %4839 = vmatprep.subr.bf16.mxu1 %v4838_v32  ;;  %v2971_v60 = vand.u32 4294901760, %v2970_v53  ;;  %v6994_v42 = vand.u32 4294901760, %v816_v46  ;;  %v6996_v57 = vand.u32 4294901760, %v817_v55  ;;  %v8539_v24 = vld [vmem:[#allocation11_spill] sm:$0xff] }
 0x16f   :  { %8515 = vst [vmem:[#allocation89_spill] sm:$0xff] %v6990_v0  ;;  %v1096_v61 = vand.u32 4294901760, %v1095_v47  ;;  %v4648_v14 = vpack.c.bf16 %v1381_v52, %v1369_v1  ;;  %v6998_v36 = vand.u32 4294901760, %v818_v30  ;;  %v7004_v25 = vsub.f32 %v814_v26, %v6990_v0 }
 0x170   :  { %8517 = vst [vmem:[#allocation91_spill] sm:$0xff] %v6994_v42  ;;  %8518 = vst [vmem:[#allocation92_spill] sm:$0xff] %v6996_v57  ;;  %v4840_v28 = vpack.c.bf16 %v2971_v60, %v2959_v27  ;;  %v7007_v53 = vsub.f32 %v815_v17, %v6992_v20  ;;  %v7010_v32 = vsub.f32 %v816_v46, %v6994_v42  ;;  %v7026_v46 = vand.u32 4294901760, %v819_v19  ;;  %v8546_v42 = vld [vmem:[#allocation22_spill] sm:$0xff] }
 0x171   :  { %8519 = vst [vmem:[#allocation93_spill] sm:$0xff] %v6998_v36  ;;  %8520 = vst [vmem:[#allocation94_spill] sm:$0xff] %v7004_v25  ;;  %1097 = vmatmul.mubr.f32.gmra.mrb[14].mxu0 %v1096_v61  ;;  %2687 = vmatmul.mubr.f32.gmra.mrb[14].mxu1 %v1096_v61  ;;  %v4650_v47 = vpack.c.bf16 %v5951_v10, %v5944_v56  ;;  %v7015_v1 = vsub.f32 %v817_v55, %v6996_v57  ;;  %v7018_v60 = vand.u32 4294901760, %v7004_v25  ;;  %v820_v61 = vld [vmem:[%s8022_s3 + $0x70] sm:$0xff]  ;;  %v8538_v56 = vld [vmem:[#allocation30_spill] sm:$0xff] }
 0x172   :  { %8521 = vst [vmem:[#allocation95_spill] sm:$0xff] %v7007_v53  ;;  %8522 = vst [vmem:[#allocation96_spill] sm:$0xff] %v7010_v32  ;;  %4649 = vmatpush1.bf16.msra.mxu0 %v4648_v14  ;;  %4841 = vmatpush1.bf16.msra.mxu1 %v4840_v28  ;;  %v7021_v26 = vand.u32 4294901760, %v7007_v53  ;;  %v7024_v17 = vsub.f32 %v818_v30, %v6998_v36  ;;  %v7038_v30 = vand.u32 4294901760, %v7010_v32  ;;  %v7043_v27 = vand.u32 4294901760, %v820_v61  ;;  %v8547_v36 = vld [vmem:[#allocation73_spill] sm:$0xff] }
 0x173   :  { %8523 = vst [vmem:[#allocation97_spill] sm:$0xff] %v7015_v1  ;;  %8524 = vst [vmem:[#allocation98_spill] sm:$0xff] %v7018_v60  ;;  %4651 = vmatprep.subr.bf16.mxu0 %v4650_v47  ;;  %4843 = vmatprep.subr.bf16.mxu1 %v4842_v38  ;;  %v1106_v14 = vsub.f32 %v7004_v25, %v7018_v60  ;;  %v7041_v52 = vand.u32 4294901760, %v7015_v1  ;;  %v7049_v47 = vsub.f32 %v819_v19, %v7026_v46  ;;  %v821_v60 = vld [vmem:[%s8022_s3 + $0x78] sm:$0xff] }
 0x174   :  { %8525 = vst [vmem:[#allocation99_spill] sm:$0xff] %v7021_v26  ;;  %8526 = vst [vmem:[#allocation100_spill] sm:$0xff] %v7024_v17  ;;  %1102 = vmatprep.mubr.f32.mxu0 %v8477_v8  ;;  %2692 = vmatprep.mubr.f32.mxu1 %v8477_v8  ;;  %v1117_v55 = vsub.f32 %v7007_v53, %v7021_v26  ;;  %v7046_v38 = vand.u32 4294901760, %v7024_v17  ;;  %v1128_v49 = vsub.f32 %v7010_v32, %v7038_v30 }
 0x175   :  { %8527 = vst [vmem:[#allocation101_spill] sm:$0xff] %v7026_v46  ;;  %8528 = vst [vmem:[#allocation102_spill] sm:$0xff] %v7038_v30  ;;  %v1107_v28 = vand.u32 4294901760, %v1106_v14  ;;  %v1139_v14 = vsub.f32 %v7015_v1, %v7041_v52  ;;  %v7061_v19 = vsub.f32 %v820_v61, %v7043_v27  ;;  %v7063_v53 = vand.u32 4294901760, %v821_v60  ;;  %v8537_v61 = vld [vmem:[#allocation65_spill] sm:$0xff]  ;;  %v8541_v46 = vld [vmem:[#allocation66_spill] sm:$0xff] }
 0x176   :  { %8529 = vst [vmem:[#allocation103_spill] sm:$0xff] %v7041_v52  ;;  %8530 = vst [vmem:[#allocation104_spill] sm:$0xff] %v7043_v27  ;;  %v1118_v26 = vand.u32 4294901760, %v1117_v55  ;;  %v1150_v25 = vsub.f32 %v7024_v17, %v7046_v38  ;;  %v7068_v55 = vand.u32 4294901760, %v7049_v47  ;;  %v1129_v17 = vand.u32 4294901760, %v1128_v49  ;;  %v8542_v30 = vld [vmem:[#allocation67_spill] sm:$0xff] }
 0x177   :  { %8531 = vst [vmem:[#allocation105_spill] sm:$0xff] %v7046_v38  ;;  %8532 = vst [vmem:[#allocation106_spill] sm:$0xff] %v7049_v47  ;;  %1108 = vmatmul.mubr.f32.gmra.mrb[16].mxu0 %v1107_v28  ;;  %2698 = vmatmul.mubr.f32.gmra.mrb[16].mxu1 %v1107_v28  ;;  %v8540_v28 = vld [vmem:[#allocation32_spill] sm:$0xff]  ;;  %v7091_v10 = vand.u32 4294901760, %v7061_v19  ;;  %v8544_v27 = vld [vmem:[#allocation70_spill] sm:$0xff]  ;;  %v1140_v52 = vand.u32 4294901760, %v1139_v14  ;;  %v7124_v32 = vsub.f32 %v821_v60, %v7063_v53 }
 0x178   :  { %1113 = vmatprep.mubr.f32.mxu0 %v8477_v8  ;;  %2703 = vmatprep.mubr.f32.mxu1 %v8477_v8  ;;  %8533 = vst [vmem:[#allocation107_spill] sm:$0xff] %v7061_v19  ;;  %8534 = vst [vmem:[#allocation108_spill] sm:$0xff] %v7063_v53  ;;  %v8545_v38 = vld [vmem:[#allocation71_spill] sm:$0xff]  ;;  %v1151_v14 = vand.u32 4294901760, %v1150_v25  ;;  %v1161_v57 = vsub.f32 %v7049_v47, %v7068_v55  ;;  %v8550_v0 = vand.u32 4294901760, %v8489_v23  ;;  %v8553_v25 = vand.u32 4294901760, %v8538_v56 }
 0x179   :  { %8535 = vst [vmem:[#allocation109_spill] sm:$0xff] %v7068_v55  ;;  %8543 = vst [vmem:[#allocation65_spill] sm:$0xff] %v7091_v10  ;;  %v8548_v49 = vld [vmem:[#allocation75_spill] sm:$0xff]  ;;  %v1172_v20 = vsub.f32 %v7061_v19, %v7091_v10  ;;  %v7141_v60 = vand.u32 4294901760, %v7124_v32  ;;  %v8556_v10 = vand.u32 4294901760, %v8539_v24  ;;  %v8557_v55 = vand.u32 4294901760, %v8540_v28 }
 0x17a   :  { %v8562_v47 = vand.u32 4294901760, %v6321_v15  ;;  %v8563_v53 = vand.u32 4294901760, %v6327_v6 }
 0x17b   :  { %1119 = vmatmul.mubr.f32.gmra.mrb[18].mxu0 %v1118_v26  ;;  %2709 = vmatmul.mubr.f32.gmra.mrb[18].mxu1 %v1118_v26  ;;  %v8549_v26 = vand.u32 4294901760, %v6231_v62  ;;  %8552 = vst [vmem:[#allocation32_spill] sm:$0xff] %v7141_v60  ;;  %v7153_v19 = vpack.c.bf16 %v8557_v55, %v8556_v10  ;;  %v8568_v10 = vand.u32 4294901760, %v8502_v43  ;;  %v8569_v55 = vand.u32 4294901760, %v8503_v44 }
 0x17c   :  { %1124 = vmatprep.mubr.f32.mxu0 %v8477_v8  ;;  %2714 = vmatprep.mubr.f32.mxu1 %v8477_v8  ;;  %v7165_v56 = vpack.c.bf16 %v8563_v53, %v8562_v47  ;;  %v8574_v53 = vand.u32 4294901760, %v6421_v50  ;;  %v8575_v47 = vand.u32 4294901760, %v6427_v9 }
 0x17d   :  { %v7136_v1 = vpack.c.bf16 %v8550_v0, %v8549_v26  ;;  %8558 = vst [vmem:[#allocation67_spill] sm:$0xff] %v7153_v19  ;;  %v8559_v0 = vand.u32 4294901760, %v8541_v46  ;;  %v8560_v26 = vand.u32 4294901760, %v8542_v30  ;;  %v7177_v19 = vpack.c.bf16 %v8569_v55, %v8568_v10 }
 0x17e   :  { %8564 = vst [vmem:[#allocation71_spill] sm:$0xff] %v7165_v56  ;;  %v7189_v56 = vpack.c.bf16 %v8575_v47, %v8574_v53  ;;  %v8580_v10 = vand.u32 4294901760, %v6435_v29  ;;  %v8581_v55 = vand.u32 4294901760, %v6444_v13  ;;  %v1162_v53 = vand.u32 4294901760, %v1161_v57 }
 0x17f   :  { %1130 = vmatmul.mubr.f32.gmra.mrb[20].mxu0 %v1129_v17  ;;  %2720 = vmatmul.mubr.f32.gmra.mrb[20].mxu1 %v1129_v17  ;;  %8551 = vst [vmem:[#allocation11_spill] sm:$0xff] %v7136_v1  ;;  %v7159_v1 = vpack.c.bf16 %v8560_v26, %v8559_v0  ;;  %8570 = vst [vmem:[#allocation73_spill] sm:$0xff] %v7177_v19  ;;  %v8571_v0 = vand.u32 4294901760, %v8544_v27  ;;  %v8572_v26 = vand.u32 4294901760, %v8545_v38  ;;  %v8586_v47 = vand.u32 4294901760, %v6515_v48 }
 0x180   :  { %1135 = vmatprep.mubr.f32.mxu0 %v8477_v8  ;;  %2725 = vmatprep.mubr.f32.mxu1 %v8477_v8  ;;  %8576 = vst [vmem:[#allocation110_spill] sm:$0xff] %v7189_v56  ;;  %v7201_v19 = vpack.c.bf16 %v8581_v55, %v8580_v10  ;;  %v8590_v10 = vand.u32 4294901760, %v6533_v35  ;;  %v8595_v57 = vand.u32 4294901760, %v6548_v16 }
 0x181   :  { %8561 = vst [vmem:[#allocation70_spill] sm:$0xff] %v7159_v1  ;;  %v7183_v1 = vpack.c.bf16 %v8572_v26, %v8571_v0  ;;  %v8583_v0 = vand.u32 4294901760, %v6454_v39  ;;  %v8584_v26 = vand.u32 4294901760, %v8546_v42 }
 0x182   :  { %8582 = vst [vmem:[#allocation112_spill] sm:$0xff] %v7201_v19  ;;  %v8592_v19 = vand.u32 4294901760, %v6539_v63 }
 0x183   :  { %1141 = vmatmul.mubr.f32.gmra.mrb[22].mxu0 %v1140_v52  ;;  %2731 = vmatmul.mubr.f32.gmra.mrb[22].mxu1 %v1140_v52  ;;  %v8554_v52 = vand.u32 4294901760, %v8491_v18  ;;  %8573 = vst [vmem:[#allocation75_spill] sm:$0xff] %v7183_v1  ;;  %v7207_v1 = vpack.c.bf16 %v8584_v26, %v8583_v0  ;;  %v8593_v0 = vand.u32 4294901760, %v6541_v37 }
 0x184   :  { %1146 = vmatprep.mubr.f32.mxu0 %v8477_v8  ;;  %2736 = vmatprep.mubr.f32.mxu1 %v8477_v8 }
 0x185   :  { %v7147_v17 = vpack.c.bf16 %v8554_v52, %v8553_v25  ;;  %v8565_v25 = vand.u32 4294901760, %v6323_v11  ;;  %v8566_v52 = vand.u32 4294901760, %v8499_v58  ;;  %8585 = vst [vmem:[#allocation113_spill] sm:$0xff] %v7207_v1  ;;  %v7225_v26 = vpack.c.bf16 %v8593_v0, %v8592_v19 }
 0x186   :  { %v8602_v19 = vand.u32 4294901760, %v6571_v45 }
 0x187   :  { %8555 = vst [vmem:[#allocation66_spill] sm:$0xff] %v7147_v17  ;;  %v7171_v17 = vpack.c.bf16 %v8566_v52, %v8565_v25  ;;  %v8577_v25 = vand.u32 4294901760, %v6423_v5  ;;  %v8578_v52 = vand.u32 4294901760, %v6432_v7  ;;  %1152 = vmatmul.mubr.f32.gmra.mrb[24].mxu0 %v1151_v14  ;;  %2742 = vmatmul.mubr.f32.gmra.mrb[24].mxu1 %v1151_v14  ;;  %8594 = vst [vmem:[#allocation116_spill] sm:$0xff] %v7225_v26  ;;  %v8596_v14 = vand.u32 4294901760, %v6554_v51 }
 0x188   :  { %1157 = vmatprep.mubr.f32.mxu0 %v8477_v8  ;;  %2747 = vmatprep.mubr.f32.mxu1 %v8477_v8  ;;  %v8604_v26 = vand.u32 4294901760, %v6587_v21 }
 0x189   :  { %8567 = vst [vmem:[#allocation22_spill] sm:$0xff] %v7171_v17  ;;  %v7195_v17 = vpack.c.bf16 %v8578_v52, %v8577_v25  ;;  %v8587_v25 = vand.u32 4294901760, %v6522_v4 }
 0x18b   :  { %8579 = vst [vmem:[#allocation111_spill] sm:$0xff] %v7195_v17  ;;  %v7213_v52 = vpack.c.bf16 %v8587_v25, %v8586_v47  ;;  %v8589_v17 = vand.u32 4294901760, %v6528_v59  ;;  %v7233_v47 = vpack.c.bf16 %v8596_v14, %v8595_v57  ;;  %v8598_v25 = vand.u32 4294901760, %v6558_v33  ;;  %1163 = vmatmul.mubr.f32.gmra.mrb[26].mxu0 %v1162_v53  ;;  %2753 = vmatmul.mubr.f32.gmra.mrb[26].mxu1 %v1162_v53  ;;  %v8611_v53 = vld [vmem:[#allocation42_spill] sm:$0xff] }
 0x18c   :  { %v8607_v57 = vand.u32 4294901760, %v8547_v36  ;;  %v8608_v14 = vand.u32 4294901760, %v8548_v49  ;;  %1168 = vmatprep.mubr.f32.mxu0 %v8477_v8  ;;  %2758 = vmatprep.mubr.f32.mxu1 %v8477_v8 }
 0x18d   :  { %8588 = vst [vmem:[#allocation114_spill] sm:$0xff] %v7213_v52  ;;  %v7219_v55 = vpack.c.bf16 %v8590_v10, %v8589_v17  ;;  %8597 = vst [vmem:[#allocation117_spill] sm:$0xff] %v7233_v47  ;;  %v8599_v17 = vand.u32 4294901760, %v6560_v31  ;;  %v8605_v52 = vand.u32 4294901760, %v6589_v12 }
 0x18e   :  { %v7257_v47 = vpack.c.bf16 %v8608_v14, %v8607_v57  ;;  %v8614_v14 = vld [vmem:[#allocation76_spill] sm:$0xff] }
 0x18f   :  { %8591 = vst [vmem:[#allocation115_spill] sm:$0xff] %v7219_v55  ;;  %v7239_v10 = vpack.c.bf16 %v8599_v17, %v8598_v25  ;;  %v8601_v55 = vand.u32 4294901760, %v6563_v40  ;;  %v7251_v1 = vpack.c.bf16 %v8605_v52, %v8604_v26  ;;  %v1173_v25 = vand.u32 4294901760, %v1172_v20  ;;  %v8610_v20 = vld [vmem:[#allocation41_spill] sm:$0xff] }
 0x190   :  { %8609 = vst [vmem:[#allocation121_spill] sm:$0xff] %v7257_v47  ;;  %v1183_v17 = vsub.f32 %v7124_v32, %v7141_v60  ;;  %v8612_v26 = vld [vmem:[#allocation45_spill] sm:$0xff] }
 0x191   :  { %8600 = vst [vmem:[#allocation118_spill] sm:$0xff] %v7239_v10  ;;  %v7245_v0 = vpack.c.bf16 %v8602_v19, %v8601_v55  ;;  %8606 = vst [vmem:[#allocation120_spill] sm:$0xff] %v7251_v1  ;;  %1174 = vmatmul.mubr.f32.gmra.mrb[28].mxu0 %v1173_v25  ;;  %2764 = vmatmul.mubr.f32.gmra.mrb[28].mxu1 %v1173_v25  ;;  %v4652_v55 = vpack.c.bf16 %v8611_v53, %v8610_v20  ;;  %v8613_v19 = vld [vmem:[#allocation43_spill] sm:$0xff]  ;;  %v8617_v47 = vld [vmem:[#allocation49_spill] sm:$0xff] }
 0x192   :  { %v1184_v52 = vand.u32 4294901760, %v1183_v17  ;;  %1179 = vmatprep.mubr.f32.mxu0 %v8477_v8  ;;  %2769 = vmatprep.mubr.f32.mxu1 %v8477_v8  ;;  %v4844_v57 = vpack.c.bf16 %v8613_v19, %v8612_v26  ;;  %v8615_v25 = vld [vmem:[#allocation47_spill] sm:$0xff]  ;;  %v8616_v17 = vld [vmem:[#allocation48_spill] sm:$0xff]  ;;  %v8620_v10 = vld [vmem:[#allocation54_spill] sm:$0xff] }
 0x193   :  { %8603 = vst [vmem:[#allocation119_spill] sm:$0xff] %v7245_v0  ;;  %v4654_v60 = vpack.c.bf16 %v8616_v17, %v8615_v25  ;;  %v8618_v1 = vld [vmem:[#allocation51_spill] sm:$0xff]  ;;  %v8619_v0 = vld [vmem:[#allocation53_spill] sm:$0xff] }
 0x194   :  { %v4656_v56 = vpack.c.bf16 %v8620_v10, %v8619_v0  ;;  %v8621_v19 = vld [vmem:[#allocation55_spill] sm:$0xff]  ;;  %v8622_v26 = vld [vmem:[#allocation57_spill] sm:$0xff] }
 0x195   :  { %1185 = vmatmul.mubr.f32.gmra.mrb[30].mxu0 %v1184_v52  ;;  %2775 = vmatmul.mubr.f32.gmra.mrb[30].mxu1 %v1184_v52  ;;  %v4846_v52 = vpack.c.bf16 %v8618_v1, %v8617_v47  ;;  %v8623_v53 = vld [vmem:[#allocation79_spill] sm:$0xff] }
 0x196   :  { %1415 = vmatprep.mubr.f32.mxu0 %v8477_v8  ;;  %3005 = vmatprep.mubr.f32.mxu1 %v8477_v8 }
 0x199   :  { %1417 = vmatmul.mubr.f32.vlgmr.msra.gmra.mrb[0].mxu0 %v8614_v14  ;;  %3007 = vmatmul.mubr.f32.vlgmr.msra.gmra.mrb[0].mxu1 %v8614_v14  ;;  %v4848_v14 = vpack.c.bf16 %v8622_v26, %v8621_v19 }
 0x19a   :  { %4653 = vmatpush1.bf16.msra.mxu0 %v4652_v55  ;;  %4845 = vmatpush1.bf16.msra.mxu1 %v4844_v57  ;;  %v8625_v55 = vpack.c.bf16 %v8481_v3, %v8480_v2  ;;  %v8626_v57 = vld [vmem:[#allocation59_spill] sm:$0xff] }
 0x19b   :  { %4655 = vmatprep.subr.bf16.mxu0 %v4654_v60  ;;  %4847 = vmatprep.subr.bf16.mxu1 %v4846_v52  ;;  %v8624_v60 = vpack.c.bf16 %v8479_v22, %v8478_v54 }
 0x19c   :  { %1422 = vmatprep.mubr.f32.mxu0 %v8477_v8  ;;  %3012 = vmatprep.mubr.f32.mxu1 %v8477_v8 }
 0x19d   :  { %1424 = vmatmul.mubr.f32.gmra.mrb[2].mxu0 %v8623_v53  ;;  %3014 = vmatmul.mubr.f32.gmra.mrb[2].mxu1 %v8623_v53 }
 0x19e   :  { %4657 = vmatpush1.bf16.msra.mxu0 %v4656_v56  ;;  %4849 = vmatpush1.bf16.msra.mxu1 %v4848_v14  ;;  %v8627_v56 = vpack.c.bf16 %v8485_v34, %v8483_v41  ;;  %v8628_v14 = vld [vmem:[#allocation64_spill] sm:$0xff] }
 0x19f   :  { %4659 = vmatprep.subr.bf16.mxu0 %v8624_v60  ;;  %4851 = vmatprep.subr.bf16.mxu1 %v8625_v55  ;;  %v8629_v52 = vpack.c.bf16 %v8537_v61, %v8628_v14  ;;  %v8630_v60 = vpack.c.bf16 %v8489_v23, %v6231_v62  ;;  %v8631_v55 = vld [vmem:[#allocation30_spill] sm:$0xff]  ;;  %v8635_v62 = vpack.c.bf16 %v8542_v30, %v8541_v46 }
 0x1a0   :  { %1429 = vmatprep.mubr.f32.mxu0 %v8477_v8  ;;  %3019 = vmatprep.mubr.f32.mxu1 %v8477_v8  ;;  %v8632_v53 = vpack.c.bf16 %v8491_v18, %v8631_v55  ;;  %v8636_v23 = vpack.c.bf16 %v6327_v6, %v6321_v15  ;;  %v8637_v18 = vpack.c.bf16 %v8499_v58, %v6323_v11  ;;  %v8643_v58 = vld [vmem:[#allocation16_spill] sm:$0xff]  ;;  %v8669_v46 = vld [vmem:[#allocation46_spill] sm:$0xff]  ;;  %v8677_v55 = vld [vmem:[#allocation33_spill] sm:$0xff] }
 0x1a1   :  { %1431 = vmatmul.mubr.f32.gmra.mrb[4].mxu0 %v8626_v57  ;;  %3021 = vmatmul.mubr.f32.gmra.mrb[4].mxu1 %v8626_v57  ;;  %v8633_v57 = vld [vmem:[#allocation63_spill] sm:$0xff]  ;;  %v8640_v15 = vpack.c.bf16 %v8545_v38, %v8544_v27  ;;  %v8641_v11 = vpack.c.bf16 %v6427_v9, %v6421_v50  ;;  %v8642_v6 = vpack.c.bf16 %v6432_v7, %v6423_v5  ;;  %v8670_v30 = vld [vmem:[#allocation50_spill] sm:$0xff]  ;;  %v8671_v27 = vld [vmem:[#allocation80_spill] sm:$0xff] }
 0x1a2   :  { %4661 = vmatpush1.bf16.msra.mxu0 %v8627_v56  ;;  %4853 = vmatpush1.bf16.msra.mxu1 %v8629_v52  ;;  %v8634_v56 = vpack.c.bf16 %v8540_v28, %v8539_v24  ;;  %v8639_v24 = vpack.c.bf16 %v8503_v44, %v8502_v43  ;;  %v8644_v44 = vpack.c.bf16 %v6444_v13, %v6435_v29  ;;  %v8648_v7 = vld [vmem:[#allocation83_spill] sm:$0xff]  ;;  %v8668_v43 = vld [vmem:[#allocation44_spill] sm:$0xff]  ;;  %v8675_v52 = vld [vmem:[#allocation61_spill] sm:$0xff] }
 0x1a3   :  { %4663 = vmatprep.subr.bf16.mxu0 %v8630_v60  ;;  %4855 = vmatprep.subr.bf16.mxu1 %v8632_v53  ;;  %v8638_v53 = vld [vmem:[#allocation29_spill] sm:$0xff]  ;;  %v8645_v50 = vpack.c.bf16 %v8546_v42, %v6454_v39  ;;  %v8646_v5 = vpack.c.bf16 %v6522_v4, %v6515_v48  ;;  %v8647_v9 = vpack.c.bf16 %v6533_v35, %v6528_v59  ;;  %v8653_v48 = vld [vmem:[#allocation86_spill] sm:$0xff]  ;;  %v8656_v35 = vld [vmem:[#allocation36_spill] sm:$0xff] }
 0x1a4   :  { %1436 = vmatprep.mubr.f32.mxu0 %v8477_v8  ;;  %3026 = vmatprep.mubr.f32.mxu1 %v8477_v8  ;;  %v8649_v42 = vpack.c.bf16 %v6541_v37, %v6539_v63  ;;  %v8650_v29 = vpack.c.bf16 %v6554_v51, %v6548_v16  ;;  %v8651_v13 = vpack.c.bf16 %v6560_v31, %v6558_v33  ;;  %v8657_v33 = vld [vmem:[#allocation38_spill] sm:$0xff]  ;;  %v8658_v63 = vld [vmem:[#allocation89_spill] sm:$0xff]  ;;  %v8660_v16 = vld [vmem:[#allocation91_spill] sm:$0xff] }
 0x1a5   :  { %1438 = vmatmul.mubr.f32.gmra.mrb[6].mxu0 %v8633_v57  ;;  %3028 = vmatmul.mubr.f32.gmra.mrb[6].mxu1 %v8633_v57  ;;  %v8652_v39 = vpack.c.bf16 %v6571_v45, %v6563_v40  ;;  %v8654_v4 = vpack.c.bf16 %v6589_v12, %v6587_v21  ;;  %v8655_v59 = vpack.c.bf16 %v8548_v49, %v8547_v36  ;;  %v8659_v37 = vld [vmem:[#allocation90_spill] sm:$0xff]  ;;  %v8661_v51 = vld [vmem:[#allocation92_spill] sm:$0xff]  ;;  %v8662_v31 = vld [vmem:[#allocation93_spill] sm:$0xff] }
 0x1a6   :  { %4665 = vmatpush1.bf16.msra.mxu0 %v8634_v56  ;;  %4857 = vmatpush1.bf16.msra.mxu1 %v8635_v62  ;;  %v8663_v40 = vld [vmem:[#allocation101_spill] sm:$0xff]  ;;  %v8664_v45 = vld [vmem:[#allocation104_spill] sm:$0xff]  ;;  %v8674_v49 = vld [vmem:[#allocation58_spill] sm:$0xff] }
 0x1a7   :  { %4667 = vmatprep.subr.bf16.mxu0 %v8636_v23  ;;  %4859 = vmatprep.subr.bf16.mxu1 %v8637_v18  ;;  %v8665_v21 = vld [vmem:[#allocation108_spill] sm:$0xff]  ;;  %v8666_v12 = vld [vmem:[#allocation77_spill] sm:$0xff]  ;;  %v8678_v56 = vld [vmem:[#allocation7_spill] sm:$0xff] }
 0x1a8   :  { %1443 = vmatprep.mubr.f32.mxu0 %v8477_v8  ;;  %3033 = vmatprep.mubr.f32.mxu1 %v8477_v8  ;;  %v8667_v36 = vld [vmem:[#allocation40_spill] sm:$0xff]  ;;  %v8680_v23 = vld [vmem:[#allocation9_spill] sm:$0xff] }
 0x1a9   :  { %1445 = vmatmul.mubr.f32.gmra.mrb[8].mxu0 %v8638_v53  ;;  %3035 = vmatmul.mubr.f32.gmra.mrb[8].mxu1 %v8638_v53  ;;  %v8672_v38 = vld [vmem:[#allocation52_spill] sm:$0xff]  ;;  %v8681_v18 = vld [vmem:[#allocation5_spill] sm:$0xff] }
 0x1aa   :  { %4669 = vmatpush1.bf16.msra.mxu0 %v8639_v24  ;;  %4861 = vmatpush1.bf16.msra.mxu1 %v8640_v15  ;;  %v8673_v28 = vld [vmem:[#allocation56_spill] sm:$0xff]  ;;  %v8682_v24 = vld [vmem:[#allocation31_spill] sm:$0xff] }
 0x1ab   :  { %4671 = vmatprep.subr.bf16.mxu0 %v8641_v11  ;;  %4863 = vmatprep.subr.bf16.mxu1 %v8642_v6  ;;  %v8676_v60 = vld [vmem:[#allocation60_spill] sm:$0xff]  ;;  %v8684_v11 = vld [vmem:[#allocation13_spill] sm:$0xff]  ;;  %v8685_v6 = vld [vmem:[#allocation14_spill] sm:$0xff] }
 0x1ac   :  { %1450 = vmatprep.mubr.f32.mxu0 %v8477_v8  ;;  %3040 = vmatprep.mubr.f32.mxu1 %v8477_v8  ;;  %v8679_v62 = vld [vmem:[#allocation8_spill] sm:$0xff] }
 0x1ad   :  { %1452 = vmatmul.mubr.f32.gmra.mrb[10].mxu0 %v8643_v58  ;;  %3042 = vmatmul.mubr.f32.gmra.mrb[10].mxu1 %v8643_v58  ;;  %v8683_v15 = vld [vmem:[#allocation12_spill] sm:$0xff] }
 0x1ae   :  { %4673 = vmatpush1.bf16.msra.mxu0 %v8644_v44  ;;  %4865 = vmatpush1.bf16.msra.mxu1 %v8645_v50  ;;  %v8686_v44 = vld [vmem:[#allocation10_spill] sm:$0xff]  ;;  %v8687_v50 = vld [vmem:[#allocation68_spill] sm:$0xff] }
 0x1af   :  { %4675 = vmatprep.subr.bf16.mxu0 %v8646_v5  ;;  %4867 = vmatprep.subr.bf16.mxu1 %v8647_v9  ;;  %v8688_v5 = vld [vmem:[#allocation17_spill] sm:$0xff]  ;;  %v8689_v9 = vld [vmem:[#allocation18_spill] sm:$0xff] }
 0x1b0   :  { %1457 = vmatprep.mubr.f32.mxu0 %v8477_v8  ;;  %3047 = vmatprep.mubr.f32.mxu1 %v8477_v8 }
 0x1b1   :  { %1459 = vmatmul.mubr.f32.gmra.mrb[12].mxu0 %v8648_v7  ;;  %3049 = vmatmul.mubr.f32.gmra.mrb[12].mxu1 %v8648_v7 }
 0x1b2   :  { %4677 = vmatpush1.bf16.msra.mxu0 %v8649_v42  ;;  %4869 = vmatpush1.bf16.msra.mxu1 %v8650_v29  ;;  %v8690_v42 = vld [vmem:[#allocation19_spill] sm:$0xff]  ;;  %v8691_v29 = vld [vmem:[#allocation69_spill] sm:$0xff] }
 0x1b3   :  { %4679 = vmatprep.subr.bf16.mxu0 %v8651_v13  ;;  %4871 = vmatprep.subr.bf16.mxu1 %v8652_v39  ;;  %v8692_v13 = vld [vmem:[#allocation20_spill] sm:$0xff]  ;;  %v8693_v39 = vld [vmem:[#allocation21_spill] sm:$0xff] }
 0x1b4   :  { %1464 = vmatprep.mubr.f32.mxu0 %v8477_v8  ;;  %3054 = vmatprep.mubr.f32.mxu1 %v8477_v8 }
 0x1b5   :  { %1466 = vmatmul.mubr.f32.gmra.mrb[14].mxu0 %v8653_v48  ;;  %3056 = vmatmul.mubr.f32.gmra.mrb[14].mxu1 %v8653_v48 }
 0x1b6   :  { %4681 = vmatpush1.bf16.msra.mxu0 %v8654_v4  ;;  %4873 = vmatpush1.bf16.msra.mxu1 %v8655_v59  ;;  %v8694_v4 = vld [vmem:[#allocation23_spill] sm:$0xff]  ;;  %v8695_v59 = vld [vmem:[#allocation24_spill] sm:$0xff] }
 0x1b7   :  { %4683 = vmatprep.subr.bf16.mxu0 %v8656_v35  ;;  %4875 = vmatprep.subr.bf16.mxu1 %v8657_v33 }
 0x1b8   :  { %1471 = vmatprep.mubr.f32.mxu0 %v8477_v8  ;;  %3061 = vmatprep.mubr.f32.mxu1 %v8477_v8 }
 0x1b9   :  { %1473 = vmatmul.mubr.f32.gmra.mrb[16].mxu0 %v8658_v63  ;;  %3063 = vmatmul.mubr.f32.gmra.mrb[16].mxu1 %v8658_v63 }
 0x1ba   :  { %1478 = vmatprep.mubr.f32.mxu0 %v8477_v8  ;;  %3068 = vmatprep.mubr.f32.mxu1 %v8477_v8 }
 0x1bd   :  { %1480 = vmatmul.mubr.f32.gmra.mrb[18].mxu0 %v8659_v37  ;;  %3070 = vmatmul.mubr.f32.gmra.mrb[18].mxu1 %v8659_v37  ;;  %v8708_v37 = vld [vmem:[#allocation39_spill] sm:$0xff] }
 0x1be   :  { %1485 = vmatprep.mubr.f32.mxu0 %v8477_v8  ;;  %3075 = vmatprep.mubr.f32.mxu1 %v8477_v8  ;;  %v8709_v63 = vand.u32 4294901760, %v8708_v37  ;;  %v8713_v37 = vld [vmem:[#allocation95_spill] sm:$0xff] }
 0x1c1   :  { %1487 = vmatmul.mubr.f32.gmra.mrb[20].mxu0 %v8660_v16  ;;  %3077 = vmatmul.mubr.f32.gmra.mrb[20].mxu1 %v8660_v16 }
 0x1c2   :  { %1492 = vmatprep.mubr.f32.mxu0 %v8477_v8  ;;  %3082 = vmatprep.mubr.f32.mxu1 %v8477_v8 }
 0x1c5   :  { %1494 = vmatmul.mubr.f32.gmra.mrb[22].mxu0 %v8661_v51  ;;  %3084 = vmatmul.mubr.f32.gmra.mrb[22].mxu1 %v8661_v51  ;;  %v8706_v51 = vld [vmem:[#allocation35_spill] sm:$0xff] }
 0x1c6   :  { %1499 = vmatprep.mubr.f32.mxu0 %v8477_v8  ;;  %3089 = vmatprep.mubr.f32.mxu1 %v8477_v8  ;;  %v8707_v16 = vand.u32 4294901760, %v8706_v51  ;;  %v8717_v51 = vld [vmem:[#allocation106_spill] sm:$0xff] }
 0x1c8   :  { %v4906_v48 = vpack.c.bf16 %v8709_v63, %v8707_v16  ;;  %v8715_v63 = vld [vmem:[#allocation97_spill] sm:$0xff]  ;;  %v8716_v16 = vld [vmem:[#allocation100_spill] sm:$0xff] }
 0x1c9   :  { %1501 = vmatmul.mubr.f32.gmra.mrb[24].mxu0 %v8662_v31  ;;  %3091 = vmatmul.mubr.f32.gmra.mrb[24].mxu1 %v8662_v31 }
 0x1ca   :  { %1506 = vmatprep.mubr.f32.mxu0 %v8477_v8  ;;  %3096 = vmatprep.mubr.f32.mxu1 %v8477_v8 }
 0x1cd   :  { %1508 = vmatmul.mubr.f32.gmra.mrb[26].mxu0 %v8663_v40  ;;  %3098 = vmatmul.mubr.f32.gmra.mrb[26].mxu1 %v8663_v40  ;;  %v8704_v40 = vld [vmem:[#allocation37_spill] sm:$0xff] }
 0x1ce   :  { %1513 = vmatprep.mubr.f32.mxu0 %v8477_v8  ;;  %3103 = vmatprep.mubr.f32.mxu1 %v8477_v8 }
 0x1d1   :  { %1515 = vmatmul.mubr.f32.gmra.mrb[28].mxu0 %v8664_v45  ;;  %3105 = vmatmul.mubr.f32.gmra.mrb[28].mxu1 %v8664_v45 }
 0x1d2   :  { %1520 = vmatprep.mubr.f32.mxu0 %v8477_v8  ;;  %3110 = vmatprep.mubr.f32.mxu1 %v8477_v8 }
 0x1d5   :  { %1522 = vmatmul.mubr.f32.gmra.mrb[30].mxu0 %v8665_v21  ;;  %3112 = vmatmul.mubr.f32.gmra.mrb[30].mxu1 %v8665_v21  ;;  %v8702_v21 = vld [vmem:[#allocation34_spill] sm:$0xff] }
 0x1d6   :  { %1656 = vmatprep.mubr.f32.mxu0 %v8477_v8  ;;  %3246 = vmatprep.mubr.f32.mxu1 %v8477_v8  ;;  %v8703_v45 = vand.u32 4294901760, %v8702_v21 }
 0x1d9   :  { %1659 = vmatmul.mubr.f32.vlgmr.msra.gmra.mrb[0].mxu0 %v8666_v12  ;;  %3249 = vmatmul.mubr.f32.vlgmr.msra.gmra.mrb[0].mxu1 %v8666_v12  ;;  %v8696_v12 = vld [vmem:[#allocation84_spill] sm:$0xff] }
 0x1da   :  { %4685 = vmatpush1.bf16.msra.mxu0 %v8667_v36  ;;  %4877 = vmatpush1.bf16.msra.mxu1 %v8668_v43 }
 0x1db   :  { %4687 = vmatprep.subr.bf16.mxu0 %v8669_v46  ;;  %4879 = vmatprep.subr.bf16.mxu1 %v8670_v30 }
 0x1dc   :  { %1664 = vmatprep.mubr.f32.mxu0 %v8477_v8  ;;  %3254 = vmatprep.mubr.f32.mxu1 %v8477_v8 }
 0x1dd   :  { %1667 = vmatmul.mubr.f32.gmra.mrb[2].mxu0 %v8671_v27  ;;  %3257 = vmatmul.mubr.f32.gmra.mrb[2].mxu1 %v8671_v27  ;;  %v8697_v27 = vld [vmem:[#allocation25_spill] sm:$0xff] }
 0x1de   :  { %4689 = vmatpush1.bf16.msra.mxu0 %v8672_v38  ;;  %4881 = vmatpush1.bf16.msra.mxu1 %v8673_v28 }
 0x1df   :  { %4691 = vmatprep.subr.bf16.mxu0 %v8674_v49  ;;  %4883 = vmatprep.subr.bf16.mxu1 %v8675_v52 }
 0x1e0   :  { %1672 = vmatprep.mubr.f32.mxu0 %v8477_v8  ;;  %3262 = vmatprep.mubr.f32.mxu1 %v8477_v8 }
 0x1e1   :  { %1675 = vmatmul.mubr.f32.gmra.mrb[4].mxu0 %v8676_v60  ;;  %3265 = vmatmul.mubr.f32.gmra.mrb[4].mxu1 %v8676_v60  ;;  %v8698_v60 = vld [vmem:[#allocation26_spill] sm:$0xff] }
 0x1e2   :  { %4693 = vmatpush1.bf16.msra.mxu0 %v8677_v55  ;;  %4885 = vmatpush1.bf16.msra.mxu1 %v8678_v56 }
 0x1e3   :  { %4695 = vmatprep.subr.bf16.mxu0 %v8679_v62  ;;  %4887 = vmatprep.subr.bf16.mxu1 %v8680_v23 }
 0x1e4   :  { %1680 = vmatprep.mubr.f32.mxu0 %v8477_v8  ;;  %3270 = vmatprep.mubr.f32.mxu1 %v8477_v8 }
 0x1e5   :  { %1683 = vmatmul.mubr.f32.gmra.mrb[6].mxu0 %v8681_v18  ;;  %3273 = vmatmul.mubr.f32.gmra.mrb[6].mxu1 %v8681_v18  ;;  %v8699_v18 = vld [vmem:[#allocation27_spill] sm:$0xff] }
 0x1e6   :  { %4697 = vmatpush1.bf16.msra.mxu0 %v8682_v24  ;;  %4889 = vmatpush1.bf16.msra.mxu1 %v8683_v15 }
 0x1e7   :  { %4699 = vmatprep.subr.bf16.mxu0 %v8684_v11  ;;  %4891 = vmatprep.subr.bf16.mxu1 %v8685_v6 }
 0x1e8   :  { %1688 = vmatprep.mubr.f32.mxu0 %v8477_v8  ;;  %3278 = vmatprep.mubr.f32.mxu1 %v8477_v8 }
 0x1e9   :  { %1691 = vmatmul.mubr.f32.gmra.mrb[8].mxu0 %v8686_v44  ;;  %3281 = vmatmul.mubr.f32.gmra.mrb[8].mxu1 %v8686_v44  ;;  %v8700_v44 = vld [vmem:[#allocation28_spill] sm:$0xff] }
 0x1ea   :  { %4701 = vmatpush1.bf16.msra.mxu0 %v8687_v50  ;;  %4893 = vmatpush1.bf16.msra.mxu1 %v8688_v5 }
 0x1eb   :  { %4703 = vmatprep.subr.bf16.mxu0 %v8689_v9  ;;  %4895 = vmatprep.subr.bf16.mxu1 %v8690_v42 }
 0x1ec   :  { %1696 = vmatprep.mubr.f32.mxu0 %v8477_v8  ;;  %3286 = vmatprep.mubr.f32.mxu1 %v8477_v8 }
 0x1ed   :  { %1699 = vmatmul.mubr.f32.gmra.mrb[10].mxu0 %v8691_v29  ;;  %3289 = vmatmul.mubr.f32.gmra.mrb[10].mxu1 %v8691_v29  ;;  %v8701_v29 = vld [vmem:[#allocation87_spill] sm:$0xff] }
 0x1ee   :  { %4705 = vmatpush1.bf16.msra.mxu0 %v8692_v13  ;;  %4897 = vmatpush1.bf16.msra.mxu1 %v8693_v39 }
 0x1ef   :  { %4707 = vmatprep.subr.bf16.mxu0 %v8694_v4  ;;  %4899 = vmatprep.subr.bf16.mxu1 %v8695_v59 }
 0x1f0   :  { %1704 = vmatprep.mubr.f32.mxu0 %v8477_v8  ;;  %3294 = vmatprep.mubr.f32.mxu1 %v8477_v8 }
 0x1f1   :  { %1707 = vmatmul.mubr.f32.gmra.mrb[12].mxu0 %v8696_v12  ;;  %3297 = vmatmul.mubr.f32.gmra.mrb[12].mxu1 %v8696_v12  ;;  %v8705_v12 = vand.u32 4294901760, %v8704_v40  ;;  %v8719_v40 = vand.u32 4294901760, %v8610_v20  ;;  %v8730_v20 = vand.u32 4294901760, %v8618_v1  ;;  %v8735_v1 = vld [vmem:[#allocation81_spill] sm:$0xff] }
 0x1f2   :  { %4709 = vmatpush1.bf16.msra.mxu0 %v8697_v27  ;;  %4901 = vmatpush1.bf16.msra.mxu1 %v8698_v60 }
 0x1f3   :  { %4711 = vmatprep.subr.bf16.mxu0 %v8699_v18  ;;  %4903 = vmatprep.subr.bf16.mxu1 %v8700_v44  ;;  %v4714_v31 = vpack.c.bf16 %v8705_v12, %v8703_v45  ;;  %v8710_v18 = vld [vmem:[#allocation72_spill] sm:$0xff]  ;;  %v8711_v44 = vld [vmem:[#allocation74_spill] sm:$0xff] }
 0x1f4   :  { %1712 = vmatprep.mubr.f32.mxu0 %v8477_v8  ;;  %3302 = vmatprep.mubr.f32.mxu1 %v8477_v8  ;;  %v8720_v45 = vld [vmem:[#allocation42_spill] sm:$0xff] }
 0x1f5   :  { %1715 = vmatmul.mubr.f32.gmra.mrb[14].mxu0 %v8701_v29  ;;  %3305 = vmatmul.mubr.f32.gmra.mrb[14].mxu1 %v8701_v29  ;;  %v8712_v29 = vld [vmem:[#allocation94_spill] sm:$0xff]  ;;  %v8721_v21 = vand.u32 4294901760, %v8720_v45 }
 0x1f6   :  { %4713 = vmatpush1.bf16.msra.mxu0 %v8710_v18  ;;  %4905 = vmatpush1.bf16.msra.mxu1 %v8711_v44  ;;  %v8729_v18 = vand.u32 4294901760, %v8617_v47  ;;  %v8734_v47 = vand.u32 4294901760, %v8622_v26  ;;  %v8740_v26 = vand.u32 4294901760, %v8483_v41  ;;  %v8747_v41 = vld [vmem:[#allocation6_spill] sm:$0xff] }
 0x1f7   :  { %4715 = vmatprep.subr.bf16.mxu0 %v4714_v31  ;;  %4907 = vmatprep.subr.bf16.mxu1 %v4906_v48  ;;  %v8714_v48 = vld [vmem:[#allocation96_spill] sm:$0xff]  ;;  %v8718_v31 = vld [vmem:[#allocation107_spill] sm:$0xff]  ;;  %v4716_v12 = vpack.c.bf16 %v8721_v21, %v8719_v40  ;;  %v8731_v40 = vand.u32 4294901760, %v8619_v0  ;;  %v8739_v0 = vand.u32 4294901760, %v8481_v3  ;;  %v8744_v3 = vld [vmem:[#allocation62_spill] sm:$0xff] }
 0x1f8   :  { %1720 = vmatprep.mubr.f32.mxu0 %v8477_v8  ;;  %3310 = vmatprep.mubr.f32.mxu1 %v8477_v8  ;;  %v4910_v45 = vpack.c.bf16 %v8730_v20, %v8729_v18  ;;  %v8736_v18 = vand.u32 4294901760, %v8478_v54  ;;  %v8741_v54 = vand.u32 4294901760, %v8485_v34  ;;  %v8748_v34 = vld [vmem:[#allocation67_spill] sm:$0xff] }
 0x1f9   :  { %1723 = vmatmul.mubr.f32.gmra.mrb[16].mxu0 %v8712_v29  ;;  %3313 = vmatmul.mubr.f32.gmra.mrb[16].mxu1 %v8712_v29  ;;  %v8722_v29 = vld [vmem:[#allocation45_spill] sm:$0xff]  ;;  %v8754_v20 = vld [vmem:[#allocation75_spill] sm:$0xff] }
 0x1fa   :  { %1728 = vmatprep.mubr.f32.mxu0 %v8477_v8  ;;  %3318 = vmatprep.mubr.f32.mxu1 %v8477_v8 }
 0x1fd   :  { %1731 = vmatmul.mubr.f32.gmra.mrb[18].mxu0 %v8713_v37  ;;  %3321 = vmatmul.mubr.f32.gmra.mrb[18].mxu1 %v8713_v37  ;;  %v8723_v37 = vand.u32 4294901760, %v8722_v29 }
 0x1fe   :  { %1736 = vmatprep.mubr.f32.mxu0 %v8477_v8  ;;  %3326 = vmatprep.mubr.f32.mxu1 %v8477_v8 }
 0x201   :  { %1739 = vmatmul.mubr.f32.gmra.mrb[20].mxu0 %v8714_v48  ;;  %3329 = vmatmul.mubr.f32.gmra.mrb[20].mxu1 %v8714_v48  ;;  %v8724_v48 = vld [vmem:[#allocation43_spill] sm:$0xff] }
 0x202   :  { %1744 = vmatprep.mubr.f32.mxu0 %v8477_v8  ;;  %3334 = vmatprep.mubr.f32.mxu1 %v8477_v8 }
 0x205   :  { %1747 = vmatmul.mubr.f32.gmra.mrb[22].mxu0 %v8715_v63  ;;  %3337 = vmatmul.mubr.f32.gmra.mrb[22].mxu1 %v8715_v63  ;;  %v8725_v63 = vand.u32 4294901760, %v8724_v48 }
 0x206   :  { %1752 = vmatprep.mubr.f32.mxu0 %v8477_v8  ;;  %3342 = vmatprep.mubr.f32.mxu1 %v8477_v8 }
 0x209   :  { %1755 = vmatmul.mubr.f32.gmra.mrb[24].mxu0 %v8716_v16  ;;  %3345 = vmatmul.mubr.f32.gmra.mrb[24].mxu1 %v8716_v16  ;;  %v4908_v16 = vpack.c.bf16 %v8725_v63, %v8723_v37  ;;  %v8738_v37 = vand.u32 4294901760, %v8480_v2  ;;  %v8743_v2 = vand.u32 4294901760, %v8537_v61  ;;  %v8745_v63 = vld [vmem:[#allocation11_spill] sm:$0xff]  ;;  %v8749_v61 = vld [vmem:[#allocation70_spill] sm:$0xff] }
 0x20a   :  { %1760 = vmatprep.mubr.f32.mxu0 %v8477_v8  ;;  %3350 = vmatprep.mubr.f32.mxu1 %v8477_v8 }
 0x20d   :  { %1763 = vmatmul.mubr.f32.gmra.mrb[26].mxu0 %v8717_v51  ;;  %3353 = vmatmul.mubr.f32.gmra.mrb[26].mxu1 %v8717_v51  ;;  %v8726_v51 = vld [vmem:[#allocation78_spill] sm:$0xff] }
 0x20e   :  { %1768 = vmatprep.mubr.f32.mxu0 %v8477_v8  ;;  %3358 = vmatprep.mubr.f32.mxu1 %v8477_v8 }
 0x211   :  { %1771 = vmatmul.mubr.f32.gmra.mrb[28].mxu0 %v8718_v31  ;;  %3361 = vmatmul.mubr.f32.gmra.mrb[28].mxu1 %v8718_v31  ;;  %v8728_v31 = vand.u32 4294901760, %v8616_v17  ;;  %v8733_v17 = vand.u32 4294901760, %v8621_v19  ;;  %v4724_v19 = vpack.c.bf16 %v8741_v54, %v8740_v26  ;;  %v8769_v26 = vld [vmem:[#allocation121_spill] sm:$0xff]  ;;  %v8770_v54 = vld [vmem:[#allocation98_spill] sm:$0xff] }
 0x212   :  { %1776 = vmatprep.mubr.f32.mxu0 %v8477_v8  ;;  %3366 = vmatprep.mubr.f32.mxu1 %v8477_v8 }
 0x213   :  { %v4912_v29 = vpack.c.bf16 %v8734_v47, %v8733_v17  ;;  %v8759_v17 = vld [vmem:[#allocation113_spill] sm:$0xff]  ;;  %v8760_v47 = vld [vmem:[#allocation114_spill] sm:$0xff] }
 0x215   :  { %1779 = vmatmul.mubr.f32.gmra.mrb[30].mxu0 %v7124_v32  ;;  %3369 = vmatmul.mubr.f32.gmra.mrb[30].mxu1 %v7124_v32  ;;  %v8727_v32 = vand.u32 4294901760, %v8615_v25  ;;  %v8732_v25 = vand.u32 4294901760, %v8620_v10  ;;  %v4914_v10 = vpack.c.bf16 %v8739_v0, %v8738_v37  ;;  %v8766_v37 = vld [vmem:[#allocation119_spill] sm:$0xff]  ;;  %v8767_v0 = vld [vmem:[#allocation88_spill] sm:$0xff] }
 0x216   :  { %1881 = vmatprep.mubr.f32.mxu0 %v8477_v8  ;;  %3471 = vmatprep.mubr.f32.mxu1 %v8477_v8 }
 0x217   :  { %v4718_v44 = vpack.c.bf16 %v8728_v31, %v8727_v32  ;;  %v4720_v21 = vpack.c.bf16 %v8732_v25, %v8731_v40  ;;  %v8752_v32 = vld [vmem:[#allocation15_spill] sm:$0xff]  ;;  %v8753_v31 = vld [vmem:[#allocation73_spill] sm:$0xff]  ;;  %v8757_v25 = vld [vmem:[#allocation82_spill] sm:$0xff] }
 0x218   :  { %v8756_v40 = vld [vmem:[#allocation111_spill] sm:$0xff] }
 0x219   :  { %1885 = vmatmul.mubr.f32.vlgmr.msra.gmra.mrb[0].mxu0 %v8726_v51  ;;  %3475 = vmatmul.mubr.f32.vlgmr.msra.gmra.mrb[0].mxu1 %v8726_v51  ;;  %v8751_v51 = vld [vmem:[#allocation22_spill] sm:$0xff] }
 0x21a   :  { %4717 = vmatpush1.bf16.msra.mxu0 %v4716_v12  ;;  %4909 = vmatpush1.bf16.msra.mxu1 %v4908_v16  ;;  %v8746_v16 = vld [vmem:[#allocation66_spill] sm:$0xff] }
 0x21b   :  { %4719 = vmatprep.subr.bf16.mxu0 %v4718_v44  ;;  %4911 = vmatprep.subr.bf16.mxu1 %v4910_v45  ;;  %v8737_v44 = vand.u32 4294901760, %v8479_v22  ;;  %v8742_v22 = vand.u32 4294901760, %v8628_v14  ;;  %v8750_v14 = vld [vmem:[#allocation71_spill] sm:$0xff]  ;;  %v8755_v45 = vld [vmem:[#allocation110_spill] sm:$0xff] }
 0x21c   :  { %1890 = vmatprep.mubr.f32.mxu0 %v8477_v8  ;;  %3480 = vmatprep.mubr.f32.mxu1 %v8477_v8 }
 0x21d   :  { %1894 = vmatmul.mubr.f32.gmra.mrb[2].mxu0 %v8735_v1  ;;  %3484 = vmatmul.mubr.f32.gmra.mrb[2].mxu1 %v8735_v1  ;;  %v4722_v12 = vpack.c.bf16 %v8737_v44, %v8736_v18  ;;  %v4916_v48 = vpack.c.bf16 %v8743_v2, %v8742_v22  ;;  %v8762_v1 = vld [vmem:[#allocation85_spill] sm:$0xff]  ;;  %v8763_v18 = vld [vmem:[#allocation116_spill] sm:$0xff] }
 0x21e   :  { %4721 = vmatpush1.bf16.msra.mxu0 %v4720_v21  ;;  %4913 = vmatpush1.bf16.msra.mxu1 %v4912_v29  ;;  %v8758_v21 = vld [vmem:[#allocation112_spill] sm:$0xff]  ;;  %v8761_v29 = vld [vmem:[#allocation115_spill] sm:$0xff]  ;;  %v8764_v44 = vld [vmem:[#allocation117_spill] sm:$0xff] }
 0x21f   :  { %4723 = vmatprep.subr.bf16.mxu0 %v4722_v12  ;;  %4915 = vmatprep.subr.bf16.mxu1 %v4914_v10  ;;  %v8765_v12 = vld [vmem:[#allocation118_spill] sm:$0xff]  ;;  %v8768_v10 = vld [vmem:[#allocation120_spill] sm:$0xff]  ;;  %v8774_v22 = vld [vmem:[#allocation105_spill] sm:$0xff] }
 0x220   :  { %1899 = vmatprep.mubr.f32.mxu0 %v8477_v8  ;;  %3489 = vmatprep.mubr.f32.mxu1 %v8477_v8  ;;  %v8775_v2 = vld [vmem:[#allocation109_spill] sm:$0xff] }
 0x221   :  { %1903 = vmatmul.mubr.f32.gmra.mrb[4].mxu0 %v8744_v3  ;;  %3493 = vmatmul.mubr.f32.gmra.mrb[4].mxu1 %v8744_v3  ;;  %v8777_v3 = vld [vmem:[#allocation32_spill] sm:$0xff] }
 0x222   :  { %4725 = vmatpush1.bf16.msra.mxu0 %v4724_v19  ;;  %4917 = vmatpush1.bf16.msra.mxu1 %v4916_v48  ;;  %v8771_v19 = vld [vmem:[#allocation99_spill] sm:$0xff]  ;;  %v8776_v48 = vld [vmem:[#allocation65_spill] sm:$0xff] }
 0x223   :  { %4727 = vmatprep.subr.bf16.mxu0 %v8745_v63  ;;  %4919 = vmatprep.subr.bf16.mxu1 %v8746_v16  ;;  %v8778_v63 = vld [vmem:[#allocation76_spill] sm:$0xff]  ;;  %v8779_v16 = vld [vmem:[#allocation79_spill] sm:$0xff] }
 0x224   :  { %1908 = vmatprep.mubr.f32.mxu0 %v8477_v8  ;;  %3498 = vmatprep.mubr.f32.mxu1 %v8477_v8 }
 0x225   :  { %1912 = vmatmul.mubr.f32.gmra.mrb[6].mxu0 %v8747_v41  ;;  %3502 = vmatmul.mubr.f32.gmra.mrb[6].mxu1 %v8747_v41 }
 0x226   :  { %4729 = vmatpush1.bf16.msra.mxu0 %v8748_v34  ;;  %4921 = vmatpush1.bf16.msra.mxu1 %v8749_v61 }
 0x227   :  { %4731 = vmatprep.subr.bf16.mxu0 %v8750_v14  ;;  %4923 = vmatprep.subr.bf16.mxu1 %v8751_v51 }
 0x228   :  { %1917 = vmatprep.mubr.f32.mxu0 %v8477_v8  ;;  %3507 = vmatprep.mubr.f32.mxu1 %v8477_v8 }
 0x229   :  { %1921 = vmatmul.mubr.f32.gmra.mrb[8].mxu0 %v8752_v32  ;;  %3511 = vmatmul.mubr.f32.gmra.mrb[8].mxu1 %v8752_v32 }
 0x22a   :  { %4733 = vmatpush1.bf16.msra.mxu0 %v8753_v31  ;;  %4925 = vmatpush1.bf16.msra.mxu1 %v8754_v20 }
 0x22b   :  { %4735 = vmatprep.subr.bf16.mxu0 %v8755_v45  ;;  %4927 = vmatprep.subr.bf16.mxu1 %v8756_v40 }
 0x22c   :  { %1926 = vmatprep.mubr.f32.mxu0 %v8477_v8  ;;  %3516 = vmatprep.mubr.f32.mxu1 %v8477_v8 }
 0x22d   :  { %1930 = vmatmul.mubr.f32.gmra.mrb[10].mxu0 %v8757_v25  ;;  %3520 = vmatmul.mubr.f32.gmra.mrb[10].mxu1 %v8757_v25 }
 0x22e   :  { %4737 = vmatpush1.bf16.msra.mxu0 %v8758_v21  ;;  %4929 = vmatpush1.bf16.msra.mxu1 %v8759_v17 }
 0x22f   :  { %4739 = vmatprep.subr.bf16.mxu0 %v8760_v47  ;;  %4931 = vmatprep.subr.bf16.mxu1 %v8761_v29 }
 0x230   :  { %1935 = vmatprep.mubr.f32.mxu0 %v8477_v8  ;;  %3525 = vmatprep.mubr.f32.mxu1 %v8477_v8 }
 0x231   :  { %1939 = vmatmul.mubr.f32.gmra.mrb[12].mxu0 %v8762_v1  ;;  %3529 = vmatmul.mubr.f32.gmra.mrb[12].mxu1 %v8762_v1 }
 0x232   :  { %4741 = vmatpush1.bf16.msra.mxu0 %v8763_v18  ;;  %4933 = vmatpush1.bf16.msra.mxu1 %v8764_v44 }
 0x233   :  { %4743 = vmatprep.subr.bf16.mxu0 %v8765_v12  ;;  %4935 = vmatprep.subr.bf16.mxu1 %v8766_v37 }
 0x234   :  { %1944 = vmatprep.mubr.f32.mxu0 %v8477_v8  ;;  %3534 = vmatprep.mubr.f32.mxu1 %v8477_v8 }
 0x235   :  { %1948 = vmatmul.mubr.f32.gmra.mrb[14].mxu0 %v8767_v0  ;;  %3538 = vmatmul.mubr.f32.gmra.mrb[14].mxu1 %v8767_v0 }
 0x236   :  { %4745 = vmatpush1.bf16.msra.mxu0 %v8768_v10  ;;  %4937 = vmatpush1.bf16.msra.mxu1 %v8769_v26 }
 0x237   :  { %4747 = vmatprep.subr.bf16.mxu0 %v8656_v35  ;;  %4939 = vmatprep.subr.bf16.mxu1 %v8657_v33  ;;  %v8772_v35 = vld [vmem:[#allocation102_spill] sm:$0xff]  ;;  %v8773_v33 = vld [vmem:[#allocation103_spill] sm:$0xff] }
 0x238   :  { %1953 = vmatprep.mubr.f32.mxu0 %v8477_v8  ;;  %3543 = vmatprep.mubr.f32.mxu1 %v8477_v8 }
 0x239   :  { %1957 = vmatmul.mubr.f32.gmra.mrb[16].mxu0 %v8770_v54  ;;  %3547 = vmatmul.mubr.f32.gmra.mrb[16].mxu1 %v8770_v54 }
 0x23a   :  { %1962 = vmatprep.mubr.f32.mxu0 %v8477_v8  ;;  %3552 = vmatprep.mubr.f32.mxu1 %v8477_v8 }
 0x23d   :  { %1966 = vmatmul.mubr.f32.gmra.mrb[18].mxu0 %v8771_v19  ;;  %3556 = vmatmul.mubr.f32.gmra.mrb[18].mxu1 %v8771_v19 }
 0x23e   :  { %1971 = vmatprep.mubr.f32.mxu0 %v8477_v8  ;;  %3561 = vmatprep.mubr.f32.mxu1 %v8477_v8 }
 0x241   :  { %1975 = vmatmul.mubr.f32.gmra.mrb[20].mxu0 %v8772_v35  ;;  %3565 = vmatmul.mubr.f32.gmra.mrb[20].mxu1 %v8772_v35 }
 0x242   :  { %1980 = vmatprep.mubr.f32.mxu0 %v8477_v8  ;;  %3570 = vmatprep.mubr.f32.mxu1 %v8477_v8 }
 0x245   :  { %1984 = vmatmul.mubr.f32.gmra.mrb[22].mxu0 %v8773_v33  ;;  %3574 = vmatmul.mubr.f32.gmra.mrb[22].mxu1 %v8773_v33 }
 0x246   :  { %1989 = vmatprep.mubr.f32.mxu0 %v8477_v8  ;;  %3579 = vmatprep.mubr.f32.mxu1 %v8477_v8 }
 0x249   :  { %1993 = vmatmul.mubr.f32.gmra.mrb[24].mxu0 %v8774_v22  ;;  %3583 = vmatmul.mubr.f32.gmra.mrb[24].mxu1 %v8774_v22 }
 0x24a   :  { %1998 = vmatprep.mubr.f32.mxu0 %v8477_v8  ;;  %3588 = vmatprep.mubr.f32.mxu1 %v8477_v8 }
 0x24d   :  { %2002 = vmatmul.mubr.f32.gmra.mrb[26].mxu0 %v8775_v2  ;;  %3592 = vmatmul.mubr.f32.gmra.mrb[26].mxu1 %v8775_v2 }
 0x24e   :  { %2007 = vmatprep.mubr.f32.mxu0 %v8477_v8  ;;  %3597 = vmatprep.mubr.f32.mxu1 %v8477_v8 }
 0x251   :  { %2011 = vmatmul.mubr.f32.gmra.mrb[28].mxu0 %v8776_v48  ;;  %3601 = vmatmul.mubr.f32.gmra.mrb[28].mxu1 %v8776_v48 }
 0x252   :  { %2016 = vmatprep.mubr.f32.mxu0 %v8477_v8  ;;  %3606 = vmatprep.mubr.f32.mxu1 %v8477_v8 }
 0x255   :  { %2020 = vmatmul.mubr.f32.gmra.mrb[30].mxu0 %v8777_v3  ;;  %3610 = vmatmul.mubr.f32.gmra.mrb[30].mxu1 %v8777_v3 }
 0x256   :  { %2186 = vmatprep.mubr.f32.mxu0 %v8477_v8  ;;  %3776 = vmatprep.mubr.f32.mxu1 %v8477_v8 }
 0x259   :  { %2188 = vmatmul.mubr.f32.vlgmr.msra.gmra.mrb[0].mxu0 %v8778_v63  ;;  %3778 = vmatmul.mubr.f32.vlgmr.msra.gmra.mrb[0].mxu1 %v8778_v63 }
 0x25a   :  { %4749 = vmatpush1.bf16.msra.mxu0 %v8667_v36  ;;  %4941 = vmatpush1.bf16.msra.mxu1 %v8668_v43  ;;  %v8780_v36 = vld [vmem:[#allocation59_spill] sm:$0xff] }
 0x25b   :  { %4751 = vmatprep.subr.bf16.mxu0 %v8669_v46  ;;  %4943 = vmatprep.subr.bf16.mxu1 %v8670_v30  ;;  %v8781_v43 = vld [vmem:[#allocation27_spill] sm:$0xff]  ;;  %v8782_v46 = vld [vmem:[#allocation28_spill] sm:$0xff]  ;;  %v8783_v30 = vld [vmem:[#allocation86_spill] sm:$0xff] }
 0x25c   :  { %2193 = vmatprep.mubr.f32.mxu0 %v8477_v8  ;;  %3783 = vmatprep.mubr.f32.mxu1 %v8477_v8 }
 0x25d   :  { %2195 = vmatmul.mubr.f32.gmra.mrb[2].mxu0 %v8779_v16  ;;  %3785 = vmatmul.mubr.f32.gmra.mrb[2].mxu1 %v8779_v16 }
 0x25e   :  { %4753 = vmatpush1.bf16.msra.mxu0 %v8672_v38  ;;  %4945 = vmatpush1.bf16.msra.mxu1 %v8673_v28  ;;  %v8784_v38 = vld [vmem:[#allocation72_spill] sm:$0xff]  ;;  %v8785_v28 = vld [vmem:[#allocation74_spill] sm:$0xff] }
 0x25f   :  { %4755 = vmatprep.subr.bf16.mxu0 %v8674_v49  ;;  %4947 = vmatprep.subr.bf16.mxu1 %v8675_v52  ;;  %v8786_v49 = vld [vmem:[#allocation89_spill] sm:$0xff]  ;;  %v8787_v52 = vld [vmem:[#allocation90_spill] sm:$0xff] }
 0x260   :  { %2200 = vmatprep.mubr.f32.mxu0 %v8477_v8  ;;  %3790 = vmatprep.mubr.f32.mxu1 %v8477_v8 }
 0x261   :  { %2202 = vmatmul.mubr.f32.gmra.mrb[4].mxu0 %v8780_v36  ;;  %3792 = vmatmul.mubr.f32.gmra.mrb[4].mxu1 %v8780_v36 }
 0x262   :  { %4757 = vmatpush1.bf16.msra.mxu0 %v8677_v55  ;;  %4949 = vmatpush1.bf16.msra.mxu1 %v8678_v56  ;;  %v8788_v55 = vld [vmem:[#allocation91_spill] sm:$0xff]  ;;  %v8789_v56 = vld [vmem:[#allocation92_spill] sm:$0xff] }
 0x263   :  { %4759 = vmatprep.subr.bf16.mxu0 %v8679_v62  ;;  %4951 = vmatprep.subr.bf16.mxu1 %v8680_v23  ;;  %v8790_v62 = vld [vmem:[#allocation93_spill] sm:$0xff] }
 0x264   :  { %2207 = vmatprep.mubr.f32.mxu0 %v8477_v8  ;;  %3797 = vmatprep.mubr.f32.mxu1 %v8477_v8  ;;  %v8791_v23 = vld [vmem:[#allocation101_spill] sm:$0xff] }
 0x265   :  { %2209 = vmatmul.mubr.f32.gmra.mrb[6].mxu0 %v8633_v57  ;;  %3799 = vmatmul.mubr.f32.gmra.mrb[6].mxu1 %v8633_v57 }
 0x266   :  { %4761 = vmatpush1.bf16.msra.mxu0 %v8682_v24  ;;  %4953 = vmatpush1.bf16.msra.mxu1 %v8683_v15  ;;  %v8792_v24 = vld [vmem:[#allocation104_spill] sm:$0xff] }
 0x267   :  { %4763 = vmatprep.subr.bf16.mxu0 %v8684_v11  ;;  %4955 = vmatprep.subr.bf16.mxu1 %v8685_v6  ;;  %v8793_v15 = vld [vmem:[#allocation108_spill] sm:$0xff] }
 0x268   :  { %2214 = vmatprep.mubr.f32.mxu0 %v8477_v8  ;;  %3804 = vmatprep.mubr.f32.mxu1 %v8477_v8 }
 0x269   :  { %2216 = vmatmul.mubr.f32.gmra.mrb[8].mxu0 %v8638_v53  ;;  %3806 = vmatmul.mubr.f32.gmra.mrb[8].mxu1 %v8638_v53 }
 0x26a   :  { %4765 = vmatpush1.bf16.msra.mxu0 %v8687_v50  ;;  %4957 = vmatpush1.bf16.msra.mxu1 %v8688_v5 }
 0x26b   :  { %4767 = vmatprep.subr.bf16.mxu0 %v8689_v9  ;;  %4959 = vmatprep.subr.bf16.mxu1 %v8690_v42 }
 0x26c   :  { %2221 = vmatprep.mubr.f32.mxu0 %v8477_v8  ;;  %3811 = vmatprep.mubr.f32.mxu1 %v8477_v8 }
 0x26d   :  { %2223 = vmatmul.mubr.f32.gmra.mrb[10].mxu0 %v8643_v58  ;;  %3813 = vmatmul.mubr.f32.gmra.mrb[10].mxu1 %v8643_v58 }
 0x26e   :  { %4769 = vmatpush1.bf16.msra.mxu0 %v8692_v13  ;;  %4961 = vmatpush1.bf16.msra.mxu1 %v8693_v39 }
 0x26f   :  { %4771 = vmatprep.subr.bf16.mxu0 %v8694_v4  ;;  %4963 = vmatprep.subr.bf16.mxu1 %v8695_v59 }
 0x270   :  { %2228 = vmatprep.mubr.f32.mxu0 %v8477_v8  ;;  %3818 = vmatprep.mubr.f32.mxu1 %v8477_v8 }
 0x271   :  { %2230 = vmatmul.mubr.f32.gmra.mrb[12].mxu0 %v8648_v7  ;;  %3820 = vmatmul.mubr.f32.gmra.mrb[12].mxu1 %v8648_v7 }
 0x272   :  { %4773 = vmatpush1.bf16.msra.mxu0 %v8697_v27  ;;  %4965 = vmatpush1.bf16.msra.mxu1 %v8698_v60 }
 0x273   :  { %4775 = vmatprep.subr.bf16.mxu0 %v8781_v43  ;;  %4967 = vmatprep.subr.bf16.mxu1 %v8782_v46 }
 0x274   :  { %2235 = vmatprep.mubr.f32.mxu0 %v8477_v8  ;;  %3825 = vmatprep.mubr.f32.mxu1 %v8477_v8 }
 0x275   :  { %2237 = vmatmul.mubr.f32.gmra.mrb[14].mxu0 %v8783_v30  ;;  %3827 = vmatmul.mubr.f32.gmra.mrb[14].mxu1 %v8783_v30 }
 0x276   :  { %4777 = vmatpush1.bf16.msra.mxu0 %v8784_v38  ;;  %4969 = vmatpush1.bf16.msra.mxu1 %v8785_v28 }
 0x277   :  { %2242 = vmatprep.mubr.f32.mxu0 %v8477_v8  ;;  %3832 = vmatprep.mubr.f32.mxu1 %v8477_v8 }
 0x279   :  { %2244 = vmatmul.mubr.f32.gmra.mrb[16].mxu0 %v8786_v49  ;;  %3834 = vmatmul.mubr.f32.gmra.mrb[16].mxu1 %v8786_v49 }
 0x27a   :  { %2249 = vmatprep.mubr.f32.mxu0 %v8477_v8  ;;  %3839 = vmatprep.mubr.f32.mxu1 %v8477_v8 }
 0x27d   :  { %2251 = vmatmul.mubr.f32.gmra.mrb[18].mxu0 %v8787_v52  ;;  %3841 = vmatmul.mubr.f32.gmra.mrb[18].mxu1 %v8787_v52 }
 0x27e   :  { %2256 = vmatprep.mubr.f32.mxu0 %v8477_v8  ;;  %3846 = vmatprep.mubr.f32.mxu1 %v8477_v8 }
 0x281   :  { %2258 = vmatmul.mubr.f32.gmra.mrb[20].mxu0 %v8788_v55  ;;  %3848 = vmatmul.mubr.f32.gmra.mrb[20].mxu1 %v8788_v55 }
 0x282   :  { %2263 = vmatprep.mubr.f32.mxu0 %v8477_v8  ;;  %3853 = vmatprep.mubr.f32.mxu1 %v8477_v8 }
 0x285   :  { %2265 = vmatmul.mubr.f32.gmra.mrb[22].mxu0 %v8789_v56  ;;  %3855 = vmatmul.mubr.f32.gmra.mrb[22].mxu1 %v8789_v56 }
 0x286   :  { %2270 = vmatprep.mubr.f32.mxu0 %v8477_v8  ;;  %3860 = vmatprep.mubr.f32.mxu1 %v8477_v8 }
 0x289   :  { %2272 = vmatmul.mubr.f32.gmra.mrb[24].mxu0 %v8790_v62  ;;  %3862 = vmatmul.mubr.f32.gmra.mrb[24].mxu1 %v8790_v62 }
 0x28a   :  { %2277 = vmatprep.mubr.f32.mxu0 %v8477_v8  ;;  %3867 = vmatprep.mubr.f32.mxu1 %v8477_v8 }
 0x28d   :  { %2279 = vmatmul.mubr.f32.gmra.mrb[26].mxu0 %v8791_v23  ;;  %3869 = vmatmul.mubr.f32.gmra.mrb[26].mxu1 %v8791_v23 }
 0x28e   :  { %2284 = vmatprep.mubr.f32.mxu0 %v8477_v8  ;;  %3874 = vmatprep.mubr.f32.mxu1 %v8477_v8 }
 0x291   :  { %2286 = vmatmul.mubr.f32.gmra.mrb[28].mxu0 %v8792_v24  ;;  %3876 = vmatmul.mubr.f32.gmra.mrb[28].mxu1 %v8792_v24 }
 0x292   :  { %2291 = vmatprep.mubr.f32.mxu0 %v8477_v8  ;;  %3881 = vmatprep.mubr.f32.mxu1 %v8477_v8 }
 0x295   :  { %2293 = vmatmul.mubr.f32.gmra.mrb[30].mxu0 %v8793_v15  ;;  %3883 = vmatmul.mubr.f32.gmra.mrb[30].mxu1 %v8793_v15 }
 0x296   :  { %2395 = vmatprep.mubr.f32.mxu0 %v8477_v8  ;;  %3985 = vmatprep.mubr.f32.mxu1 %v8477_v8 }
 0x299   :  { %2397 = vmatmul.mubr.f32.vlgmr.msra.gmra.mrb[0].mxu0 %v8778_v63  ;;  %3987 = vmatmul.mubr.f32.vlgmr.msra.gmra.mrb[0].mxu1 %v8778_v63 }
 0x29a   :  { %2402 = vmatprep.mubr.f32.mxu0 %v8477_v8  ;;  %3992 = vmatprep.mubr.f32.mxu1 %v8477_v8 }
 0x29d   :  { %2404 = vmatmul.mubr.f32.gmra.mrb[2].mxu0 %v8779_v16  ;;  %3994 = vmatmul.mubr.f32.gmra.mrb[2].mxu1 %v8779_v16 }
 0x29e   :  { %2409 = vmatprep.mubr.f32.mxu0 %v8477_v8  ;;  %3999 = vmatprep.mubr.f32.mxu1 %v8477_v8 }
 0x2a1   :  { %2411 = vmatmul.mubr.f32.gmra.mrb[4].mxu0 %v8780_v36  ;;  %4001 = vmatmul.mubr.f32.gmra.mrb[4].mxu1 %v8780_v36 }
 0x2a2   :  { %2416 = vmatprep.mubr.f32.mxu0 %v8477_v8  ;;  %4006 = vmatprep.mubr.f32.mxu1 %v8477_v8 }
 0x2a5   :  { %2418 = vmatmul.mubr.f32.gmra.mrb[6].mxu0 %v8633_v57  ;;  %4008 = vmatmul.mubr.f32.gmra.mrb[6].mxu1 %v8633_v57  ;;  %v841_v57 = vpop.permute.xlu0 %840 }
 0x2a6   :  { %2423 = vmatprep.mubr.f32.mxu0 %v8477_v8  ;;  %4013 = vmatprep.mubr.f32.mxu1 %v8477_v8 }
 0x2a9   :  { %2425 = vmatmul.mubr.f32.gmra.mrb[8].mxu0 %v8638_v53  ;;  %4015 = vmatmul.mubr.f32.gmra.mrb[8].mxu1 %v8638_v53  ;;  %v846_v53 = vpop.permute.xlu1 %845 }
 0x2aa   :  { %2430 = vmatprep.mubr.f32.mxu0 %v8477_v8  ;;  %4020 = vmatprep.mubr.f32.mxu1 %v8477_v8 }
 0x2ad   :  { %2432 = vmatmul.mubr.f32.gmra.mrb[10].mxu0 %v8643_v58  ;;  %4022 = vmatmul.mubr.f32.gmra.mrb[10].mxu1 %v8643_v58  ;;  %v7801_v58 = vpop.permute.xlu0 %850 }
 0x2ae   :  { %2437 = vmatprep.mubr.f32.mxu0 %v8477_v8  ;;  %4027 = vmatprep.mubr.f32.mxu1 %v8477_v8 }
 0x2b1   :  { %2439 = vmatmul.mubr.f32.gmra.mrb[12].mxu0 %v8648_v7  ;;  %4029 = vmatmul.mubr.f32.gmra.mrb[12].mxu1 %v8648_v7  ;;  %v7803_v7 = vpop.permute.xlu1 %855  ;;  %v4309_v11 = vpop.permute.xlu0 %4308 }
 0x2b2   :  { %2444 = vmatprep.mubr.f32.mxu0 %v8477_v8  ;;  %4034 = vmatprep.mubr.f32.mxu1 %v8477_v8 }
 0x2b5   :  { %2446 = vmatmul.mubr.f32.gmra.mrb[14].mxu0 %v8783_v30  ;;  %4036 = vmatmul.mubr.f32.gmra.mrb[14].mxu1 %v8783_v30  ;;  %v4314_v6 = vpop.permute.xlu1 %4313  ;;  %v7805_v59 = vpop.permute.xlu0 %860 }
 0x2b6   :  { %2451 = vmatprep.mubr.f32.mxu0 %v8477_v8  ;;  %4041 = vmatprep.mubr.f32.mxu1 %v8477_v8 }
 0x2b9   :  { %2453 = vmatmul.mubr.f32.gmra.mrb[16].mxu0 %v8786_v49  ;;  %4043 = vmatmul.mubr.f32.gmra.mrb[16].mxu1 %v8786_v49  ;;  %v7807_v41 = vpop.permute.xlu1 %4318  ;;  %v7809_v10 = vpop.permute.xlu0 %865 }
 0x2ba   :  { %2458 = vmatprep.mubr.f32.mxu0 %v8477_v8  ;;  %4048 = vmatprep.mubr.f32.mxu1 %v8477_v8 }
 0x2bd   :  { %2460 = vmatmul.mubr.f32.gmra.mrb[18].mxu0 %v8787_v52  ;;  %4050 = vmatmul.mubr.f32.gmra.mrb[18].mxu1 %v8787_v52  ;;  %v7811_v19 = vpop.permute.xlu1 %4323 }
 0x2be   :  { %2465 = vmatprep.mubr.f32.mxu0 %v8477_v8  ;;  %4055 = vmatprep.mubr.f32.mxu1 %v8477_v8 }
 0x2c1   :  { %2467 = vmatmul.mubr.f32.gmra.mrb[20].mxu0 %v8788_v55  ;;  %4057 = vmatmul.mubr.f32.gmra.mrb[20].mxu1 %v8788_v55 }
 0x2c2   :  { %2472 = vmatprep.mubr.f32.mxu0 %v8477_v8  ;;  %4062 = vmatprep.mubr.f32.mxu1 %v8477_v8 }
 0x2c5   :  { %2474 = vmatmul.mubr.f32.gmra.mrb[22].mxu0 %v8789_v56  ;;  %4064 = vmatmul.mubr.f32.gmra.mrb[22].mxu1 %v8789_v56 }
 0x2c6   :  { %2479 = vmatprep.mubr.f32.mxu0 %v8477_v8  ;;  %4069 = vmatprep.mubr.f32.mxu1 %v8477_v8 }
 0x2c9   :  { %2481 = vmatmul.mubr.f32.gmra.mrb[24].mxu0 %v8790_v62  ;;  %4071 = vmatmul.mubr.f32.gmra.mrb[24].mxu1 %v8790_v62 }
 0x2ca   :  { %2486 = vmatprep.mubr.f32.mxu0 %v8477_v8  ;;  %4076 = vmatprep.mubr.f32.mxu1 %v8477_v8 }
 0x2cd   :  { %2488 = vmatmul.mubr.f32.gmra.mrb[26].mxu0 %v8791_v23  ;;  %4078 = vmatmul.mubr.f32.gmra.mrb[26].mxu1 %v8791_v23 }
 0x2ce   :  { %2493 = vmatprep.mubr.f32.mxu0 %v8477_v8  ;;  %4083 = vmatprep.mubr.f32.mxu1 %v8477_v8 }
 0x2d1   :  { %2495 = vmatmul.mubr.f32.gmra.mrb[28].mxu0 %v8792_v24  ;;  %4085 = vmatmul.mubr.f32.gmra.mrb[28].mxu1 %v8792_v24 }
 0x2d2   :  { %2500 = vmatprep.mubr.f32.mxu0 %v8477_v8  ;;  %4090 = vmatprep.mubr.f32.mxu1 %v8477_v8 }
 0x2d5   :  { %2502 = vmatmul.mubr.f32.gmra.mrb[30].mxu0 %v8793_v15  ;;  %4092 = vmatmul.mubr.f32.gmra.mrb[30].mxu1 %v8793_v15 }
 0x36c   :  { %v2398_v50 = vpop.f32.mrb[0].mxu0  ;;  %v3988_v5 = vpop.f32.mrb[0].mxu1 }
 0x36d   :  { %v4970_v9 = vadd.f32 %v2398_v50, %v841_v57  ;;  %v5002_v42 = vadd.f32 %v3988_v5, %v841_v57  ;;  %v2400_v13 = vpop.f32.mrb[1].mxu0  ;;  %v3990_v39 = vpop.f32.mrb[1].mxu1 }
 0x36e   :  { %v4971_v4 = vadd.f32 %v2400_v13, %v841_v57  ;;  %v5003_v8 = vadd.f32 %v3990_v39, %v841_v57  ;;  %v7815_v57 = vpop.permute.xlu0 %870 }
 0x36f   :  { %vm4098_vm0 = vcmp.gt.f32.partialorder %v4970_v9, 0.0  ;;  %v4162_v27 = vmul.f32 0.01, %v4970_v9  ;;  %vm4100_vm1 = vcmp.gt.f32.partialorder %v5002_v42, 0.0  ;;  %v4164_v60 = vmul.f32 0.01, %v5002_v42 }
 0x370   :  { %vm4099_vm2 = vcmp.gt.f32.partialorder %v4971_v4, 0.0  ;;  %v4163_v34 = vmul.f32 0.01, %v4971_v4  ;;  %vm4101_vm3 = vcmp.gt.f32.partialorder %v5003_v8, 0.0  ;;  %v4165_v61 = vmul.f32 0.01, %v5003_v8 }
 0x371   :  { %v4226_v14 = vsel %vm4098_vm0, %v4970_v9, %v4162_v27  ;;  %v4228_v51 = vsel %vm4100_vm1, %v5002_v42, %v4164_v60  ;;  %v2405_v32 = vpop.f32.mrb[2].mxu0  ;;  %v3995_v31 = vpop.f32.mrb[2].mxu1 }
 0x372   :  { %v4227_v20 = vsel %vm4099_vm2, %v4971_v4, %v4163_v34  ;;  %v4229_v45 = vsel %vm4101_vm3, %v5003_v8, %v4165_v61  ;;  %v2407_v40 = vpop.f32.mrb[3].mxu0  ;;  %v3997_v25 = vpop.f32.mrb[3].mxu1  ;;  %v4386_v21 = vmul.f32 %v4309_v11, %v4226_v14  ;;  %v4388_v17 = vmul.f32 %v4309_v11, %v4228_v51 }
 0x373   :  { %v4972_v47 = vadd.f32 %v2405_v32, %v846_v53  ;;  %v5004_v29 = vadd.f32 %v3995_v31, %v846_v53  ;;  %v4387_v1 = vmul.f32 %v4309_v11, %v4227_v20  ;;  %v4389_v18 = vmul.f32 %v4309_v11, %v4229_v45  ;;  %v7823_v14 = vpop.permute.xlu1 %4328 }
 0x374   :  { %v4973_v44 = vadd.f32 %v2407_v40, %v846_v53  ;;  %v5005_v12 = vadd.f32 %v3997_v25, %v846_v53  ;;  %v2412_v37 = vpop.f32.mrb[4].mxu0  ;;  %v4002_v0 = vpop.f32.mrb[4].mxu1 }
 0x375   :  { %vm4102_vm4 = vcmp.gt.f32.partialorder %v4972_v47, 0.0  ;;  %v4166_v26 = vmul.f32 0.01, %v4972_v47  ;;  %vm4104_vm5 = vcmp.gt.f32.partialorder %v5004_v29, 0.0  ;;  %v4168_v54 = vmul.f32 0.01, %v5004_v29 }
 0x376   :  { %vm4103_vm6 = vcmp.gt.f32.partialorder %v4973_v44, 0.0  ;;  %v4167_v35 = vmul.f32 0.01, %v4973_v44  ;;  %vm4105_vm7 = vcmp.gt.f32.partialorder %v5005_v12, 0.0  ;;  %v4169_v33 = vmul.f32 0.01, %v5005_v12 }
 0x377   :  { %v4230_v22 = vsel %vm4102_vm4, %v4972_v47, %v4166_v26  ;;  %v4232_v2 = vsel %vm4104_vm5, %v5004_v29, %v4168_v54  ;;  %v4974_v48 = vadd.f32 %v2412_v37, %v7801_v58  ;;  %v5006_v3 = vadd.f32 %v4002_v0, %v7801_v58  ;;  %v2414_v63 = vpop.f32.mrb[5].mxu0  ;;  %v4004_v16 = vpop.f32.mrb[5].mxu1 }
 0x378   :  { %v4390_v36 = vmul.f32 %v4314_v6, %v4230_v22  ;;  %v4392_v43 = vmul.f32 %v4314_v6, %v4232_v2  ;;  %v4231_v46 = vsel %vm4103_vm6, %v4973_v44, %v4167_v35  ;;  %v4233_v30 = vsel %vm4105_vm7, %v5005_v12, %v4169_v33  ;;  %v2419_v38 = vpop.f32.mrb[6].mxu0  ;;  %v4009_v28 = vpop.f32.mrb[6].mxu1 }
 0x379   :  { %v4391_v49 = vmul.f32 %v4314_v6, %v4231_v46  ;;  %v4393_v52 = vmul.f32 %v4314_v6, %v4233_v30  ;;  %vm4106_vm8 = vcmp.gt.f32.partialorder %v4974_v48, 0.0  ;;  %v4170_v55 = vmul.f32 0.01, %v4974_v48  ;;  %v2421_v56 = vpop.f32.mrb[7].mxu0  ;;  %v4011_v62 = vpop.f32.mrb[7].mxu1 }
 0x37a   :  { %v4450_v23 = vadd.f32 %v4390_v36, %v4386_v21  ;;  %v4492_v24 = vadd.f32 %v4392_v43, %v4388_v17  ;;  %vm4108_vm9 = vcmp.gt.f32.partialorder %v5006_v3, 0.0  ;;  %v4172_v15 = vmul.f32 0.01, %v5006_v3  ;;  %v7831_v35 = vpop.permute.xlu0 %875 }
 0x37b   :  { %v4471_v53 = vadd.f32 %v4391_v49, %v4387_v1  ;;  %v4513_v11 = vadd.f32 %v4393_v52, %v4389_v18  ;;  %v4234_v50 = vsel %vm4106_vm8, %v4974_v48, %v4170_v55  ;;  %v4975_v5 = vadd.f32 %v2414_v63, %v7801_v58 }
 0x37c   :  { %v4394_v9 = vmul.f32 %v7807_v41, %v4234_v50  ;;  %v4236_v42 = vsel %vm4108_vm9, %v5006_v3, %v4172_v15  ;;  %v5007_v6 = vadd.f32 %v4004_v16, %v7801_v58  ;;  %v4976_v13 = vadd.f32 %v2419_v38, %v7803_v7  ;;  %v2426_v39 = vpop.f32.mrb[8].mxu0  ;;  %v4016_v4 = vpop.f32.mrb[8].mxu1 }
 0x37d   :  { %v4396_v8 = vmul.f32 %v7807_v41, %v4236_v42  ;;  %vm4107_vm10 = vcmp.gt.f32.partialorder %v4975_v5, 0.0  ;;  %v4171_v27 = vmul.f32 0.01, %v4975_v5  ;;  %v5008_v60 = vadd.f32 %v4009_v28, %v7803_v7  ;;  %v2428_v34 = vpop.f32.mrb[9].mxu0  ;;  %v4018_v61 = vpop.f32.mrb[9].mxu1 }
 0x37e   :  { %v4451_v51 = vadd.f32 %v4450_v23, %v4394_v9  ;;  %vm4109_vm11 = vcmp.gt.f32.partialorder %v5007_v6, 0.0  ;;  %v4173_v32 = vmul.f32 0.01, %v5007_v6  ;;  %vm4110_vm12 = vcmp.gt.f32.partialorder %v4976_v13, 0.0 }
 0x37f   :  { %v4493_v31 = vadd.f32 %v4492_v24, %v4396_v8  ;;  %v4235_v58 = vsel %vm4107_vm10, %v4975_v5, %v4171_v27  ;;  %v4174_v20 = vmul.f32 0.01, %v4976_v13  ;;  %vm4112_vm13 = vcmp.gt.f32.partialorder %v5008_v60, 0.0  ;;  %v7855_v27 = vpop.permute.xlu0 %880 }
 0x380   :  { %v4395_v45 = vmul.f32 %v7807_v41, %v4235_v58  ;;  %v4237_v40 = vsel %vm4109_vm11, %v5007_v6, %v4173_v32  ;;  %v4176_v25 = vmul.f32 0.01, %v5008_v60  ;;  %v4977_v21 = vadd.f32 %v2421_v56, %v7803_v7  ;;  %v2433_v17 = vpop.f32.mrb[10].mxu0  ;;  %v4023_v47 = vpop.f32.mrb[10].mxu1 }
 0x381   :  { %v4397_v29 = vmul.f32 %v7807_v41, %v4237_v40  ;;  %v4238_v1 = vsel %vm4110_vm12, %v4976_v13, %v4174_v20  ;;  %v5009_v18 = vadd.f32 %v4011_v62, %v7803_v7  ;;  %v4978_v44 = vadd.f32 %v2426_v39, %v7805_v59  ;;  %v2435_v12 = vpop.f32.mrb[11].mxu0  ;;  %v4025_v37 = vpop.f32.mrb[11].mxu1 }
 0x382   :  { %v4472_v0 = vadd.f32 %v4471_v53, %v4395_v45  ;;  %v4398_v26 = vmul.f32 %v7811_v19, %v4238_v1  ;;  %v4240_v54 = vsel %vm4112_vm13, %v5008_v60, %v4176_v25  ;;  %vm4111_vm14 = vcmp.gt.f32.partialorder %v4977_v21, 0.0  ;;  %v7834_v41 = vpop.permute.xlu1 %4333 }
 0x383   :  { %v4514_v33 = vadd.f32 %v4513_v11, %v4397_v29  ;;  %v4400_v22 = vmul.f32 %v7811_v19, %v4240_v54  ;;  %v4175_v2 = vmul.f32 0.01, %v4977_v21  ;;  %vm4113_vm15 = vcmp.gt.f32.partialorder %v5009_v18, 0.0 }
 0x384   :  { %v4452_v48 = vadd.f32 %v4451_v51, %v4398_v26  ;;  %v4177_v7 = vmul.f32 0.01, %v5009_v18  ;;  %vm4114_vm0 = vcmp.gt.f32.partialorder %v4978_v44, 0.0  ;;  %v4178_v3 = vmul.f32 0.01, %v4978_v44  ;;  %v2440_v63 = vpop.f32.mrb[12].mxu0 }
 0x385   :  { %v4494_v16 = vadd.f32 %v4493_v31, %v4400_v22  ;;  %v4239_v36 = vsel %vm4111_vm14, %v4977_v21, %v4175_v2  ;;  %v5010_v43 = vadd.f32 %v4016_v4, %v7805_v59  ;;  %v4979_v46 = vadd.f32 %v2428_v34, %v7805_v59  ;;  %v4030_v30 = vpop.f32.mrb[12].mxu1  ;;  %v2442_v38 = vpop.f32.mrb[13].mxu0 }
 0x386   :  { %v4399_v28 = vmul.f32 %v7811_v19, %v4239_v36  ;;  %v4241_v49 = vsel %vm4113_vm15, %v5009_v18, %v4177_v7  ;;  %v4242_v52 = vsel %vm4114_vm0, %v4978_v44, %v4178_v3  ;;  %v5011_v55 = vadd.f32 %v4018_v61, %v7805_v59  ;;  %v7840_v56 = vpop.f32.mrb[13].mxu1  ;;  %v7857_v60 = vpop.permute.xlu1 %4338 }
 0x387   :  { %v4401_v62 = vmul.f32 %v7811_v19, %v4241_v49  ;;  %v4402_v23 = vmul.f32 %v7823_v14, %v4242_v52  ;;  %vm4116_vm1 = vcmp.gt.f32.partialorder %v5010_v43, 0.0  ;;  %v4180_v24 = vmul.f32 0.01, %v5010_v43 }
 0x388   :  { %v4473_v15 = vadd.f32 %v4472_v0, %v4399_v28  ;;  %vm4115_vm2 = vcmp.gt.f32.partialorder %v4979_v46, 0.0  ;;  %v4179_v53 = vmul.f32 0.01, %v4979_v46  ;;  %vm4117_vm3 = vcmp.gt.f32.partialorder %v5011_v55, 0.0  ;;  %v7844_v11 = vpop.f32.mrb[14].mxu0  ;;  %v7846_v50 = vpop.f32.mrb[14].mxu1 }
 0x389   :  { %v4515_v5 = vadd.f32 %v4514_v33, %v4401_v62  ;;  %v4453_v9 = vadd.f32 %v4452_v48, %v4402_v23  ;;  %v4244_v42 = vsel %vm4116_vm1, %v5010_v43, %v4180_v24  ;;  %v4181_v59 = vmul.f32 0.01, %v5011_v55  ;;  %v7848_v6 = vpop.f32.mrb[15].mxu0  ;;  %v7850_v13 = vpop.f32.mrb[15].mxu1 }
 0x38a   :  { %v4404_v19 = vmul.f32 %v7823_v14, %v4244_v42  ;;  %v4243_v39 = vsel %vm4115_vm2, %v4979_v46, %v4179_v53  ;;  %v4980_v4 = vadd.f32 %v2433_v17, %v7809_v10  ;;  %v5012_v8 = vadd.f32 %v4023_v47, %v7809_v10  ;;  %v7887_v46 = vpop.permute.xlu0 %885 }
 0x38b   :  { %v4403_v34 = vmul.f32 %v7823_v14, %v4243_v39  ;;  %v4245_v61 = vsel %vm4117_vm3, %v5011_v55, %v4181_v59  ;;  %v4981_v51 = vadd.f32 %v2435_v12, %v7809_v10  ;;  %v5013_v32 = vadd.f32 %v4025_v37, %v7809_v10 }
 0x38c   :  { %v4495_v31 = vadd.f32 %v4494_v16, %v4404_v19  ;;  %v4405_v58 = vmul.f32 %v7823_v14, %v4245_v61  ;;  %vm4118_vm4 = vcmp.gt.f32.partialorder %v4980_v4, 0.0  ;;  %v4182_v20 = vmul.f32 0.01, %v4980_v4  ;;  %v7864_v45 = vpop.f32.mrb[16].mxu0  ;;  %v7866_v40 = vpop.f32.mrb[16].mxu1 }
 0x38d   :  { %v4474_v25 = vadd.f32 %v4473_v15, %v4403_v34  ;;  %vm4120_vm5 = vcmp.gt.f32.partialorder %v5012_v8, 0.0  ;;  %v4184_v21 = vmul.f32 0.01, %v5012_v8  ;;  %vm4119_vm6 = vcmp.gt.f32.partialorder %v4981_v51, 0.0  ;;  %v7868_v17 = vpop.f32.mrb[17].mxu0  ;;  %v7870_v47 = vpop.f32.mrb[17].mxu1 }
 0x38e   :  { %v4516_v29 = vadd.f32 %v4515_v5, %v4405_v58  ;;  %v4246_v1 = vsel %vm4118_vm4, %v4980_v4, %v4182_v20  ;;  %v4183_v10 = vmul.f32 0.01, %v4981_v51  ;;  %vm4121_vm7 = vcmp.gt.f32.partialorder %v5013_v32, 0.0 }
 0x38f   :  { %v4406_v14 = vmul.f32 %v7834_v41, %v4246_v1  ;;  %v4248_v18 = vsel %vm4120_vm5, %v5012_v8, %v4184_v21  ;;  %v4185_v44 = vmul.f32 0.01, %v5013_v32  ;;  %v4982_v12 = vadd.f32 %v2440_v63, %v7815_v57 }
 0x390   :  { %v4408_v37 = vmul.f32 %v7834_v41, %v4248_v18  ;;  %v4247_v0 = vsel %vm4119_vm6, %v4981_v51, %v4183_v10  ;;  %v5014_v26 = vadd.f32 %v4030_v30, %v7815_v57  ;;  %v4983_v54 = vadd.f32 %v2442_v38, %v7815_v57  ;;  %v7877_v33 = vpop.f32.mrb[18].mxu0  ;;  %v7879_v22 = vpop.f32.mrb[18].mxu1 }
 0x391   :  { %v4454_v2 = vadd.f32 %v4453_v9, %v4406_v14  ;;  %v4407_v48 = vmul.f32 %v7834_v41, %v4247_v0  ;;  %v4249_v7 = vsel %vm4121_vm7, %v5013_v32, %v4185_v44  ;;  %vm4122_vm8 = vcmp.gt.f32.partialorder %v4982_v12, 0.0  ;;  %v7882_v3 = vpop.f32.mrb[19].mxu0  ;;  %v7884_v16 = vpop.f32.mrb[19].mxu1 }
 0x392   :  { %v4496_v63 = vadd.f32 %v4495_v31, %v4408_v37  ;;  %v4409_v36 = vmul.f32 %v7834_v41, %v4249_v7  ;;  %v4186_v43 = vmul.f32 0.01, %v4982_v12  ;;  %vm4124_vm9 = vcmp.gt.f32.partialorder %v5014_v26, 0.0  ;;  %v7889_v30 = vpop.permute.xlu1 %4343  ;;  %v7926_v14 = vpop.permute.xlu0 %890 }
 0x393   :  { %v4475_v38 = vadd.f32 %v4474_v25, %v4407_v48  ;;  %v4188_v28 = vmul.f32 0.01, %v5014_v26  ;;  %vm4123_vm10 = vcmp.gt.f32.partialorder %v4983_v54, 0.0  ;;  %v4187_v49 = vmul.f32 0.01, %v4983_v54 }
 0x394   :  { %v4517_v52 = vadd.f32 %v4516_v29, %v4409_v36  ;;  %v4250_v55 = vsel %vm4122_vm8, %v4982_v12, %v4186_v43  ;;  %v5015_v62 = vadd.f32 %v7840_v56, %v7815_v57  ;;  %v4984_v23 = vadd.f32 %v7844_v11, %v7831_v35  ;;  %v7895_v24 = vpop.f32.mrb[20].mxu0  ;;  %v7897_v41 = vpop.f32.mrb[20].mxu1 }
 0x395   :  { %v4410_v15 = vmul.f32 %v7857_v60, %v4250_v55  ;;  %v4252_v53 = vsel %vm4124_vm9, %v5014_v26, %v4188_v28  ;;  %v4251_v5 = vsel %vm4123_vm10, %v4983_v54, %v4187_v49  ;;  %v5016_v9 = vadd.f32 %v7846_v50, %v7831_v35  ;;  %v7902_v42 = vpop.f32.mrb[21].mxu0  ;;  %v7904_v59 = vpop.f32.mrb[21].mxu1 }
 0x396   :  { %v4412_v57 = vmul.f32 %v7857_v60, %v4252_v53  ;;  %v4411_v56 = vmul.f32 %v7857_v60, %v4251_v5  ;;  %vm4125_vm11 = vcmp.gt.f32.partialorder %v5015_v62, 0.0  ;;  %v4189_v11 = vmul.f32 0.01, %v5015_v62  ;;  %v4349_v18 = vpop.permute.xlu1 %4348 }
 0x397   :  { %v4455_v19 = vadd.f32 %v4454_v2, %v4410_v15  ;;  %vm4126_vm12 = vcmp.gt.f32.partialorder %v4984_v23, 0.0  ;;  %v4190_v39 = vmul.f32 0.01, %v4984_v23  ;;  %vm4128_vm13 = vcmp.gt.f32.partialorder %v5016_v9, 0.0 }
 0x398   :  { %v4497_v4 = vadd.f32 %v4496_v63, %v4412_v57  ;;  %v4476_v8 = vadd.f32 %v4475_v38, %v4411_v56  ;;  %v4253_v34 = vsel %vm4125_vm11, %v5015_v62, %v4189_v11  ;;  %v4192_v61 = vmul.f32 0.01, %v5016_v9  ;;  %v7908_v51 = vpop.f32.mrb[22].mxu0  ;;  %v7910_v50 = vpop.f32.mrb[22].mxu1 }
 0x399   :  { %v4413_v32 = vmul.f32 %v7857_v60, %v4253_v34  ;;  %v4254_v31 = vsel %vm4126_vm12, %v4984_v23, %v4190_v39  ;;  %v4985_v58 = vadd.f32 %v7848_v6, %v7831_v35  ;;  %v5017_v20 = vadd.f32 %v7850_v13, %v7831_v35  ;;  %v7917_v25 = vpop.f32.mrb[23].mxu0  ;;  %v7919_v21 = vpop.f32.mrb[23].mxu1 }
 0x39a   :  { %v4414_v29 = vmul.f32 %v7889_v30, %v4254_v31  ;;  %v4256_v1 = vsel %vm4128_vm13, %v5016_v9, %v4192_v61  ;;  %v4986_v10 = vadd.f32 %v7864_v45, %v7855_v27  ;;  %v5018_v60 = vadd.f32 %v7866_v40, %v7855_v27  ;;  %v7953_v57 = vpop.permute.xlu0 %895  ;;  %v4354_v56 = vpop.permute.xlu1 %4353 }
 0x39b   :  { %v4518_v6 = vadd.f32 %v4517_v52, %v4413_v32  ;;  %v4416_v44 = vmul.f32 %v7889_v30, %v4256_v1  ;;  %vm4127_vm14 = vcmp.gt.f32.partialorder %v4985_v58, 0.0  ;;  %v4191_v35 = vmul.f32 0.01, %v4985_v58 }
 0x39c   :  { %v4456_v13 = vadd.f32 %v4455_v19, %v4414_v29  ;;  %vm4129_vm15 = vcmp.gt.f32.partialorder %v5017_v20, 0.0  ;;  %v4193_v12 = vmul.f32 0.01, %v5017_v20  ;;  %vm4130_vm0 = vcmp.gt.f32.partialorder %v4986_v10, 0.0  ;;  %v7929_v37 = vpop.f32.mrb[24].mxu0  ;;  %v7931_v0 = vpop.f32.mrb[24].mxu1 }
 0x39d   :  { %v4498_v45 = vadd.f32 %v4497_v4, %v4416_v44  ;;  %v4255_v26 = vsel %vm4127_vm14, %v4985_v58, %v4191_v35  ;;  %v4194_v54 = vmul.f32 0.01, %v4986_v10  ;;  %vm4132_vm1 = vcmp.gt.f32.partialorder %v5018_v60, 0.0  ;;  %v7933_v40 = vpop.f32.mrb[25].mxu0  ;;  %v7935_v2 = vpop.f32.mrb[25].mxu1 }
 0x39e   :  { %v4415_v48 = vmul.f32 %v7889_v30, %v4255_v26  ;;  %v4257_v7 = vsel %vm4129_vm15, %v5017_v20, %v4193_v12  ;;  %v4196_v63 = vmul.f32 0.01, %v5018_v60  ;;  %v4987_v36 = vadd.f32 %v7868_v17, %v7855_v27 }
 0x39f   :  { %v4417_v43 = vmul.f32 %v7889_v30, %v4257_v7  ;;  %v4258_v38 = vsel %vm4130_vm0, %v4986_v10, %v4194_v54  ;;  %v5019_v28 = vadd.f32 %v7870_v47, %v7855_v27  ;;  %v4988_v49 = vadd.f32 %v7877_v33, %v7887_v46 }
 0x3a0   :  { %v4477_v52 = vadd.f32 %v4476_v8, %v4415_v48  ;;  %v4418_v55 = vmul.f32 %v4349_v18, %v4258_v38  ;;  %v4260_v62 = vsel %vm4132_vm1, %v5018_v60, %v4196_v63  ;;  %vm4131_vm2 = vcmp.gt.f32.partialorder %v4987_v36, 0.0  ;;  %v7945_v23 = vpop.f32.mrb[26].mxu0  ;;  %v7947_v15 = vpop.f32.mrb[26].mxu1 }
 0x3a1   :  { %v4519_v53 = vadd.f32 %v4518_v6, %v4417_v43  ;;  %v4420_v5 = vmul.f32 %v4349_v18, %v4260_v62  ;;  %v4195_v17 = vmul.f32 0.01, %v4987_v36  ;;  %vm4133_vm3 = vcmp.gt.f32.partialorder %v5019_v28, 0.0  ;;  %v7949_v30 = vpop.f32.mrb[27].mxu0  ;;  %v7951_v9 = vpop.f32.mrb[27].mxu1 }
 0x3a2   :  { %v4457_v27 = vadd.f32 %v4456_v13, %v4418_v55  ;;  %v4197_v47 = vmul.f32 0.01, %v5019_v28  ;;  %vm4134_vm4 = vcmp.gt.f32.partialorder %v4988_v49, 0.0  ;;  %v4198_v33 = vmul.f32 0.01, %v4988_v49 }
 0x3a3   :  { %v4499_v11 = vadd.f32 %v4498_v45, %v4420_v5  ;;  %v4259_v19 = vsel %vm4131_vm2, %v4987_v36, %v4195_v17  ;;  %v5020_v39 = vadd.f32 %v7879_v22, %v7887_v46  ;;  %v4989_v4 = vadd.f32 %v7882_v3, %v7887_v46 }
 0x3a4   :  { %v4419_v8 = vmul.f32 %v4349_v18, %v4259_v19  ;;  %v4261_v34 = vsel %vm4133_vm3, %v5019_v28, %v4197_v47  ;;  %v4262_v61 = vsel %vm4134_vm4, %v4988_v49, %v4198_v33  ;;  %v5021_v32 = vadd.f32 %v7884_v16, %v7887_v46  ;;  %v7962_v31 = vpop.f32.mrb[28].mxu0  ;;  %v7964_v58 = vpop.f32.mrb[28].mxu1 }
 0x3a5   :  { %v4421_v20 = vmul.f32 %v4349_v18, %v4261_v34  ;;  %v4422_v29 = vmul.f32 %v4354_v56, %v4262_v61  ;;  %vm4136_vm5 = vcmp.gt.f32.partialorder %v5020_v39, 0.0  ;;  %v4200_v1 = vmul.f32 0.01, %v5020_v39  ;;  %v7966_v10 = vpop.f32.mrb[29].mxu0  ;;  %v7968_v22 = vpop.f32.mrb[29].mxu1 }
 0x3a6   :  { %v4478_v60 = vadd.f32 %v4477_v52, %v4419_v8  ;;  %vm4135_vm6 = vcmp.gt.f32.partialorder %v4989_v4, 0.0  ;;  %v4199_v3 = vmul.f32 0.01, %v4989_v4  ;;  %vm4137_vm7 = vcmp.gt.f32.partialorder %v5021_v32, 0.0  ;;  %v4359_v49 = vpop.permute.xlu1 %4358 }
 0x3a7   :  { %v4520_v6 = vadd.f32 %v4519_v53, %v4421_v20  ;;  %v4458_v44 = vadd.f32 %v4457_v27, %v4422_v29  ;;  %v4264_v35 = vsel %vm4136_vm5, %v5020_v39, %v4200_v1  ;;  %v4201_v16 = vmul.f32 0.01, %v5021_v32 }
 0x3a8   :  { %v4424_v46 = vmul.f32 %v4354_v56, %v4264_v35  ;;  %v4263_v13 = vsel %vm4135_vm6, %v4989_v4, %v4199_v3  ;;  %v4990_v18 = vadd.f32 %v7895_v24, %v7926_v14  ;;  %v5022_v12 = vadd.f32 %v7897_v41, %v7926_v14  ;;  %v7974_v45 = vpop.f32.mrb[30].mxu0  ;;  %v7976_v26 = vpop.f32.mrb[30].mxu1 }
 0x3a9   :  { %v4423_v54 = vmul.f32 %v4354_v56, %v4263_v13  ;;  %v4265_v48 = vsel %vm4137_vm7, %v5021_v32, %v4201_v16  ;;  %v4991_v7 = vadd.f32 %v7902_v42, %v7926_v14  ;;  %v5023_v63 = vadd.f32 %v7904_v59, %v7926_v14  ;;  %v7982_v36 = vpop.f32.mrb[31].mxu0  ;;  %v7984_v43 = vpop.f32.mrb[31].mxu1 }
 0x3aa   :  { %v901_v24 = vpop.permute.xlu0 %900  ;;  %v4500_v38 = vadd.f32 %v4499_v11, %v4424_v46  ;;  %v4425_v28 = vmul.f32 %v4354_v56, %v4265_v48  ;;  %vm4138_vm8 = vcmp.gt.f32.partialorder %v4990_v18, 0.0  ;;  %v4202_v41 = vmul.f32 0.01, %v4990_v18  ;;  %v4364_v32 = vpop.permute.xlu1 %4363 }
 0x3ab   :  { %v4479_v52 = vadd.f32 %v4478_v60, %v4423_v54  ;;  %vm4140_vm9 = vcmp.gt.f32.partialorder %v5022_v12, 0.0  ;;  %v4204_v55 = vmul.f32 0.01, %v5022_v12  ;;  %vm4139_vm10 = vcmp.gt.f32.partialorder %v4991_v7, 0.0 }
 0x3ac   :  { %v4521_v62 = vadd.f32 %v4520_v6, %v4425_v28  ;;  %v4266_v53 = vsel %vm4138_vm8, %v4990_v18, %v4202_v41  ;;  %v4203_v42 = vmul.f32 0.01, %v4991_v7  ;;  %vm4141_vm11 = vcmp.gt.f32.partialorder %v5023_v63, 0.0 }
 0x3ad   :  { %v4426_v5 = vmul.f32 %v4359_v49, %v4266_v53  ;;  %v4268_v59 = vsel %vm4140_vm9, %v5022_v12, %v4204_v55  ;;  %v4205_v14 = vmul.f32 0.01, %v5023_v63  ;;  %v4992_v17 = vadd.f32 %v7908_v51, %v7953_v57 }
 0x3ae   :  { %v4428_v27 = vmul.f32 %v4359_v49, %v4268_v59  ;;  %v4267_v47 = vsel %vm4139_vm10, %v4991_v7, %v4203_v42  ;;  %v5024_v33 = vadd.f32 %v7910_v50, %v7953_v57  ;;  %v4993_v56 = vadd.f32 %v7917_v25, %v7953_v57  ;;  %v906_v4 = vpop.permute.xlu0 %905 }
 0x3af   :  { %v4459_v11 = vadd.f32 %v4458_v44, %v4426_v5  ;;  %v4427_v19 = vmul.f32 %v4359_v49, %v4267_v47  ;;  %v4269_v39 = vsel %vm4141_vm11, %v5023_v63, %v4205_v14  ;;  %vm4142_vm12 = vcmp.gt.f32.partialorder %v4992_v17, 0.0 }
 0x3b0   :  { %v4501_v8 = vadd.f32 %v4500_v38, %v4428_v27  ;;  %v4429_v34 = vmul.f32 %v4359_v49, %v4269_v39  ;;  %v4206_v61 = vmul.f32 0.01, %v4992_v17  ;;  %vm4144_vm13 = vcmp.gt.f32.partialorder %v5024_v33, 0.0 }
 0x3b1   :  { %v4480_v20 = vadd.f32 %v4479_v52, %v4427_v19  ;;  %v4208_v51 = vmul.f32 0.01, %v5024_v33  ;;  %vm4143_vm14 = vcmp.gt.f32.partialorder %v4993_v56, 0.0  ;;  %v4207_v29 = vmul.f32 0.01, %v4993_v56 }
 0x3b2   :  { %v4522_v1 = vadd.f32 %v4521_v62, %v4429_v34  ;;  %v4270_v60 = vsel %vm4142_vm12, %v4992_v17, %v4206_v61  ;;  %v5025_v50 = vadd.f32 %v7919_v21, %v7953_v57  ;;  %v4994_v25 = vadd.f32 %v7929_v37, %v901_v24  ;;  %v911_v54 = vpop.permute.xlu0 %910  ;;  %v4369_v57 = vpop.permute.xlu1 %4368 }
 0x3b3   :  { %v4430_v3 = vmul.f32 %v4364_v32, %v4270_v60  ;;  %v4272_v6 = vsel %vm4144_vm13, %v5024_v33, %v4208_v51  ;;  %v4271_v44 = vsel %vm4143_vm14, %v4993_v56, %v4207_v29  ;;  %v5026_v35 = vadd.f32 %v7931_v0, %v901_v24 }
 0x3b4   :  { %v4432_v16 = vmul.f32 %v4364_v32, %v4272_v6  ;;  %v4431_v46 = vmul.f32 %v4364_v32, %v4271_v44  ;;  %vm4145_vm15 = vcmp.gt.f32.partialorder %v5025_v50, 0.0  ;;  %v4209_v13 = vmul.f32 0.01, %v5025_v50 }
 0x3b5   :  { %v4460_v18 = vadd.f32 %v4459_v11, %v4430_v3  ;;  %vm4146_vm0 = vcmp.gt.f32.partialorder %v4994_v25, 0.0  ;;  %v4210_v12 = vmul.f32 0.01, %v4994_v25  ;;  %vm4148_vm1 = vcmp.gt.f32.partialorder %v5026_v35, 0.0 }
 0x3b6   :  { %v4502_v48 = vadd.f32 %v4501_v8, %v4432_v16  ;;  %v4481_v7 = vadd.f32 %v4480_v20, %v4431_v46  ;;  %v4273_v63 = vsel %vm4145_vm15, %v5025_v50, %v4209_v13  ;;  %v4212_v21 = vmul.f32 0.01, %v5026_v35  ;;  %v4374_v33 = vpop.permute.xlu1 %4373 }
 0x3b7   :  { %v4433_v37 = vmul.f32 %v4364_v32, %v4273_v63  ;;  %v4274_v38 = vsel %vm4146_vm0, %v4994_v25, %v4210_v12  ;;  %v4995_v28 = vadd.f32 %v7933_v40, %v901_v24  ;;  %v5027_v0 = vadd.f32 %v7935_v2, %v901_v24  ;;  %v916_v40 = vpop.permute.xlu0 %915 }
 0x3b8   :  { %v4434_v41 = vmul.f32 %v4369_v57, %v4274_v38  ;;  %v4276_v49 = vsel %vm4148_vm1, %v5026_v35, %v4212_v21  ;;  %v4996_v52 = vadd.f32 %v7945_v23, %v906_v4  ;;  %v5028_v55 = vadd.f32 %v7947_v15, %v906_v4 }
 0x3b9   :  { %v4523_v62 = vadd.f32 %v4522_v1, %v4433_v37  ;;  %v4436_v53 = vmul.f32 %v4369_v57, %v4276_v49  ;;  %vm4147_vm2 = vcmp.gt.f32.partialorder %v4995_v28, 0.0  ;;  %v4211_v42 = vmul.f32 0.01, %v4995_v28 }
 0x3ba   :  { %v4461_v5 = vadd.f32 %v4460_v18, %v4434_v41  ;;  %vm4149_vm3 = vcmp.gt.f32.partialorder %v5027_v0, 0.0  ;;  %v4213_v59 = vmul.f32 0.01, %v5027_v0  ;;  %vm4150_vm4 = vcmp.gt.f32.partialorder %v4996_v52, 0.0 }
 0x3bb   :  { %v4503_v14 = vadd.f32 %v4502_v48, %v4436_v53  ;;  %v4275_v17 = vsel %vm4147_vm2, %v4995_v28, %v4211_v42  ;;  %v4214_v27 = vmul.f32 0.01, %v4996_v52  ;;  %vm4152_vm5 = vcmp.gt.f32.partialorder %v5028_v55, 0.0 }
 0x3bc   :  { %v4435_v2 = vmul.f32 %v4369_v57, %v4275_v17  ;;  %v4277_v24 = vsel %vm4149_vm3, %v5027_v0, %v4213_v59  ;;  %v4216_v47 = vmul.f32 0.01, %v5028_v55  ;;  %v4997_v23 = vadd.f32 %v7949_v30, %v906_v4 }
 0x3bd   :  { %v4437_v15 = vmul.f32 %v4369_v57, %v4277_v24  ;;  %v4278_v56 = vsel %vm4150_vm4, %v4996_v52, %v4214_v27  ;;  %v5029_v11 = vadd.f32 %v7951_v9, %v906_v4  ;;  %v4998_v19 = vadd.f32 %v7962_v31, %v911_v54  ;;  %v4379_v4 = vpop.permute.xlu0 %4378  ;;  %v4384_v52 = vpop.permute.xlu1 %4383 }
 0x3be   :  { %v4482_v39 = vadd.f32 %v4481_v7, %v4435_v2  ;;  %v4438_v8 = vmul.f32 %v4374_v33, %v4278_v56  ;;  %v4280_v34 = vsel %vm4152_vm5, %v5028_v55, %v4216_v47  ;;  %vm4151_vm6 = vcmp.gt.f32.partialorder %v4997_v23, 0.0 }
 0x3bf   :  { %v4524_v61 = vadd.f32 %v4523_v62, %v4437_v15  ;;  %v4440_v32 = vmul.f32 %v4374_v33, %v4280_v34  ;;  %v4215_v20 = vmul.f32 0.01, %v4997_v23  ;;  %vm4153_vm7 = vcmp.gt.f32.partialorder %v5029_v11, 0.0 }
 0x3c0   :  { %v4462_v51 = vadd.f32 %v4461_v5, %v4438_v8  ;;  %v4217_v29 = vmul.f32 0.01, %v5029_v11  ;;  %vm4154_vm8 = vcmp.gt.f32.partialorder %v4998_v19, 0.0  ;;  %v4218_v1 = vmul.f32 0.01, %v4998_v19 }
 0x3c1   :  { %v4504_v30 = vadd.f32 %v4503_v14, %v4440_v32  ;;  %v4279_v60 = vsel %vm4151_vm6, %v4997_v23, %v4215_v20  ;;  %v5030_v50 = vadd.f32 %v7964_v58, %v911_v54  ;;  %v4999_v9 = vadd.f32 %v7966_v10, %v911_v54 }
 0x3c2   :  { %v4439_v31 = vmul.f32 %v4374_v33, %v4279_v60  ;;  %v4281_v25 = vsel %vm4153_vm7, %v5029_v11, %v4217_v29  ;;  %v4282_v3 = vsel %vm4154_vm8, %v4998_v19, %v4218_v1  ;;  %v5031_v6 = vadd.f32 %v7968_v22, %v911_v54 }
 0x3c3   :  { %v4441_v44 = vmul.f32 %v4374_v33, %v4281_v25  ;;  %v4442_v35 = vmul.f32 %v4379_v4, %v4282_v3  ;;  %vm4156_vm9 = vcmp.gt.f32.partialorder %v5030_v50, 0.0  ;;  %v4220_v16 = vmul.f32 0.01, %v5030_v50 }
 0x3c4   :  { %v4483_v46 = vadd.f32 %v4482_v39, %v4439_v31  ;;  %vm4155_vm10 = vcmp.gt.f32.partialorder %v4999_v9, 0.0  ;;  %v4219_v13 = vmul.f32 0.01, %v4999_v9  ;;  %vm4157_vm11 = vcmp.gt.f32.partialorder %v5031_v6, 0.0 }
 0x3c5   :  { %v4525_v18 = vadd.f32 %v4524_v61, %v4441_v44  ;;  %v4463_v12 = vadd.f32 %v4462_v51, %v4442_v35  ;;  %v4284_v48 = vsel %vm4156_vm9, %v5030_v50, %v4220_v16  ;;  %v4221_v58 = vmul.f32 0.01, %v5031_v6  ;;  %v4538_v51 = vpop.permute.xlu0 %4537 }
 0x3c6   :  { %v4444_v7 = vmul.f32 %v4379_v4, %v4284_v48  ;;  %v4283_v10 = vsel %vm4155_vm10, %v4999_v9, %v4219_v13  ;;  %v5000_v63 = vadd.f32 %v7974_v45, %v916_v40  ;;  %v5032_v21 = vadd.f32 %v7976_v26, %v916_v40  ;;  %v8795_v48 = vld [vmem:[#allocation3_spill] sm:$0xff] }
 0x3c7   :  { %v4443_v57 = vmul.f32 %v4379_v4, %v4283_v10  ;;  %v4285_v22 = vsel %vm4157_vm11, %v5031_v6, %v4221_v58  ;;  %v5001_v54 = vadd.f32 %v7982_v36, %v916_v40  ;;  %v5033_v37 = vadd.f32 %v7984_v43, %v916_v40 }
 0x3c8   :  { %v4505_v38 = vadd.f32 %v4504_v30, %v4444_v7  ;;  %v4445_v28 = vmul.f32 %v4379_v4, %v4285_v22  ;;  %vm4158_vm12 = vcmp.gt.f32.partialorder %v5000_v63, 0.0  ;;  %v4222_v0 = vmul.f32 0.01, %v5000_v63  ;;  %v8794_v4 = vld [vmem:[#allocation4_spill] sm:$0xff] }
 0x3c9   :  { %v4484_v41 = vadd.f32 %v4483_v46, %v4443_v57  ;;  %vm4160_vm13 = vcmp.gt.f32.partialorder %v5032_v21, 0.0  ;;  %v4224_v49 = vmul.f32 0.01, %v5032_v21  ;;  %vm4159_vm14 = vcmp.gt.f32.partialorder %v5001_v54, 0.0 }
 0x3ca   :  { %v4526_v55 = vadd.f32 %v4525_v18, %v4445_v28  ;;  %v4286_v62 = vsel %vm4158_vm12, %v5000_v63, %v4222_v0  ;;  %v4223_v45 = vmul.f32 0.01, %v5001_v54  ;;  %vm4161_vm15 = vcmp.gt.f32.partialorder %v5033_v37, 0.0 }
 0x3cb   :  { %v4446_v26 = vmul.f32 %v4384_v52, %v4286_v62  ;;  %v4288_v53 = vsel %vm4160_vm13, %v5032_v21, %v4224_v49  ;;  %v4225_v42 = vmul.f32 0.01, %v5033_v37  ;;  %v5379_v32 = vmov 1966171168  }
 0x3cc   :  { %v4448_v5 = vmul.f32 %v4384_v52, %v4288_v53  ;;  %v4287_v36 = vsel %vm4159_vm14, %v5001_v54, %v4223_v45  ;;  %v4555_v20 = vunpack.c.l.s4 %v5379_v32  ;;  %v4543_v31 = vrot.slane %v4538_v51, %v8794_v4 }
 0x3cd   :  { %v4464_v59 = vadd.f32 %v4463_v12, %v4446_v26  ;;  %v4447_v43 = vmul.f32 %v4384_v52, %v4287_v36  ;;  %v4289_v14 = vsel %vm4161_vm15, %v5033_v37, %v4225_v42  ;;  %v8796_v54 = vlaneseq }
 0x3ce   :  { %v4506_v17 = vadd.f32 %v4505_v38, %v4448_v5  ;;  %v4449_v27 = vmul.f32 %v4384_v52, %v4289_v14  ;;  %v4556_v6 = vunpack.c.0.s8 %v4555_v20 }
 0x3cf   :  { %v4465_v40 = vrot.slane %v4464_v59, 4  ;;  %v4485_v2 = vadd.f32 %v4484_v41, %v4447_v43  ;;  %vm4579_vm0 = vcmp.lt.s32.totalorder %v8796_v54, 512 }
 0x3d0   :  { %v4507_v24 = vrot.slane %v4506_v17, 4  ;;  %v4527_v47 = vadd.f32 %v4526_v55, %v4449_v27  ;;  %v4559_v58 = vsub.s32 %v4556_v6, %v8795_v48 }
 0x3d1   :  { %v4466_v23 = vadd.f32 %v4465_v40, %v4464_v59  ;;  %v4486_v33 = vrot.slane %v4485_v2, 4 }
 0x3d2   :  { %v4508_v15 = vadd.f32 %v4507_v24, %v4506_v17  ;;  %v4528_v56 = vrot.slane %v4527_v47, 4 }
 0x3d3   :  { %v4467_v11 = vrot.slane %v4466_v23, 2  ;;  %v4487_v19 = vadd.f32 %v4486_v33, %v4485_v2 }
 0x3d4   :  { %v4509_v39 = vrot.slane %v4508_v15, 2  ;;  %v4529_v8 = vadd.f32 %v4528_v56, %v4527_v47 }
 0x3d5   :  { %v4468_v34 = vadd.f32 %v4467_v11, %v4466_v23  ;;  %v4488_v61 = vrot.slane %v4487_v19, 2 }
 0x3d6   :  { %v4510_v29 = vadd.f32 %v4509_v39, %v4508_v15  ;;  %v4530_v1 = vrot.slane %v4529_v8, 2 }
 0x3d7   :  { %v4469_v30 = vrot.slane %v4468_v34, 1  ;;  %v4489_v60 = vadd.f32 %v4488_v61, %v4487_v19 }
 0x3d8   :  { %v4511_v50 = vrot.slane %v4510_v29, 1  ;;  %v4531_v9 = vadd.f32 %v4530_v1, %v4529_v8 }
 0x3d9   :  { %v4470_v25 = vadd.f32 %v4469_v30, %v4468_v34  ;;  %v4490_v3 = vrot.slane %v4489_v60, 1 }
 0x3da   :  { %v4512_v44 = vadd.f32 %v4511_v50, %v4510_v29  ;;  %v4532_v35 = vrot.slane %v4531_v9, 1 }
 0x3db   :  { %v4544_v16 = vadd.f32 %v4543_v31, %v4470_v25  ;;  %v4491_v46 = vadd.f32 %v4490_v3, %v4489_v60 }
 0x3dc   :  { %v4546_v13 = vadd.f32 %v4543_v31, %v4512_v44  ;;  %v4533_v18 = vadd.f32 %v4532_v35, %v4531_v9 }
 0x3dd   :  { %v4545_v12 = vadd.f32 %v4543_v31, %v4491_v46 }
 0x3de   :  { %v4547_v7 = vadd.f32 %v4543_v31, %v4533_v18 }
 0x3df   :  { %v4552_v10 = vcombine.low %v4544_v16, %v4545_v12 }
 0x3e0   :  { %v4553_v63 = vcombine.low %v4546_v13, %v4547_v7 }
 0x3e1   :  { %v4560_v21 = vrot.slane %v4552_v10, %v4559_v58 }
 0x3e2   :  { %v4567_v57 = vrot.slane %v4553_v63, %v4559_v58 }
 0x3e4   :  { %v4568_v22 = vcombine.low %v4560_v21, %v4567_v57 }
 0x3e6   :  { %v4575_v37 = vrot.slane %v4568_v22, %v4559_v58 }
 0x3e8   :  { %4581 = vst.msk [vmem:[%s8023_s7] sm:$0xf] %vm4579_vm0, %v4575_v37 }

</bundles_post_ra>
